<compile_context>
chip_gen: v6e
topology: v6e:2x2x1
jax: 0.10.0
libtpu: 0.0.40
codegen_flags: <defaults>
</compile_context>

<pallas_src>
import jax
import jax.numpy as jnp
from jax.experimental import pallas as pl
from jax.experimental.pallas import tpu as pltpu


def _silu(y):
    # TODO(synk): pl.reciprocal(1 + exp(-y), approx=True) would move the divide to
    # the EUP (~1e-3 rel. error); kept exact here to match the fp32 reference.
    return y * jax.nn.sigmoid(y)


def _gsconv_kernel(w1_ref, b1_ref, w2_ref, b2_ref, x_ref, o_ref, x1p_ref):
    """Fused GSConv: 1x1 conv+BN+SiLU -> DW 5x5+BN+SiLU -> concat + shuffle.

    w1_ref : SMEM (C_, C1)        pointwise weights with BN1 scale folded in
    b1_ref : SMEM (C_,)           folded BN1 bias
    w2_ref : SMEM (C_, 25)        depthwise 5x5 weights (row-major), BN2 scale folded
    b2_ref : SMEM (C_,)           folded BN2 bias
    x_ref  : VMEM (1, C1, H, W)   full-H input slab (resident across row tiles)
    o_ref  : VMEM (1, C2, TH, W)  shuffled output tile
    x1p_ref: VMEM (C_, TH+4, W+4) zero-padded x1 scratch (halo for the DW conv)
    """
    t = pl.program_id(1)
    nt = pl.num_programs(1)
    _, C1, H, W = x_ref.shape
    _, C2, TH, _ = o_ref.shape
    C_ = C2 // 2
    r0 = pl.multiple_of(t * TH, TH)          # first output row of this tile

    # Zero the scratch: unwritten border rows/cols provide the DW zero padding.
    x1p_ref[...] = jnp.zeros_like(x1p_ref)

    def pw_block(row_start, nrows, dst_row):
        # 1x1 conv as a VPU broadcast-MAC (+ bias, SiLU); writes scratch rows
        # [dst_row, dst_row + nrows), cols [2, 2 + W).
        for c in range(C_):
            acc = jnp.full((nrows, W), b1_ref[c], dtype=jnp.float32)
            for i in range(C1):
                acc = acc + w1_ref[c, i] * x_ref[0, i, pl.ds(row_start, nrows), :]
            x1p_ref[c, dst_row:dst_row + nrows, 2:2 + W] = _silu(acc)

    pw_block(r0, TH, 2)                      # tile interior rows (always in-bounds)

    @pl.when(t > 0)
    def _top_halo():                         # 2 rows above the tile
        pw_block(r0 - 2, 2, 0)

    @pl.when(t < nt - 1)
    def _bottom_halo():                      # 2 rows below the tile
        pw_block(r0 + TH, 2, TH + 2)

    # Invert "concat then take even channels, then odd channels":
    # x2 channel s lands at output channel out_pos(s).
    def out_pos(s):
        return s // 2 if s % 2 == 0 else C_ + s // 2

    for c in range(C_):
        # Pass-through branch: x1 channel c goes straight to its shuffled slot.
        o_ref[0, out_pos(c), :, :] = x1p_ref[c, 2:2 + TH, 2:2 + W]

        # Depthwise 5x5 over the zero-padded scratch (+ bias, SiLU).
        acc = jnp.full((TH, W), b2_ref[c], dtype=jnp.float32)
        for dy in range(5):
            slab = x1p_ref[c, dy:dy + TH, :]          # (TH, W+4), loaded once per dy
            for dx in range(5):
                acc = acc + w2_ref[c, dy * 5 + dx] * slab[:, dx:dx + W]
        o_ref[0, out_pos(C_ + c), :, :] = _silu(acc)


def fold_bn(gamma, beta, mean, var, eps=1e-3):
    # ultralytics Conv uses BatchNorm2d(eps=1e-3).
    scale = gamma / jnp.sqrt(var + eps)
    bias = beta - mean * scale
    return scale.astype(jnp.float32), bias.astype(jnp.float32)


def _pick_tile_h(H, tile_h):
    # Row-tile height: multiple of 8 (sublane) dividing H, else the full H.
    if H % tile_h == 0 and tile_h % 8 == 0:
        return tile_h
    return H


def gsconv_forward(x_nchw, params, *, tile_h=8):
    """GSConv forward. x_nchw: (B, C1, H, W) float32 -> (B, 2*c_, H, W) float32."""
    B, C1, H, W = x_nchw.shape
    C_ = params["w1"].shape[1]
    C2 = 2 * C_
    TH = _pick_tile_h(H, tile_h)
    NT = H // TH

    # Fold BN scales into the conv weights (trace-time, free).
    w1f = jnp.transpose(params["w1"] * params["s1"][None, :], (1, 0))            # (C_, C1)
    w2f = jnp.transpose(params["w2"] * params["s2"][None, None, :], (2, 0, 1))   # (C_, 5, 5)
    w2f = w2f.reshape(C_, 25)
    b1 = params["b1"].astype(jnp.float32)
    b2 = params["b2"].astype(jnp.float32)
    x = x_nchw.astype(jnp.float32)

    smem = pl.BlockSpec(memory_space=pltpu.MemorySpace.SMEM)
    return pl.pallas_call(
        _gsconv_kernel,
        out_shape=jax.ShapeDtypeStruct((B, C2, H, W), jnp.float32),
        grid_spec=pltpu.PrefetchScalarGridSpec(
            num_scalar_prefetch=0,
            grid=(B, NT),
            in_specs=[
                smem,                                                    # w1f
                smem,                                                    # b1
                smem,                                                    # w2f
                smem,                                                    # b2
                pl.BlockSpec((1, C1, H, W), lambda b, t: (b, 0, 0, 0)),  # x slab
            ],
            out_specs=pl.BlockSpec((1, C2, TH, W), lambda b, t: (b, 0, t, 0)),
            scratch_shapes=[pltpu.VMEM((C_, TH + 4, W + 4), jnp.float32)],
        ),
        compiler_params=pltpu.CompilerParams(
            dimension_semantics=("parallel", "parallel"),
            vmem_limit_bytes=64 * 1024 * 1024,
        ),
    )(w1f, b1, w2f, b2, x)


# ----------------------------------------------------------------------------
# Pure-JAX reference (mirrors the PyTorch module, NCHW) and parameter builder
# ----------------------------------------------------------------------------
def gsconv_ref(x, params):
    B, C1, H, W = x.shape
    w1, s1, b1 = params["w1"], params["s1"], params["b1"]
    w2, s2, b2 = params["w2"], params["s2"], params["b2"]
    y1 = jnp.einsum("bihw,ic->bchw", x, w1)
    y1 = y1 * s1[None, :, None, None] + b1[None, :, None, None]
    x1 = y1 * jax.nn.sigmoid(y1)
    x1p = jnp.pad(x1, ((0, 0), (0, 0), (2, 2), (2, 2)))
    acc = jnp.zeros_like(x1)
    for dy in range(5):
        for dx in range(5):
            acc = acc + x1p[:, :, dy:dy + H, dx:dx + W] * w2[dy, dx, :][None, :, None, None]
    y2 = acc * s2[None, :, None, None] + b2[None, :, None, None]
    dw = y2 * jax.nn.sigmoid(y2)
    x2 = jnp.concatenate([x1, dw], axis=1)
    return jnp.concatenate([x2[:, 0::2], x2[:, 1::2]], axis=1)


def make_params(key, c1, c2):
    c_ = c2 // 2
    k1, k2 = jax.random.split(key)
    # cv1 conv weight: PyTorch (c_, c1, 1, 1) -> ours (c1, c_)
    w1 = 0.1 * jax.random.normal(k1, (c1, c_), jnp.float32)
    # cv2 depthwise weight: PyTorch (c_, 1, 5, 5) -> ours (5, 5, c_)
    w2 = 0.1 * jax.random.normal(k2, (5, 5, c_), jnp.float32)
    # deterministic (eval-mode) BatchNorm parameters, folded into scale/bias
    ar = jnp.arange(c_, dtype=jnp.float32)
    s1, b1 = fold_bn(1.0 + 0.10 * ar, 0.05 * ar, 0.01 * ar, 1.0 + 0.02 * ar)
    s2, b2 = fold_bn(1.0 - 0.05 * ar, -0.02 * ar, 0.03 * ar, 1.0 + 0.01 * ar)
    return {"w1": w1, "s1": s1, "b1": b1, "w2": w2, "s2": s2, "b2": b2}


if __name__ == "__main__":
    key = jax.random.PRNGKey(0)
    kx, kp = jax.random.split(key)

    B, C1, C2, H, W = 2, 4, 8, 16, 16
    x = jax.random.normal(kx, (B, C1, H, W), jnp.float32)
    params = make_params(kp, C1, C2)

    out = jax.block_until_ready(gsconv_forward(x, params))
    assert out.shape == (B, C2, H, W), out.shape

    ref = jax.block_until_ready(gsconv_ref(x, params))
    if not bool(jnp.allclose(out, ref, rtol=1e-4, atol=1e-4)):
        raise AssertionError(
            f"mismatch vs reference: max abs err = {float(jnp.max(jnp.abs(out - ref)))}")
    print("KERNEL_OK")
</pallas_src>

<mosaic_0001>
module attributes {stable_mosaic.version = 11 : i64} {
  func.func @_gsconv_kernel(%arg0: i32, %arg1: i32, %arg2: memref<4x4xf32, #tpu.memory_space<smem>>, %arg3: memref<4xf32, #tpu.memory_space<smem>>, %arg4: memref<4x25xf32, #tpu.memory_space<smem>>, %arg5: memref<4xf32, #tpu.memory_space<smem>>, %arg6: memref<1x4x16x16xf32, #tpu.memory_space<vmem>>, %arg7: memref<1x8x8x16xf32, #tpu.memory_space<vmem>>, %arg8: memref<4x12x20xf32, #tpu.memory_space<vmem>>) attributes {dimension_semantics = [#tpu.dimension_semantics<parallel>, #tpu.dimension_semantics<parallel>], iteration_bounds = array<i64: 2, 2>, scalar_prefetch = 0 : i64, scratch_operands = 1 : i64, tpu.core_type = #tpu.core_type<tc>, window_params = [{transform_indices = @transform_0, window_bounds = array<i64: 4, 4>}, {transform_indices = @transform_1, window_bounds = array<i64: 4>}, {transform_indices = @transform_2, window_bounds = array<i64: 4, 25>}, {transform_indices = @transform_3, window_bounds = array<i64: 4>}, {transform_indices = @transform_4, window_bounds = array<i64: 1, 4, 16, 16>}, {transform_indices = @transform_5, window_bounds = array<i64: 1, 8, 8, 16>}]} {
    %c8_i32 = arith.constant 8 : i32
    %0 = arith.muli %arg1, %c8_i32 : i32
    %1 = tpu.assume_multiple %0, 8 : i32
    %cst = arith.constant 0.000000e+00 : f32
    %2 = vector.broadcast %cst : f32 to vector<4x12x20xf32>
    %c0 = arith.constant 0 : index
    %c0_0 = arith.constant 0 : index
    %c0_1 = arith.constant 0 : index
    %3 = vector.load %arg8[%c0, %c0_0, %c0_1] : memref<4x12x20xf32, #tpu.memory_space<vmem>>, vector<4x12x20xf32>
    tpu.vector_store %arg8[%c0, %c0_0, %c0_1], %2 {strides = array<i32>} : memref<4x12x20xf32, #tpu.memory_space<vmem>>, vector<4x12x20xf32>,
    %c0_2 = arith.constant 0 : index
    %4 = memref.load %arg3[%c0_2] : memref<4xf32, #tpu.memory_space<smem>>
    %5 = vector.broadcast %4 : f32 to vector<8x16xf32>
    %c0_3 = arith.constant 0 : index
    %c0_4 = arith.constant 0 : index
    %6 = memref.load %arg2[%c0_3, %c0_4] : memref<4x4xf32, #tpu.memory_space<smem>>
    %c0_5 = arith.constant 0 : index
    %c0_6 = arith.constant 0 : index
    %7 = arith.index_cast %1 : i32 to index
    %c0_7 = arith.constant 0 : index
    %8 = vector.load %arg6[%c0_5, %c0_6, %7, %c0_7] : memref<1x4x16x16xf32, #tpu.memory_space<vmem>>, vector<1x1x8x16xf32>
    %9 = vector.shape_cast %8 : vector<1x1x8x16xf32> to vector<8x16xf32>
    %10 = vector.broadcast %6 : f32 to vector<8x16xf32>
    %11 = arith.mulf %10, %9 : vector<8x16xf32>
    %12 = arith.addf %5, %11 : vector<8x16xf32>
    %c0_8 = arith.constant 0 : index
    %c1 = arith.constant 1 : index
    %13 = memref.load %arg2[%c0_8, %c1] : memref<4x4xf32, #tpu.memory_space<smem>>
    %c0_9 = arith.constant 0 : index
    %c1_10 = arith.constant 1 : index
    %14 = arith.index_cast %1 : i32 to index
    %c0_11 = arith.constant 0 : index
    %15 = vector.load %arg6[%c0_9, %c1_10, %14, %c0_11] : memref<1x4x16x16xf32, #tpu.memory_space<vmem>>, vector<1x1x8x16xf32>
    %16 = vector.shape_cast %15 : vector<1x1x8x16xf32> to vector<8x16xf32>
    %17 = vector.broadcast %13 : f32 to vector<8x16xf32>
    %18 = arith.mulf %17, %16 : vector<8x16xf32>
    %19 = arith.addf %12, %18 : vector<8x16xf32>
    %c0_12 = arith.constant 0 : index
    %c2 = arith.constant 2 : index
    %20 = memref.load %arg2[%c0_12, %c2] : memref<4x4xf32, #tpu.memory_space<smem>>
    %c0_13 = arith.constant 0 : index
    %c2_14 = arith.constant 2 : index
    %21 = arith.index_cast %1 : i32 to index
    %c0_15 = arith.constant 0 : index
    %22 = vector.load %arg6[%c0_13, %c2_14, %21, %c0_15] : memref<1x4x16x16xf32, #tpu.memory_space<vmem>>, vector<1x1x8x16xf32>
    %23 = vector.shape_cast %22 : vector<1x1x8x16xf32> to vector<8x16xf32>
    %24 = vector.broadcast %20 : f32 to vector<8x16xf32>
    %25 = arith.mulf %24, %23 : vector<8x16xf32>
    %26 = arith.addf %19, %25 : vector<8x16xf32>
    %c0_16 = arith.constant 0 : index
    %c3 = arith.constant 3 : index
    %27 = memref.load %arg2[%c0_16, %c3] : memref<4x4xf32, #tpu.memory_space<smem>>
    %c0_17 = arith.constant 0 : index
    %c3_18 = arith.constant 3 : index
    %28 = arith.index_cast %1 : i32 to index
    %c0_19 = arith.constant 0 : index
    %29 = vector.load %arg6[%c0_17, %c3_18, %28, %c0_19] : memref<1x4x16x16xf32, #tpu.memory_space<vmem>>, vector<1x1x8x16xf32>
    %30 = vector.shape_cast %29 : vector<1x1x8x16xf32> to vector<8x16xf32>
    %31 = vector.broadcast %27 : f32 to vector<8x16xf32>
    %32 = arith.mulf %31, %30 : vector<8x16xf32>
    %33 = arith.addf %26, %32 : vector<8x16xf32>
    %34 = arith.negf %33 : vector<8x16xf32>
    %35 = math.exp %34 : vector<8x16xf32>
    %cst_20 = arith.constant 1.000000e+00 : f32
    %36 = vector.broadcast %cst_20 : f32 to vector<8x16xf32>
    %37 = arith.addf %36, %35 : vector<8x16xf32>
    %38 = arith.divf %36, %37 : vector<8x16xf32>
    %39 = arith.mulf %33, %38 : vector<8x16xf32>
    %c0_21 = arith.constant 0 : index
    %c2_22 = arith.constant 2 : index
    %c2_23 = arith.constant 2 : index
    %40 = vector.load %arg8[%c0_21, %c2_22, %c2_23] : memref<4x12x20xf32, #tpu.memory_space<vmem>>, vector<1x8x16xf32>
    %41 = vector.shape_cast %40 : vector<1x8x16xf32> to vector<8x16xf32>
    %42 = vector.shape_cast %39 : vector<8x16xf32> to vector<1x8x16xf32>
    tpu.vector_store %arg8[%c0_21, %c2_22, %c2_23], %42 {strides = array<i32>} : memref<4x12x20xf32, #tpu.memory_space<vmem>>, vector<1x8x16xf32>,
    %c1_24 = arith.constant 1 : index
    %43 = memref.load %arg3[%c1_24] : memref<4xf32, #tpu.memory_space<smem>>
    %44 = vector.broadcast %43 : f32 to vector<8x16xf32>
    %c1_25 = arith.constant 1 : index
    %c0_26 = arith.constant 0 : index
    %45 = memref.load %arg2[%c1_25, %c0_26] : memref<4x4xf32, #tpu.memory_space<smem>>
    %c0_27 = arith.constant 0 : index
    %c0_28 = arith.constant 0 : index
    %46 = arith.index_cast %1 : i32 to index
    %c0_29 = arith.constant 0 : index
    %47 = vector.load %arg6[%c0_27, %c0_28, %46, %c0_29] : memref<1x4x16x16xf32, #tpu.memory_space<vmem>>, vector<1x1x8x16xf32>
    %48 = vector.shape_cast %47 : vector<1x1x8x16xf32> to vector<8x16xf32>
    %49 = vector.broadcast %45 : f32 to vector<8x16xf32>
    %50 = arith.mulf %49, %48 : vector<8x16xf32>
    %51 = arith.addf %44, %50 : vector<8x16xf32>
    %c1_30 = arith.constant 1 : index
    %c1_31 = arith.constant 1 : index
    %52 = memref.load %arg2[%c1_30, %c1_31] : memref<4x4xf32, #tpu.memory_space<smem>>
    %c0_32 = arith.constant 0 : index
    %c1_33 = arith.constant 1 : index
    %53 = arith.index_cast %1 : i32 to index
    %c0_34 = arith.constant 0 : index
    %54 = vector.load %arg6[%c0_32, %c1_33, %53, %c0_34] : memref<1x4x16x16xf32, #tpu.memory_space<vmem>>, vector<1x1x8x16xf32>
    %55 = vector.shape_cast %54 : vector<1x1x8x16xf32> to vector<8x16xf32>
    %56 = vector.broadcast %52 : f32 to vector<8x16xf32>
    %57 = arith.mulf %56, %55 : vector<8x16xf32>
    %58 = arith.addf %51, %57 : vector<8x16xf32>
    %c1_35 = arith.constant 1 : index
    %c2_36 = arith.constant 2 : index
    %59 = memref.load %arg2[%c1_35, %c2_36] : memref<4x4xf32, #tpu.memory_space<smem>>
    %c0_37 = arith.constant 0 : index
    %c2_38 = arith.constant 2 : index
    %60 = arith.index_cast %1 : i32 to index
    %c0_39 = arith.constant 0 : index
    %61 = vector.load %arg6[%c0_37, %c2_38, %60, %c0_39] : memref<1x4x16x16xf32, #tpu.memory_space<vmem>>, vector<1x1x8x16xf32>
    %62 = vector.shape_cast %61 : vector<1x1x8x16xf32> to vector<8x16xf32>
    %63 = vector.broadcast %59 : f32 to vector<8x16xf32>
    %64 = arith.mulf %63, %62 : vector<8x16xf32>
    %65 = arith.addf %58, %64 : vector<8x16xf32>
    %c1_40 = arith.constant 1 : index
    %c3_41 = arith.constant 3 : index
    %66 = memref.load %arg2[%c1_40, %c3_41] : memref<4x4xf32, #tpu.memory_space<smem>>
    %c0_42 = arith.constant 0 : index
    %c3_43 = arith.constant 3 : index
    %67 = arith.index_cast %1 : i32 to index
    %c0_44 = arith.constant 0 : index
    %68 = vector.load %arg6[%c0_42, %c3_43, %67, %c0_44] : memref<1x4x16x16xf32, #tpu.memory_space<vmem>>, vector<1x1x8x16xf32>
    %69 = vector.shape_cast %68 : vector<1x1x8x16xf32> to vector<8x16xf32>
    %70 = vector.broadcast %66 : f32 to vector<8x16xf32>
    %71 = arith.mulf %70, %69 : vector<8x16xf32>
    %72 = arith.addf %65, %71 : vector<8x16xf32>
    %73 = arith.negf %72 : vector<8x16xf32>
    %74 = math.exp %73 : vector<8x16xf32>
    %cst_45 = arith.constant 1.000000e+00 : f32
    %75 = vector.broadcast %cst_45 : f32 to vector<8x16xf32>
    %76 = arith.addf %75, %74 : vector<8x16xf32>
    %77 = arith.divf %75, %76 : vector<8x16xf32>
    %78 = arith.mulf %72, %77 : vector<8x16xf32>
    %c1_46 = arith.constant 1 : index
    %c2_47 = arith.constant 2 : index
    %c2_48 = arith.constant 2 : index
    %79 = vector.load %arg8[%c1_46, %c2_47, %c2_48] : memref<4x12x20xf32, #tpu.memory_space<vmem>>, vector<1x8x16xf32>
    %80 = vector.shape_cast %79 : vector<1x8x16xf32> to vector<8x16xf32>
    %81 = vector.shape_cast %78 : vector<8x16xf32> to vector<1x8x16xf32>
    tpu.vector_store %arg8[%c1_46, %c2_47, %c2_48], %81 {strides = array<i32>} : memref<4x12x20xf32, #tpu.memory_space<vmem>>, vector<1x8x16xf32>,
    %c2_49 = arith.constant 2 : index
    %82 = memref.load %arg3[%c2_49] : memref<4xf32, #tpu.memory_space<smem>>
    %83 = vector.broadcast %82 : f32 to vector<8x16xf32>
    %c2_50 = arith.constant 2 : index
    %c0_51 = arith.constant 0 : index
    %84 = memref.load %arg2[%c2_50, %c0_51] : memref<4x4xf32, #tpu.memory_space<smem>>
    %c0_52 = arith.constant 0 : index
    %c0_53 = arith.constant 0 : index
    %85 = arith.index_cast %1 : i32 to index
    %c0_54 = arith.constant 0 : index
    %86 = vector.load %arg6[%c0_52, %c0_53, %85, %c0_54] : memref<1x4x16x16xf32, #tpu.memory_space<vmem>>, vector<1x1x8x16xf32>
    %87 = vector.shape_cast %86 : vector<1x1x8x16xf32> to vector<8x16xf32>
    %88 = vector.broadcast %84 : f32 to vector<8x16xf32>
    %89 = arith.mulf %88, %87 : vector<8x16xf32>
    %90 = arith.addf %83, %89 : vector<8x16xf32>
    %c2_55 = arith.constant 2 : index
    %c1_56 = arith.constant 1 : index
    %91 = memref.load %arg2[%c2_55, %c1_56] : memref<4x4xf32, #tpu.memory_space<smem>>
    %c0_57 = arith.constant 0 : index
    %c1_58 = arith.constant 1 : index
    %92 = arith.index_cast %1 : i32 to index
    %c0_59 = arith.constant 0 : index
    %93 = vector.load %arg6[%c0_57, %c1_58, %92, %c0_59] : memref<1x4x16x16xf32, #tpu.memory_space<vmem>>, vector<1x1x8x16xf32>
    %94 = vector.shape_cast %93 : vector<1x1x8x16xf32> to vector<8x16xf32>
    %95 = vector.broadcast %91 : f32 to vector<8x16xf32>
    %96 = arith.mulf %95, %94 : vector<8x16xf32>
    %97 = arith.addf %90, %96 : vector<8x16xf32>
    %c2_60 = arith.constant 2 : index
    %c2_61 = arith.constant 2 : index
    %98 = memref.load %arg2[%c2_60, %c2_61] : memref<4x4xf32, #tpu.memory_space<smem>>
    %c0_62 = arith.constant 0 : index
    %c2_63 = arith.constant 2 : index
    %99 = arith.index_cast %1 : i32 to index
    %c0_64 = arith.constant 0 : index
    %100 = vector.load %arg6[%c0_62, %c2_63, %99, %c0_64] : memref<1x4x16x16xf32, #tpu.memory_space<vmem>>, vector<1x1x8x16xf32>
    %101 = vector.shape_cast %100 : vector<1x1x8x16xf32> to vector<8x16xf32>
    %102 = vector.broadcast %98 : f32 to vector<8x16xf32>
    %103 = arith.mulf %102, %101 : vector<8x16xf32>
    %104 = arith.addf %97, %103 : vector<8x16xf32>
    %c2_65 = arith.constant 2 : index
    %c3_66 = arith.constant 3 : index
    %105 = memref.load %arg2[%c2_65, %c3_66] : memref<4x4xf32, #tpu.memory_space<smem>>
    %c0_67 = arith.constant 0 : index
    %c3_68 = arith.constant 3 : index
    %106 = arith.index_cast %1 : i32 to index
    %c0_69 = arith.constant 0 : index
    %107 = vector.load %arg6[%c0_67, %c3_68, %106, %c0_69] : memref<1x4x16x16xf32, #tpu.memory_space<vmem>>, vector<1x1x8x16xf32>
    %108 = vector.shape_cast %107 : vector<1x1x8x16xf32> to vector<8x16xf32>
    %109 = vector.broadcast %105 : f32 to vector<8x16xf32>
    %110 = arith.mulf %109, %108 : vector<8x16xf32>
    %111 = arith.addf %104, %110 : vector<8x16xf32>
    %112 = arith.negf %111 : vector<8x16xf32>
    %113 = math.exp %112 : vector<8x16xf32>
    %cst_70 = arith.constant 1.000000e+00 : f32
    %114 = vector.broadcast %cst_70 : f32 to vector<8x16xf32>
    %115 = arith.addf %114, %113 : vector<8x16xf32>
    %116 = arith.divf %114, %115 : vector<8x16xf32>
    %117 = arith.mulf %111, %116 : vector<8x16xf32>
    %c2_71 = arith.constant 2 : index
    %c2_72 = arith.constant 2 : index
    %c2_73 = arith.constant 2 : index
    %118 = vector.load %arg8[%c2_71, %c2_72, %c2_73] : memref<4x12x20xf32, #tpu.memory_space<vmem>>, vector<1x8x16xf32>
    %119 = vector.shape_cast %118 : vector<1x8x16xf32> to vector<8x16xf32>
    %120 = vector.shape_cast %117 : vector<8x16xf32> to vector<1x8x16xf32>
    tpu.vector_store %arg8[%c2_71, %c2_72, %c2_73], %120 {strides = array<i32>} : memref<4x12x20xf32, #tpu.memory_space<vmem>>, vector<1x8x16xf32>,
    %c3_74 = arith.constant 3 : index
    %121 = memref.load %arg3[%c3_74] : memref<4xf32, #tpu.memory_space<smem>>
    %122 = vector.broadcast %121 : f32 to vector<8x16xf32>
    %c3_75 = arith.constant 3 : index
    %c0_76 = arith.constant 0 : index
    %123 = memref.load %arg2[%c3_75, %c0_76] : memref<4x4xf32, #tpu.memory_space<smem>>
    %c0_77 = arith.constant 0 : index
    %c0_78 = arith.constant 0 : index
    %124 = arith.index_cast %1 : i32 to index
    %c0_79 = arith.constant 0 : index
    %125 = vector.load %arg6[%c0_77, %c0_78, %124, %c0_79] : memref<1x4x16x16xf32, #tpu.memory_space<vmem>>, vector<1x1x8x16xf32>
    %126 = vector.shape_cast %125 : vector<1x1x8x16xf32> to vector<8x16xf32>
    %127 = vector.broadcast %123 : f32 to vector<8x16xf32>
    %128 = arith.mulf %127, %126 : vector<8x16xf32>
    %129 = arith.addf %122, %128 : vector<8x16xf32>
    %c3_80 = arith.constant 3 : index
    %c1_81 = arith.constant 1 : index
    %130 = memref.load %arg2[%c3_80, %c1_81] : memref<4x4xf32, #tpu.memory_space<smem>>
    %c0_82 = arith.constant 0 : index
    %c1_83 = arith.constant 1 : index
    %131 = arith.index_cast %1 : i32 to index
    %c0_84 = arith.constant 0 : index
    %132 = vector.load %arg6[%c0_82, %c1_83, %131, %c0_84] : memref<1x4x16x16xf32, #tpu.memory_space<vmem>>, vector<1x1x8x16xf32>
    %133 = vector.shape_cast %132 : vector<1x1x8x16xf32> to vector<8x16xf32>
    %134 = vector.broadcast %130 : f32 to vector<8x16xf32>
    %135 = arith.mulf %134, %133 : vector<8x16xf32>
    %136 = arith.addf %129, %135 : vector<8x16xf32>
    %c3_85 = arith.constant 3 : index
    %c2_86 = arith.constant 2 : index
    %137 = memref.load %arg2[%c3_85, %c2_86] : memref<4x4xf32, #tpu.memory_space<smem>>
    %c0_87 = arith.constant 0 : index
    %c2_88 = arith.constant 2 : index
    %138 = arith.index_cast %1 : i32 to index
    %c0_89 = arith.constant 0 : index
    %139 = vector.load %arg6[%c0_87, %c2_88, %138, %c0_89] : memref<1x4x16x16xf32, #tpu.memory_space<vmem>>, vector<1x1x8x16xf32>
    %140 = vector.shape_cast %139 : vector<1x1x8x16xf32> to vector<8x16xf32>
    %141 = vector.broadcast %137 : f32 to vector<8x16xf32>
    %142 = arith.mulf %141, %140 : vector<8x16xf32>
    %143 = arith.addf %136, %142 : vector<8x16xf32>
    %c3_90 = arith.constant 3 : index
    %c3_91 = arith.constant 3 : index
    %144 = memref.load %arg2[%c3_90, %c3_91] : memref<4x4xf32, #tpu.memory_space<smem>>
    %c0_92 = arith.constant 0 : index
    %c3_93 = arith.constant 3 : index
    %145 = arith.index_cast %1 : i32 to index
    %c0_94 = arith.constant 0 : index
    %146 = vector.load %arg6[%c0_92, %c3_93, %145, %c0_94] : memref<1x4x16x16xf32, #tpu.memory_space<vmem>>, vector<1x1x8x16xf32>
    %147 = vector.shape_cast %146 : vector<1x1x8x16xf32> to vector<8x16xf32>
    %148 = vector.broadcast %144 : f32 to vector<8x16xf32>
    %149 = arith.mulf %148, %147 : vector<8x16xf32>
    %150 = arith.addf %143, %149 : vector<8x16xf32>
    %151 = arith.negf %150 : vector<8x16xf32>
    %152 = math.exp %151 : vector<8x16xf32>
    %cst_95 = arith.constant 1.000000e+00 : f32
    %153 = vector.broadcast %cst_95 : f32 to vector<8x16xf32>
    %154 = arith.addf %153, %152 : vector<8x16xf32>
    %155 = arith.divf %153, %154 : vector<8x16xf32>
    %156 = arith.mulf %150, %155 : vector<8x16xf32>
    %c3_96 = arith.constant 3 : index
    %c2_97 = arith.constant 2 : index
    %c2_98 = arith.constant 2 : index
    %157 = vector.load %arg8[%c3_96, %c2_97, %c2_98] : memref<4x12x20xf32, #tpu.memory_space<vmem>>, vector<1x8x16xf32>
    %158 = vector.shape_cast %157 : vector<1x8x16xf32> to vector<8x16xf32>
    %159 = vector.shape_cast %156 : vector<8x16xf32> to vector<1x8x16xf32>
    tpu.vector_store %arg8[%c3_96, %c2_97, %c2_98], %159 {strides = array<i32>} : memref<4x12x20xf32, #tpu.memory_space<vmem>>, vector<1x8x16xf32>,
    %c0_i32 = arith.constant 0 : i32
    %160 = arith.cmpi sgt, %arg1, %c0_i32 : i32
    %161 = arith.extui %160 : i1 to i32
    %c0_i32_99 = arith.constant 0 : i32
    %162 = arith.cmpi ne, %161, %c0_i32_99 : i32
    scf.if %162 {
      %c2_i32 = arith.constant 2 : i32
      %770 = arith.subi %1, %c2_i32 : i32
      %c0_392 = arith.constant 0 : index
      %771 = memref.load %arg3[%c0_392] : memref<4xf32, #tpu.memory_space<smem>>
      %772 = vector.broadcast %771 : f32 to vector<2x16xf32>
      %c0_393 = arith.constant 0 : index
      %c0_394 = arith.constant 0 : index
      %773 = memref.load %arg2[%c0_393, %c0_394] : memref<4x4xf32, #tpu.memory_space<smem>>
      %c0_395 = arith.constant 0 : index
      %c0_396 = arith.constant 0 : index
      %774 = arith.index_cast %770 : i32 to index
      %c0_397 = arith.constant 0 : index
      %775 = vector.load %arg6[%c0_395, %c0_396, %774, %c0_397] : memref<1x4x16x16xf32, #tpu.memory_space<vmem>>, vector<1x1x2x16xf32>
      %776 = vector.shape_cast %775 : vector<1x1x2x16xf32> to vector<2x16xf32>
      %777 = vector.broadcast %773 : f32 to vector<2x16xf32>
      %778 = arith.mulf %777, %776 : vector<2x16xf32>
      %779 = arith.addf %772, %778 : vector<2x16xf32>
      %c0_398 = arith.constant 0 : index
      %c1_399 = arith.constant 1 : index
      %780 = memref.load %arg2[%c0_398, %c1_399] : memref<4x4xf32, #tpu.memory_space<smem>>
      %c0_400 = arith.constant 0 : index
      %c1_401 = arith.constant 1 : index
      %781 = arith.index_cast %770 : i32 to index
      %c0_402 = arith.constant 0 : index
      %782 = vector.load %arg6[%c0_400, %c1_401, %781, %c0_402] : memref<1x4x16x16xf32, #tpu.memory_space<vmem>>, vector<1x1x2x16xf32>
      %783 = vector.shape_cast %782 : vector<1x1x2x16xf32> to vector<2x16xf32>
      %784 = vector.broadcast %780 : f32 to vector<2x16xf32>
      %785 = arith.mulf %784, %783 : vector<2x16xf32>
      %786 = arith.addf %779, %785 : vector<2x16xf32>
      %c0_403 = arith.constant 0 : index
      %c2_404 = arith.constant 2 : index
      %787 = memref.load %arg2[%c0_403, %c2_404] : memref<4x4xf32, #tpu.memory_space<smem>>
      %c0_405 = arith.constant 0 : index
      %c2_406 = arith.constant 2 : index
      %788 = arith.index_cast %770 : i32 to index
      %c0_407 = arith.constant 0 : index
      %789 = vector.load %arg6[%c0_405, %c2_406, %788, %c0_407] : memref<1x4x16x16xf32, #tpu.memory_space<vmem>>, vector<1x1x2x16xf32>
      %790 = vector.shape_cast %789 : vector<1x1x2x16xf32> to vector<2x16xf32>
      %791 = vector.broadcast %787 : f32 to vector<2x16xf32>
      %792 = arith.mulf %791, %790 : vector<2x16xf32>
      %793 = arith.addf %786, %792 : vector<2x16xf32>
      %c0_408 = arith.constant 0 : index
      %c3_409 = arith.constant 3 : index
      %794 = memref.load %arg2[%c0_408, %c3_409] : memref<4x4xf32, #tpu.memory_space<smem>>
      %c0_410 = arith.constant 0 : index
      %c3_411 = arith.constant 3 : index
      %795 = arith.index_cast %770 : i32 to index
      %c0_412 = arith.constant 0 : index
      %796 = vector.load %arg6[%c0_410, %c3_411, %795, %c0_412] : memref<1x4x16x16xf32, #tpu.memory_space<vmem>>, vector<1x1x2x16xf32>
      %797 = vector.shape_cast %796 : vector<1x1x2x16xf32> to vector<2x16xf32>
      %798 = vector.broadcast %794 : f32 to vector<2x16xf32>
      %799 = arith.mulf %798, %797 : vector<2x16xf32>
      %800 = arith.addf %793, %799 : vector<2x16xf32>
      %801 = arith.negf %800 : vector<2x16xf32>
      %802 = math.exp %801 : vector<2x16xf32>
      %cst_413 = arith.constant 1.000000e+00 : f32
      %803 = vector.broadcast %cst_413 : f32 to vector<2x16xf32>
      %804 = arith.addf %803, %802 : vector<2x16xf32>
      %805 = arith.divf %803, %804 : vector<2x16xf32>
      %806 = arith.mulf %800, %805 : vector<2x16xf32>
      %c0_414 = arith.constant 0 : index
      %c0_415 = arith.constant 0 : index
      %c2_416 = arith.constant 2 : index
      %807 = vector.load %arg8[%c0_414, %c0_415, %c2_416] : memref<4x12x20xf32, #tpu.memory_space<vmem>>, vector<1x2x16xf32>
      %808 = vector.shape_cast %807 : vector<1x2x16xf32> to vector<2x16xf32>
      %809 = vector.shape_cast %806 : vector<2x16xf32> to vector<1x2x16xf32>
      tpu.vector_store %arg8[%c0_414, %c0_415, %c2_416], %809 {strides = array<i32>} : memref<4x12x20xf32, #tpu.memory_space<vmem>>, vector<1x2x16xf32>,
      %c1_417 = arith.constant 1 : index
      %810 = memref.load %arg3[%c1_417] : memref<4xf32, #tpu.memory_space<smem>>
      %811 = vector.broadcast %810 : f32 to vector<2x16xf32>
      %c1_418 = arith.constant 1 : index
      %c0_419 = arith.constant 0 : index
      %812 = memref.load %arg2[%c1_418, %c0_419] : memref<4x4xf32, #tpu.memory_space<smem>>
      %c0_420 = arith.constant 0 : index
      %c0_421 = arith.constant 0 : index
      %813 = arith.index_cast %770 : i32 to index
      %c0_422 = arith.constant 0 : index
      %814 = vector.load %arg6[%c0_420, %c0_421, %813, %c0_422] : memref<1x4x16x16xf32, #tpu.memory_space<vmem>>, vector<1x1x2x16xf32>
      %815 = vector.shape_cast %814 : vector<1x1x2x16xf32> to vector<2x16xf32>
      %816 = vector.broadcast %812 : f32 to vector<2x16xf32>
      %817 = arith.mulf %816, %815 : vector<2x16xf32>
      %818 = arith.addf %811, %817 : vector<2x16xf32>
      %c1_423 = arith.constant 1 : index
      %c1_424 = arith.constant 1 : index
      %819 = memref.load %arg2[%c1_423, %c1_424] : memref<4x4xf32, #tpu.memory_space<smem>>
      %c0_425 = arith.constant 0 : index
      %c1_426 = arith.constant 1 : index
      %820 = arith.index_cast %770 : i32 to index
      %c0_427 = arith.constant 0 : index
      %821 = vector.load %arg6[%c0_425, %c1_426, %820, %c0_427] : memref<1x4x16x16xf32, #tpu.memory_space<vmem>>, vector<1x1x2x16xf32>
      %822 = vector.shape_cast %821 : vector<1x1x2x16xf32> to vector<2x16xf32>
      %823 = vector.broadcast %819 : f32 to vector<2x16xf32>
      %824 = arith.mulf %823, %822 : vector<2x16xf32>
      %825 = arith.addf %818, %824 : vector<2x16xf32>
      %c1_428 = arith.constant 1 : index
      %c2_429 = arith.constant 2 : index
      %826 = memref.load %arg2[%c1_428, %c2_429] : memref<4x4xf32, #tpu.memory_space<smem>>
      %c0_430 = arith.constant 0 : index
      %c2_431 = arith.constant 2 : index
      %827 = arith.index_cast %770 : i32 to index
      %c0_432 = arith.constant 0 : index
      %828 = vector.load %arg6[%c0_430, %c2_431, %827, %c0_432] : memref<1x4x16x16xf32, #tpu.memory_space<vmem>>, vector<1x1x2x16xf32>
      %829 = vector.shape_cast %828 : vector<1x1x2x16xf32> to vector<2x16xf32>
      %830 = vector.broadcast %826 : f32 to vector<2x16xf32>
      %831 = arith.mulf %830, %829 : vector<2x16xf32>
      %832 = arith.addf %825, %831 : vector<2x16xf32>
      %c1_433 = arith.constant 1 : index
      %c3_434 = arith.constant 3 : index
      %833 = memref.load %arg2[%c1_433, %c3_434] : memref<4x4xf32, #tpu.memory_space<smem>>
      %c0_435 = arith.constant 0 : index
      %c3_436 = arith.constant 3 : index
      %834 = arith.index_cast %770 : i32 to index
      %c0_437 = arith.constant 0 : index
      %835 = vector.load %arg6[%c0_435, %c3_436, %834, %c0_437] : memref<1x4x16x16xf32, #tpu.memory_space<vmem>>, vector<1x1x2x16xf32>
      %836 = vector.shape_cast %835 : vector<1x1x2x16xf32> to vector<2x16xf32>
      %837 = vector.broadcast %833 : f32 to vector<2x16xf32>
      %838 = arith.mulf %837, %836 : vector<2x16xf32>
      %839 = arith.addf %832, %838 : vector<2x16xf32>
      %840 = arith.negf %839 : vector<2x16xf32>
      %841 = math.exp %840 : vector<2x16xf32>
      %cst_438 = arith.constant 1.000000e+00 : f32
      %842 = vector.broadcast %cst_438 : f32 to vector<2x16xf32>
      %843 = arith.addf %842, %841 : vector<2x16xf32>
      %844 = arith.divf %842, %843 : vector<2x16xf32>
      %845 = arith.mulf %839, %844 : vector<2x16xf32>
      %c1_439 = arith.constant 1 : index
      %c0_440 = arith.constant 0 : index
      %c2_441 = arith.constant 2 : index
      %846 = vector.load %arg8[%c1_439, %c0_440, %c2_441] : memref<4x12x20xf32, #tpu.memory_space<vmem>>, vector<1x2x16xf32>
      %847 = vector.shape_cast %846 : vector<1x2x16xf32> to vector<2x16xf32>
      %848 = vector.shape_cast %845 : vector<2x16xf32> to vector<1x2x16xf32>
      tpu.vector_store %arg8[%c1_439, %c0_440, %c2_441], %848 {strides = array<i32>} : memref<4x12x20xf32, #tpu.memory_space<vmem>>, vector<1x2x16xf32>,
      %c2_442 = arith.constant 2 : index
      %849 = memref.load %arg3[%c2_442] : memref<4xf32, #tpu.memory_space<smem>>
      %850 = vector.broadcast %849 : f32 to vector<2x16xf32>
      %c2_443 = arith.constant 2 : index
      %c0_444 = arith.constant 0 : index
      %851 = memref.load %arg2[%c2_443, %c0_444] : memref<4x4xf32, #tpu.memory_space<smem>>
      %c0_445 = arith.constant 0 : index
      %c0_446 = arith.constant 0 : index
      %852 = arith.index_cast %770 : i32 to index
      %c0_447 = arith.constant 0 : index
      %853 = vector.load %arg6[%c0_445, %c0_446, %852, %c0_447] : memref<1x4x16x16xf32, #tpu.memory_space<vmem>>, vector<1x1x2x16xf32>
      %854 = vector.shape_cast %853 : vector<1x1x2x16xf32> to vector<2x16xf32>
      %855 = vector.broadcast %851 : f32 to vector<2x16xf32>
      %856 = arith.mulf %855, %854 : vector<2x16xf32>
      %857 = arith.addf %850, %856 : vector<2x16xf32>
      %c2_448 = arith.constant 2 : index
      %c1_449 = arith.constant 1 : index
      %858 = memref.load %arg2[%c2_448, %c1_449] : memref<4x4xf32, #tpu.memory_space<smem>>
      %c0_450 = arith.constant 0 : index
      %c1_451 = arith.constant 1 : index
      %859 = arith.index_cast %770 : i32 to index
      %c0_452 = arith.constant 0 : index
      %860 = vector.load %arg6[%c0_450, %c1_451, %859, %c0_452] : memref<1x4x16x16xf32, #tpu.memory_space<vmem>>, vector<1x1x2x16xf32>
      %861 = vector.shape_cast %860 : vector<1x1x2x16xf32> to vector<2x16xf32>
      %862 = vector.broadcast %858 : f32 to vector<2x16xf32>
      %863 = arith.mulf %862, %861 : vector<2x16xf32>
      %864 = arith.addf %857, %863 : vector<2x16xf32>
      %c2_453 = arith.constant 2 : index
      %c2_454 = arith.constant 2 : index
      %865 = memref.load %arg2[%c2_453, %c2_454] : memref<4x4xf32, #tpu.memory_space<smem>>
      %c0_455 = arith.constant 0 : index
      %c2_456 = arith.constant 2 : index
      %866 = arith.index_cast %770 : i32 to index
      %c0_457 = arith.constant 0 : index
      %867 = vector.load %arg6[%c0_455, %c2_456, %866, %c0_457] : memref<1x4x16x16xf32, #tpu.memory_space<vmem>>, vector<1x1x2x16xf32>
      %868 = vector.shape_cast %867 : vector<1x1x2x16xf32> to vector<2x16xf32>
      %869 = vector.broadcast %865 : f32 to vector<2x16xf32>
      %870 = arith.mulf %869, %868 : vector<2x16xf32>
      %871 = arith.addf %864, %870 : vector<2x16xf32>
      %c2_458 = arith.constant 2 : index
      %c3_459 = arith.constant 3 : index
      %872 = memref.load %arg2[%c2_458, %c3_459] : memref<4x4xf32, #tpu.memory_space<smem>>
      %c0_460 = arith.constant 0 : index
      %c3_461 = arith.constant 3 : index
      %873 = arith.index_cast %770 : i32 to index
      %c0_462 = arith.constant 0 : index
      %874 = vector.load %arg6[%c0_460, %c3_461, %873, %c0_462] : memref<1x4x16x16xf32, #tpu.memory_space<vmem>>, vector<1x1x2x16xf32>
      %875 = vector.shape_cast %874 : vector<1x1x2x16xf32> to vector<2x16xf32>
      %876 = vector.broadcast %872 : f32 to vector<2x16xf32>
      %877 = arith.mulf %876, %875 : vector<2x16xf32>
      %878 = arith.addf %871, %877 : vector<2x16xf32>
      %879 = arith.negf %878 : vector<2x16xf32>
      %880 = math.exp %879 : vector<2x16xf32>
      %cst_463 = arith.constant 1.000000e+00 : f32
      %881 = vector.broadcast %cst_463 : f32 to vector<2x16xf32>
      %882 = arith.addf %881, %880 : vector<2x16xf32>
      %883 = arith.divf %881, %882 : vector<2x16xf32>
      %884 = arith.mulf %878, %883 : vector<2x16xf32>
      %c2_464 = arith.constant 2 : index
      %c0_465 = arith.constant 0 : index
      %c2_466 = arith.constant 2 : index
      %885 = vector.load %arg8[%c2_464, %c0_465, %c2_466] : memref<4x12x20xf32, #tpu.memory_space<vmem>>, vector<1x2x16xf32>
      %886 = vector.shape_cast %885 : vector<1x2x16xf32> to vector<2x16xf32>
      %887 = vector.shape_cast %884 : vector<2x16xf32> to vector<1x2x16xf32>
      tpu.vector_store %arg8[%c2_464, %c0_465, %c2_466], %887 {strides = array<i32>} : memref<4x12x20xf32, #tpu.memory_space<vmem>>, vector<1x2x16xf32>,
      %c3_467 = arith.constant 3 : index
      %888 = memref.load %arg3[%c3_467] : memref<4xf32, #tpu.memory_space<smem>>
      %889 = vector.broadcast %888 : f32 to vector<2x16xf32>
      %c3_468 = arith.constant 3 : index
      %c0_469 = arith.constant 0 : index
      %890 = memref.load %arg2[%c3_468, %c0_469] : memref<4x4xf32, #tpu.memory_space<smem>>
      %c0_470 = arith.constant 0 : index
      %c0_471 = arith.constant 0 : index
      %891 = arith.index_cast %770 : i32 to index
      %c0_472 = arith.constant 0 : index
      %892 = vector.load %arg6[%c0_470, %c0_471, %891, %c0_472] : memref<1x4x16x16xf32, #tpu.memory_space<vmem>>, vector<1x1x2x16xf32>
      %893 = vector.shape_cast %892 : vector<1x1x2x16xf32> to vector<2x16xf32>
      %894 = vector.broadcast %890 : f32 to vector<2x16xf32>
      %895 = arith.mulf %894, %893 : vector<2x16xf32>
      %896 = arith.addf %889, %895 : vector<2x16xf32>
      %c3_473 = arith.constant 3 : index
      %c1_474 = arith.constant 1 : index
      %897 = memref.load %arg2[%c3_473, %c1_474] : memref<4x4xf32, #tpu.memory_space<smem>>
      %c0_475 = arith.constant 0 : index
      %c1_476 = arith.constant 1 : index
      %898 = arith.index_cast %770 : i32 to index
      %c0_477 = arith.constant 0 : index
      %899 = vector.load %arg6[%c0_475, %c1_476, %898, %c0_477] : memref<1x4x16x16xf32, #tpu.memory_space<vmem>>, vector<1x1x2x16xf32>
      %900 = vector.shape_cast %899 : vector<1x1x2x16xf32> to vector<2x16xf32>
      %901 = vector.broadcast %897 : f32 to vector<2x16xf32>
      %902 = arith.mulf %901, %900 : vector<2x16xf32>
      %903 = arith.addf %896, %902 : vector<2x16xf32>
      %c3_478 = arith.constant 3 : index
      %c2_479 = arith.constant 2 : index
      %904 = memref.load %arg2[%c3_478, %c2_479] : memref<4x4xf32, #tpu.memory_space<smem>>
      %c0_480 = arith.constant 0 : index
      %c2_481 = arith.constant 2 : index
      %905 = arith.index_cast %770 : i32 to index
      %c0_482 = arith.constant 0 : index
      %906 = vector.load %arg6[%c0_480, %c2_481, %905, %c0_482] : memref<1x4x16x16xf32, #tpu.memory_space<vmem>>, vector<1x1x2x16xf32>
      %907 = vector.shape_cast %906 : vector<1x1x2x16xf32> to vector<2x16xf32>
      %908 = vector.broadcast %904 : f32 to vector<2x16xf32>
      %909 = arith.mulf %908, %907 : vector<2x16xf32>
      %910 = arith.addf %903, %909 : vector<2x16xf32>
      %c3_483 = arith.constant 3 : index
      %c3_484 = arith.constant 3 : index
      %911 = memref.load %arg2[%c3_483, %c3_484] : memref<4x4xf32, #tpu.memory_space<smem>>
      %c0_485 = arith.constant 0 : index
      %c3_486 = arith.constant 3 : index
      %912 = arith.index_cast %770 : i32 to index
      %c0_487 = arith.constant 0 : index
      %913 = vector.load %arg6[%c0_485, %c3_486, %912, %c0_487] : memref<1x4x16x16xf32, #tpu.memory_space<vmem>>, vector<1x1x2x16xf32>
      %914 = vector.shape_cast %913 : vector<1x1x2x16xf32> to vector<2x16xf32>
      %915 = vector.broadcast %911 : f32 to vector<2x16xf32>
      %916 = arith.mulf %915, %914 : vector<2x16xf32>
      %917 = arith.addf %910, %916 : vector<2x16xf32>
      %918 = arith.negf %917 : vector<2x16xf32>
      %919 = math.exp %918 : vector<2x16xf32>
      %cst_488 = arith.constant 1.000000e+00 : f32
      %920 = vector.broadcast %cst_488 : f32 to vector<2x16xf32>
      %921 = arith.addf %920, %919 : vector<2x16xf32>
      %922 = arith.divf %920, %921 : vector<2x16xf32>
      %923 = arith.mulf %917, %922 : vector<2x16xf32>
      %c3_489 = arith.constant 3 : index
      %c0_490 = arith.constant 0 : index
      %c2_491 = arith.constant 2 : index
      %924 = vector.load %arg8[%c3_489, %c0_490, %c2_491] : memref<4x12x20xf32, #tpu.memory_space<vmem>>, vector<1x2x16xf32>
      %925 = vector.shape_cast %924 : vector<1x2x16xf32> to vector<2x16xf32>
      %926 = vector.shape_cast %923 : vector<2x16xf32> to vector<1x2x16xf32>
      tpu.vector_store %arg8[%c3_489, %c0_490, %c2_491], %926 {strides = array<i32>} : memref<4x12x20xf32, #tpu.memory_space<vmem>>, vector<1x2x16xf32>,
    } else {
    }
    %c1_i32 = arith.constant 1 : i32
    %163 = arith.cmpi slt, %arg1, %c1_i32 : i32
    %164 = arith.extui %163 : i1 to i32
    %c0_i32_100 = arith.constant 0 : i32
    %165 = arith.cmpi ne, %164, %c0_i32_100 : i32
    scf.if %165 {
      %c8_i32_392 = arith.constant 8 : i32
      %770 = arith.addi %1, %c8_i32_392 : i32
      %c0_393 = arith.constant 0 : index
      %771 = memref.load %arg3[%c0_393] : memref<4xf32, #tpu.memory_space<smem>>
      %772 = vector.broadcast %771 : f32 to vector<2x16xf32>
      %c0_394 = arith.constant 0 : index
      %c0_395 = arith.constant 0 : index
      %773 = memref.load %arg2[%c0_394, %c0_395] : memref<4x4xf32, #tpu.memory_space<smem>>
      %c0_396 = arith.constant 0 : index
      %c0_397 = arith.constant 0 : index
      %774 = arith.index_cast %770 : i32 to index
      %c0_398 = arith.constant 0 : index
      %775 = vector.load %arg6[%c0_396, %c0_397, %774, %c0_398] : memref<1x4x16x16xf32, #tpu.memory_space<vmem>>, vector<1x1x2x16xf32>
      %776 = vector.shape_cast %775 : vector<1x1x2x16xf32> to vector<2x16xf32>
      %777 = vector.broadcast %773 : f32 to vector<2x16xf32>
      %778 = arith.mulf %777, %776 : vector<2x16xf32>
      %779 = arith.addf %772, %778 : vector<2x16xf32>
      %c0_399 = arith.constant 0 : index
      %c1_400 = arith.constant 1 : index
      %780 = memref.load %arg2[%c0_399, %c1_400] : memref<4x4xf32, #tpu.memory_space<smem>>
      %c0_401 = arith.constant 0 : index
      %c1_402 = arith.constant 1 : index
      %781 = arith.index_cast %770 : i32 to index
      %c0_403 = arith.constant 0 : index
      %782 = vector.load %arg6[%c0_401, %c1_402, %781, %c0_403] : memref<1x4x16x16xf32, #tpu.memory_space<vmem>>, vector<1x1x2x16xf32>
      %783 = vector.shape_cast %782 : vector<1x1x2x16xf32> to vector<2x16xf32>
      %784 = vector.broadcast %780 : f32 to vector<2x16xf32>
      %785 = arith.mulf %784, %783 : vector<2x16xf32>
      %786 = arith.addf %779, %785 : vector<2x16xf32>
      %c0_404 = arith.constant 0 : index
      %c2_405 = arith.constant 2 : index
      %787 = memref.load %arg2[%c0_404, %c2_405] : memref<4x4xf32, #tpu.memory_space<smem>>
      %c0_406 = arith.constant 0 : index
      %c2_407 = arith.constant 2 : index
      %788 = arith.index_cast %770 : i32 to index
      %c0_408 = arith.constant 0 : index
      %789 = vector.load %arg6[%c0_406, %c2_407, %788, %c0_408] : memref<1x4x16x16xf32, #tpu.memory_space<vmem>>, vector<1x1x2x16xf32>
      %790 = vector.shape_cast %789 : vector<1x1x2x16xf32> to vector<2x16xf32>
      %791 = vector.broadcast %787 : f32 to vector<2x16xf32>
      %792 = arith.mulf %791, %790 : vector<2x16xf32>
      %793 = arith.addf %786, %792 : vector<2x16xf32>
      %c0_409 = arith.constant 0 : index
      %c3_410 = arith.constant 3 : index
      %794 = memref.load %arg2[%c0_409, %c3_410] : memref<4x4xf32, #tpu.memory_space<smem>>
      %c0_411 = arith.constant 0 : index
      %c3_412 = arith.constant 3 : index
      %795 = arith.index_cast %770 : i32 to index
      %c0_413 = arith.constant 0 : index
      %796 = vector.load %arg6[%c0_411, %c3_412, %795, %c0_413] : memref<1x4x16x16xf32, #tpu.memory_space<vmem>>, vector<1x1x2x16xf32>
      %797 = vector.shape_cast %796 : vector<1x1x2x16xf32> to vector<2x16xf32>
      %798 = vector.broadcast %794 : f32 to vector<2x16xf32>
      %799 = arith.mulf %798, %797 : vector<2x16xf32>
      %800 = arith.addf %793, %799 : vector<2x16xf32>
      %801 = arith.negf %800 : vector<2x16xf32>
      %802 = math.exp %801 : vector<2x16xf32>
      %cst_414 = arith.constant 1.000000e+00 : f32
      %803 = vector.broadcast %cst_414 : f32 to vector<2x16xf32>
      %804 = arith.addf %803, %802 : vector<2x16xf32>
      %805 = arith.divf %803, %804 : vector<2x16xf32>
      %806 = arith.mulf %800, %805 : vector<2x16xf32>
      %c0_415 = arith.constant 0 : index
      %c10_416 = arith.constant 10 : index
      %c2_417 = arith.constant 2 : index
      %807 = vector.load %arg8[%c0_415, %c10_416, %c2_417] : memref<4x12x20xf32, #tpu.memory_space<vmem>>, vector<1x2x16xf32>
      %808 = vector.shape_cast %807 : vector<1x2x16xf32> to vector<2x16xf32>
      %809 = vector.shape_cast %806 : vector<2x16xf32> to vector<1x2x16xf32>
      tpu.vector_store %arg8[%c0_415, %c10_416, %c2_417], %809 {strides = array<i32>} : memref<4x12x20xf32, #tpu.memory_space<vmem>>, vector<1x2x16xf32>,
      %c1_418 = arith.constant 1 : index
      %810 = memref.load %arg3[%c1_418] : memref<4xf32, #tpu.memory_space<smem>>
      %811 = vector.broadcast %810 : f32 to vector<2x16xf32>
      %c1_419 = arith.constant 1 : index
      %c0_420 = arith.constant 0 : index
      %812 = memref.load %arg2[%c1_419, %c0_420] : memref<4x4xf32, #tpu.memory_space<smem>>
      %c0_421 = arith.constant 0 : index
      %c0_422 = arith.constant 0 : index
      %813 = arith.index_cast %770 : i32 to index
      %c0_423 = arith.constant 0 : index
      %814 = vector.load %arg6[%c0_421, %c0_422, %813, %c0_423] : memref<1x4x16x16xf32, #tpu.memory_space<vmem>>, vector<1x1x2x16xf32>
      %815 = vector.shape_cast %814 : vector<1x1x2x16xf32> to vector<2x16xf32>
      %816 = vector.broadcast %812 : f32 to vector<2x16xf32>
      %817 = arith.mulf %816, %815 : vector<2x16xf32>
      %818 = arith.addf %811, %817 : vector<2x16xf32>
      %c1_424 = arith.constant 1 : index
      %c1_425 = arith.constant 1 : index
      %819 = memref.load %arg2[%c1_424, %c1_425] : memref<4x4xf32, #tpu.memory_space<smem>>
      %c0_426 = arith.constant 0 : index
      %c1_427 = arith.constant 1 : index
      %820 = arith.index_cast %770 : i32 to index
      %c0_428 = arith.constant 0 : index
      %821 = vector.load %arg6[%c0_426, %c1_427, %820, %c0_428] : memref<1x4x16x16xf32, #tpu.memory_space<vmem>>, vector<1x1x2x16xf32>
      %822 = vector.shape_cast %821 : vector<1x1x2x16xf32> to vector<2x16xf32>
      %823 = vector.broadcast %819 : f32 to vector<2x16xf32>
      %824 = arith.mulf %823, %822 : vector<2x16xf32>
      %825 = arith.addf %818, %824 : vector<2x16xf32>
      %c1_429 = arith.constant 1 : index
      %c2_430 = arith.constant 2 : index
      %826 = memref.load %arg2[%c1_429, %c2_430] : memref<4x4xf32, #tpu.memory_space<smem>>
      %c0_431 = arith.constant 0 : index
      %c2_432 = arith.constant 2 : index
      %827 = arith.index_cast %770 : i32 to index
      %c0_433 = arith.constant 0 : index
      %828 = vector.load %arg6[%c0_431, %c2_432, %827, %c0_433] : memref<1x4x16x16xf32, #tpu.memory_space<vmem>>, vector<1x1x2x16xf32>
      %829 = vector.shape_cast %828 : vector<1x1x2x16xf32> to vector<2x16xf32>
      %830 = vector.broadcast %826 : f32 to vector<2x16xf32>
      %831 = arith.mulf %830, %829 : vector<2x16xf32>
      %832 = arith.addf %825, %831 : vector<2x16xf32>
      %c1_434 = arith.constant 1 : index
      %c3_435 = arith.constant 3 : index
      %833 = memref.load %arg2[%c1_434, %c3_435] : memref<4x4xf32, #tpu.memory_space<smem>>
      %c0_436 = arith.constant 0 : index
      %c3_437 = arith.constant 3 : index
      %834 = arith.index_cast %770 : i32 to index
      %c0_438 = arith.constant 0 : index
      %835 = vector.load %arg6[%c0_436, %c3_437, %834, %c0_438] : memref<1x4x16x16xf32, #tpu.memory_space<vmem>>, vector<1x1x2x16xf32>
      %836 = vector.shape_cast %835 : vector<1x1x2x16xf32> to vector<2x16xf32>
      %837 = vector.broadcast %833 : f32 to vector<2x16xf32>
      %838 = arith.mulf %837, %836 : vector<2x16xf32>
      %839 = arith.addf %832, %838 : vector<2x16xf32>
      %840 = arith.negf %839 : vector<2x16xf32>
      %841 = math.exp %840 : vector<2x16xf32>
      %cst_439 = arith.constant 1.000000e+00 : f32
      %842 = vector.broadcast %cst_439 : f32 to vector<2x16xf32>
      %843 = arith.addf %842, %841 : vector<2x16xf32>
      %844 = arith.divf %842, %843 : vector<2x16xf32>
      %845 = arith.mulf %839, %844 : vector<2x16xf32>
      %c1_440 = arith.constant 1 : index
      %c10_441 = arith.constant 10 : index
      %c2_442 = arith.constant 2 : index
      %846 = vector.load %arg8[%c1_440, %c10_441, %c2_442] : memref<4x12x20xf32, #tpu.memory_space<vmem>>, vector<1x2x16xf32>
      %847 = vector.shape_cast %846 : vector<1x2x16xf32> to vector<2x16xf32>
      %848 = vector.shape_cast %845 : vector<2x16xf32> to vector<1x2x16xf32>
      tpu.vector_store %arg8[%c1_440, %c10_441, %c2_442], %848 {strides = array<i32>} : memref<4x12x20xf32, #tpu.memory_space<vmem>>, vector<1x2x16xf32>,
      %c2_443 = arith.constant 2 : index
      %849 = memref.load %arg3[%c2_443] : memref<4xf32, #tpu.memory_space<smem>>
      %850 = vector.broadcast %849 : f32 to vector<2x16xf32>
      %c2_444 = arith.constant 2 : index
      %c0_445 = arith.constant 0 : index
      %851 = memref.load %arg2[%c2_444, %c0_445] : memref<4x4xf32, #tpu.memory_space<smem>>
      %c0_446 = arith.constant 0 : index
      %c0_447 = arith.constant 0 : index
      %852 = arith.index_cast %770 : i32 to index
      %c0_448 = arith.constant 0 : index
      %853 = vector.load %arg6[%c0_446, %c0_447, %852, %c0_448] : memref<1x4x16x16xf32, #tpu.memory_space<vmem>>, vector<1x1x2x16xf32>
      %854 = vector.shape_cast %853 : vector<1x1x2x16xf32> to vector<2x16xf32>
      %855 = vector.broadcast %851 : f32 to vector<2x16xf32>
      %856 = arith.mulf %855, %854 : vector<2x16xf32>
      %857 = arith.addf %850, %856 : vector<2x16xf32>
      %c2_449 = arith.constant 2 : index
      %c1_450 = arith.constant 1 : index
      %858 = memref.load %arg2[%c2_449, %c1_450] : memref<4x4xf32, #tpu.memory_space<smem>>
      %c0_451 = arith.constant 0 : index
      %c1_452 = arith.constant 1 : index
      %859 = arith.index_cast %770 : i32 to index
      %c0_453 = arith.constant 0 : index
      %860 = vector.load %arg6[%c0_451, %c1_452, %859, %c0_453] : memref<1x4x16x16xf32, #tpu.memory_space<vmem>>, vector<1x1x2x16xf32>
      %861 = vector.shape_cast %860 : vector<1x1x2x16xf32> to vector<2x16xf32>
      %862 = vector.broadcast %858 : f32 to vector<2x16xf32>
      %863 = arith.mulf %862, %861 : vector<2x16xf32>
      %864 = arith.addf %857, %863 : vector<2x16xf32>
      %c2_454 = arith.constant 2 : index
      %c2_455 = arith.constant 2 : index
      %865 = memref.load %arg2[%c2_454, %c2_455] : memref<4x4xf32, #tpu.memory_space<smem>>
      %c0_456 = arith.constant 0 : index
      %c2_457 = arith.constant 2 : index
      %866 = arith.index_cast %770 : i32 to index
      %c0_458 = arith.constant 0 : index
      %867 = vector.load %arg6[%c0_456, %c2_457, %866, %c0_458] : memref<1x4x16x16xf32, #tpu.memory_space<vmem>>, vector<1x1x2x16xf32>
      %868 = vector.shape_cast %867 : vector<1x1x2x16xf32> to vector<2x16xf32>
      %869 = vector.broadcast %865 : f32 to vector<2x16xf32>
      %870 = arith.mulf %869, %868 : vector<2x16xf32>
      %871 = arith.addf %864, %870 : vector<2x16xf32>
      %c2_459 = arith.constant 2 : index
      %c3_460 = arith.constant 3 : index
      %872 = memref.load %arg2[%c2_459, %c3_460] : memref<4x4xf32, #tpu.memory_space<smem>>
      %c0_461 = arith.constant 0 : index
      %c3_462 = arith.constant 3 : index
      %873 = arith.index_cast %770 : i32 to index
      %c0_463 = arith.constant 0 : index
      %874 = vector.load %arg6[%c0_461, %c3_462, %873, %c0_463] : memref<1x4x16x16xf32, #tpu.memory_space<vmem>>, vector<1x1x2x16xf32>
      %875 = vector.shape_cast %874 : vector<1x1x2x16xf32> to vector<2x16xf32>
      %876 = vector.broadcast %872 : f32 to vector<2x16xf32>
      %877 = arith.mulf %876, %875 : vector<2x16xf32>
      %878 = arith.addf %871, %877 : vector<2x16xf32>
      %879 = arith.negf %878 : vector<2x16xf32>
      %880 = math.exp %879 : vector<2x16xf32>
      %cst_464 = arith.constant 1.000000e+00 : f32
      %881 = vector.broadcast %cst_464 : f32 to vector<2x16xf32>
      %882 = arith.addf %881, %880 : vector<2x16xf32>
      %883 = arith.divf %881, %882 : vector<2x16xf32>
      %884 = arith.mulf %878, %883 : vector<2x16xf32>
      %c2_465 = arith.constant 2 : index
      %c10_466 = arith.constant 10 : index
      %c2_467 = arith.constant 2 : index
      %885 = vector.load %arg8[%c2_465, %c10_466, %c2_467] : memref<4x12x20xf32, #tpu.memory_space<vmem>>, vector<1x2x16xf32>
      %886 = vector.shape_cast %885 : vector<1x2x16xf32> to vector<2x16xf32>
      %887 = vector.shape_cast %884 : vector<2x16xf32> to vector<1x2x16xf32>
      tpu.vector_store %arg8[%c2_465, %c10_466, %c2_467], %887 {strides = array<i32>} : memref<4x12x20xf32, #tpu.memory_space<vmem>>, vector<1x2x16xf32>,
      %c3_468 = arith.constant 3 : index
      %888 = memref.load %arg3[%c3_468] : memref<4xf32, #tpu.memory_space<smem>>
      %889 = vector.broadcast %888 : f32 to vector<2x16xf32>
      %c3_469 = arith.constant 3 : index
      %c0_470 = arith.constant 0 : index
      %890 = memref.load %arg2[%c3_469, %c0_470] : memref<4x4xf32, #tpu.memory_space<smem>>
      %c0_471 = arith.constant 0 : index
      %c0_472 = arith.constant 0 : index
      %891 = arith.index_cast %770 : i32 to index
      %c0_473 = arith.constant 0 : index
      %892 = vector.load %arg6[%c0_471, %c0_472, %891, %c0_473] : memref<1x4x16x16xf32, #tpu.memory_space<vmem>>, vector<1x1x2x16xf32>
      %893 = vector.shape_cast %892 : vector<1x1x2x16xf32> to vector<2x16xf32>
      %894 = vector.broadcast %890 : f32 to vector<2x16xf32>
      %895 = arith.mulf %894, %893 : vector<2x16xf32>
      %896 = arith.addf %889, %895 : vector<2x16xf32>
      %c3_474 = arith.constant 3 : index
      %c1_475 = arith.constant 1 : index
      %897 = memref.load %arg2[%c3_474, %c1_475] : memref<4x4xf32, #tpu.memory_space<smem>>
      %c0_476 = arith.constant 0 : index
      %c1_477 = arith.constant 1 : index
      %898 = arith.index_cast %770 : i32 to index
      %c0_478 = arith.constant 0 : index
      %899 = vector.load %arg6[%c0_476, %c1_477, %898, %c0_478] : memref<1x4x16x16xf32, #tpu.memory_space<vmem>>, vector<1x1x2x16xf32>
      %900 = vector.shape_cast %899 : vector<1x1x2x16xf32> to vector<2x16xf32>
      %901 = vector.broadcast %897 : f32 to vector<2x16xf32>
      %902 = arith.mulf %901, %900 : vector<2x16xf32>
      %903 = arith.addf %896, %902 : vector<2x16xf32>
      %c3_479 = arith.constant 3 : index
      %c2_480 = arith.constant 2 : index
      %904 = memref.load %arg2[%c3_479, %c2_480] : memref<4x4xf32, #tpu.memory_space<smem>>
      %c0_481 = arith.constant 0 : index
      %c2_482 = arith.constant 2 : index
      %905 = arith.index_cast %770 : i32 to index
      %c0_483 = arith.constant 0 : index
      %906 = vector.load %arg6[%c0_481, %c2_482, %905, %c0_483] : memref<1x4x16x16xf32, #tpu.memory_space<vmem>>, vector<1x1x2x16xf32>
      %907 = vector.shape_cast %906 : vector<1x1x2x16xf32> to vector<2x16xf32>
      %908 = vector.broadcast %904 : f32 to vector<2x16xf32>
      %909 = arith.mulf %908, %907 : vector<2x16xf32>
      %910 = arith.addf %903, %909 : vector<2x16xf32>
      %c3_484 = arith.constant 3 : index
      %c3_485 = arith.constant 3 : index
      %911 = memref.load %arg2[%c3_484, %c3_485] : memref<4x4xf32, #tpu.memory_space<smem>>
      %c0_486 = arith.constant 0 : index
      %c3_487 = arith.constant 3 : index
      %912 = arith.index_cast %770 : i32 to index
      %c0_488 = arith.constant 0 : index
      %913 = vector.load %arg6[%c0_486, %c3_487, %912, %c0_488] : memref<1x4x16x16xf32, #tpu.memory_space<vmem>>, vector<1x1x2x16xf32>
      %914 = vector.shape_cast %913 : vector<1x1x2x16xf32> to vector<2x16xf32>
      %915 = vector.broadcast %911 : f32 to vector<2x16xf32>
      %916 = arith.mulf %915, %914 : vector<2x16xf32>
      %917 = arith.addf %910, %916 : vector<2x16xf32>
      %918 = arith.negf %917 : vector<2x16xf32>
      %919 = math.exp %918 : vector<2x16xf32>
      %cst_489 = arith.constant 1.000000e+00 : f32
      %920 = vector.broadcast %cst_489 : f32 to vector<2x16xf32>
      %921 = arith.addf %920, %919 : vector<2x16xf32>
      %922 = arith.divf %920, %921 : vector<2x16xf32>
      %923 = arith.mulf %917, %922 : vector<2x16xf32>
      %c3_490 = arith.constant 3 : index
      %c10_491 = arith.constant 10 : index
      %c2_492 = arith.constant 2 : index
      %924 = vector.load %arg8[%c3_490, %c10_491, %c2_492] : memref<4x12x20xf32, #tpu.memory_space<vmem>>, vector<1x2x16xf32>
      %925 = vector.shape_cast %924 : vector<1x2x16xf32> to vector<2x16xf32>
      %926 = vector.shape_cast %923 : vector<2x16xf32> to vector<1x2x16xf32>
      tpu.vector_store %arg8[%c3_490, %c10_491, %c2_492], %926 {strides = array<i32>} : memref<4x12x20xf32, #tpu.memory_space<vmem>>, vector<1x2x16xf32>,
    } else {
    }
    %c0_101 = arith.constant 0 : index
    %c2_102 = arith.constant 2 : index
    %c2_103 = arith.constant 2 : index
    %166 = vector.load %arg8[%c0_101, %c2_102, %c2_103] : memref<4x12x20xf32, #tpu.memory_space<vmem>>, vector<1x8x16xf32>
    %167 = vector.shape_cast %166 : vector<1x8x16xf32> to vector<8x16xf32>
    %c0_104 = arith.constant 0 : index
    %c0_105 = arith.constant 0 : index
    %c0_106 = arith.constant 0 : index
    %c0_107 = arith.constant 0 : index
    %168 = vector.load %arg7[%c0_104, %c0_105, %c0_106, %c0_107] : memref<1x8x8x16xf32, #tpu.memory_space<vmem>>, vector<1x1x8x16xf32>
    %169 = vector.shape_cast %168 : vector<1x1x8x16xf32> to vector<8x16xf32>
    %170 = vector.shape_cast %167 : vector<8x16xf32> to vector<1x1x8x16xf32>
    tpu.vector_store %arg7[%c0_104, %c0_105, %c0_106, %c0_107], %170 {strides = array<i32>} : memref<1x8x8x16xf32, #tpu.memory_space<vmem>>, vector<1x1x8x16xf32>,
    %c0_108 = arith.constant 0 : index
    %171 = memref.load %arg5[%c0_108] : memref<4xf32, #tpu.memory_space<smem>>
    %172 = vector.broadcast %171 : f32 to vector<8x16xf32>
    %c0_109 = arith.constant 0 : index
    %c0_110 = arith.constant 0 : index
    %c0_111 = arith.constant 0 : index
    %173 = vector.load %arg8[%c0_109, %c0_110, %c0_111] : memref<4x12x20xf32, #tpu.memory_space<vmem>>, vector<1x8x20xf32>
    %174 = vector.shape_cast %173 : vector<1x8x20xf32> to vector<8x20xf32>
    %c0_112 = arith.constant 0 : index
    %c0_113 = arith.constant 0 : index
    %175 = memref.load %arg4[%c0_112, %c0_113] : memref<4x25xf32, #tpu.memory_space<smem>>
    %176 = vector.extract_strided_slice %174 {offsets = [0, 0], sizes = [8, 16], strides = [1, 1]} : vector<8x20xf32> to vector<8x16xf32>
    %177 = vector.broadcast %175 : f32 to vector<8x16xf32>
    %178 = arith.mulf %177, %176 : vector<8x16xf32>
    %179 = arith.addf %172, %178 : vector<8x16xf32>
    %c0_114 = arith.constant 0 : index
    %c1_115 = arith.constant 1 : index
    %180 = memref.load %arg4[%c0_114, %c1_115] : memref<4x25xf32, #tpu.memory_space<smem>>
    %181 = vector.extract_strided_slice %174 {offsets = [0, 1], sizes = [8, 16], strides = [1, 1]} : vector<8x20xf32> to vector<8x16xf32>
    %182 = vector.broadcast %180 : f32 to vector<8x16xf32>
    %183 = arith.mulf %182, %181 : vector<8x16xf32>
    %184 = arith.addf %179, %183 : vector<8x16xf32>
    %c0_116 = arith.constant 0 : index
    %c2_117 = arith.constant 2 : index
    %185 = memref.load %arg4[%c0_116, %c2_117] : memref<4x25xf32, #tpu.memory_space<smem>>
    %186 = vector.extract_strided_slice %174 {offsets = [0, 2], sizes = [8, 16], strides = [1, 1]} : vector<8x20xf32> to vector<8x16xf32>
    %187 = vector.broadcast %185 : f32 to vector<8x16xf32>
    %188 = arith.mulf %187, %186 : vector<8x16xf32>
    %189 = arith.addf %184, %188 : vector<8x16xf32>
    %c0_118 = arith.constant 0 : index
    %c3_119 = arith.constant 3 : index
    %190 = memref.load %arg4[%c0_118, %c3_119] : memref<4x25xf32, #tpu.memory_space<smem>>
    %191 = vector.extract_strided_slice %174 {offsets = [0, 3], sizes = [8, 16], strides = [1, 1]} : vector<8x20xf32> to vector<8x16xf32>
    %192 = vector.broadcast %190 : f32 to vector<8x16xf32>
    %193 = arith.mulf %192, %191 : vector<8x16xf32>
    %194 = arith.addf %189, %193 : vector<8x16xf32>
    %c0_120 = arith.constant 0 : index
    %c4 = arith.constant 4 : index
    %195 = memref.load %arg4[%c0_120, %c4] : memref<4x25xf32, #tpu.memory_space<smem>>
    %196 = vector.extract_strided_slice %174 {offsets = [0, 4], sizes = [8, 16], strides = [1, 1]} : vector<8x20xf32> to vector<8x16xf32>
    %197 = vector.broadcast %195 : f32 to vector<8x16xf32>
    %198 = arith.mulf %197, %196 : vector<8x16xf32>
    %199 = arith.addf %194, %198 : vector<8x16xf32>
    %c0_121 = arith.constant 0 : index
    %c1_122 = arith.constant 1 : index
    %c0_123 = arith.constant 0 : index
    %200 = vector.load %arg8[%c0_121, %c1_122, %c0_123] : memref<4x12x20xf32, #tpu.memory_space<vmem>>, vector<1x8x20xf32>
    %201 = vector.shape_cast %200 : vector<1x8x20xf32> to vector<8x20xf32>
    %c0_124 = arith.constant 0 : index
    %c5 = arith.constant 5 : index
    %202 = memref.load %arg4[%c0_124, %c5] : memref<4x25xf32, #tpu.memory_space<smem>>
    %203 = vector.extract_strided_slice %201 {offsets = [0, 0], sizes = [8, 16], strides = [1, 1]} : vector<8x20xf32> to vector<8x16xf32>
    %204 = vector.broadcast %202 : f32 to vector<8x16xf32>
    %205 = arith.mulf %204, %203 : vector<8x16xf32>
    %206 = arith.addf %199, %205 : vector<8x16xf32>
    %c0_125 = arith.constant 0 : index
    %c6 = arith.constant 6 : index
    %207 = memref.load %arg4[%c0_125, %c6] : memref<4x25xf32, #tpu.memory_space<smem>>
    %208 = vector.extract_strided_slice %201 {offsets = [0, 1], sizes = [8, 16], strides = [1, 1]} : vector<8x20xf32> to vector<8x16xf32>
    %209 = vector.broadcast %207 : f32 to vector<8x16xf32>
    %210 = arith.mulf %209, %208 : vector<8x16xf32>
    %211 = arith.addf %206, %210 : vector<8x16xf32>
    %c0_126 = arith.constant 0 : index
    %c7 = arith.constant 7 : index
    %212 = memref.load %arg4[%c0_126, %c7] : memref<4x25xf32, #tpu.memory_space<smem>>
    %213 = vector.extract_strided_slice %201 {offsets = [0, 2], sizes = [8, 16], strides = [1, 1]} : vector<8x20xf32> to vector<8x16xf32>
    %214 = vector.broadcast %212 : f32 to vector<8x16xf32>
    %215 = arith.mulf %214, %213 : vector<8x16xf32>
    %216 = arith.addf %211, %215 : vector<8x16xf32>
    %c0_127 = arith.constant 0 : index
    %c8 = arith.constant 8 : index
    %217 = memref.load %arg4[%c0_127, %c8] : memref<4x25xf32, #tpu.memory_space<smem>>
    %218 = vector.extract_strided_slice %201 {offsets = [0, 3], sizes = [8, 16], strides = [1, 1]} : vector<8x20xf32> to vector<8x16xf32>
    %219 = vector.broadcast %217 : f32 to vector<8x16xf32>
    %220 = arith.mulf %219, %218 : vector<8x16xf32>
    %221 = arith.addf %216, %220 : vector<8x16xf32>
    %c0_128 = arith.constant 0 : index
    %c9 = arith.constant 9 : index
    %222 = memref.load %arg4[%c0_128, %c9] : memref<4x25xf32, #tpu.memory_space<smem>>
    %223 = vector.extract_strided_slice %201 {offsets = [0, 4], sizes = [8, 16], strides = [1, 1]} : vector<8x20xf32> to vector<8x16xf32>
    %224 = vector.broadcast %222 : f32 to vector<8x16xf32>
    %225 = arith.mulf %224, %223 : vector<8x16xf32>
    %226 = arith.addf %221, %225 : vector<8x16xf32>
    %c0_129 = arith.constant 0 : index
    %c2_130 = arith.constant 2 : index
    %c0_131 = arith.constant 0 : index
    %227 = vector.load %arg8[%c0_129, %c2_130, %c0_131] : memref<4x12x20xf32, #tpu.memory_space<vmem>>, vector<1x8x20xf32>
    %228 = vector.shape_cast %227 : vector<1x8x20xf32> to vector<8x20xf32>
    %c0_132 = arith.constant 0 : index
    %c10 = arith.constant 10 : index
    %229 = memref.load %arg4[%c0_132, %c10] : memref<4x25xf32, #tpu.memory_space<smem>>
    %230 = vector.extract_strided_slice %228 {offsets = [0, 0], sizes = [8, 16], strides = [1, 1]} : vector<8x20xf32> to vector<8x16xf32>
    %231 = vector.broadcast %229 : f32 to vector<8x16xf32>
    %232 = arith.mulf %231, %230 : vector<8x16xf32>
    %233 = arith.addf %226, %232 : vector<8x16xf32>
    %c0_133 = arith.constant 0 : index
    %c11 = arith.constant 11 : index
    %234 = memref.load %arg4[%c0_133, %c11] : memref<4x25xf32, #tpu.memory_space<smem>>
    %235 = vector.extract_strided_slice %228 {offsets = [0, 1], sizes = [8, 16], strides = [1, 1]} : vector<8x20xf32> to vector<8x16xf32>
    %236 = vector.broadcast %234 : f32 to vector<8x16xf32>
    %237 = arith.mulf %236, %235 : vector<8x16xf32>
    %238 = arith.addf %233, %237 : vector<8x16xf32>
    %c0_134 = arith.constant 0 : index
    %c12 = arith.constant 12 : index
    %239 = memref.load %arg4[%c0_134, %c12] : memref<4x25xf32, #tpu.memory_space<smem>>
    %240 = vector.extract_strided_slice %228 {offsets = [0, 2], sizes = [8, 16], strides = [1, 1]} : vector<8x20xf32> to vector<8x16xf32>
    %241 = vector.broadcast %239 : f32 to vector<8x16xf32>
    %242 = arith.mulf %241, %240 : vector<8x16xf32>
    %243 = arith.addf %238, %242 : vector<8x16xf32>
    %c0_135 = arith.constant 0 : index
    %c13 = arith.constant 13 : index
    %244 = memref.load %arg4[%c0_135, %c13] : memref<4x25xf32, #tpu.memory_space<smem>>
    %245 = vector.extract_strided_slice %228 {offsets = [0, 3], sizes = [8, 16], strides = [1, 1]} : vector<8x20xf32> to vector<8x16xf32>
    %246 = vector.broadcast %244 : f32 to vector<8x16xf32>
    %247 = arith.mulf %246, %245 : vector<8x16xf32>
    %248 = arith.addf %243, %247 : vector<8x16xf32>
    %c0_136 = arith.constant 0 : index
    %c14 = arith.constant 14 : index
    %249 = memref.load %arg4[%c0_136, %c14] : memref<4x25xf32, #tpu.memory_space<smem>>
    %250 = vector.extract_strided_slice %228 {offsets = [0, 4], sizes = [8, 16], strides = [1, 1]} : vector<8x20xf32> to vector<8x16xf32>
    %251 = vector.broadcast %249 : f32 to vector<8x16xf32>
    %252 = arith.mulf %251, %250 : vector<8x16xf32>
    %253 = arith.addf %248, %252 : vector<8x16xf32>
    %c0_137 = arith.constant 0 : index
    %c3_138 = arith.constant 3 : index
    %c0_139 = arith.constant 0 : index
    %254 = vector.load %arg8[%c0_137, %c3_138, %c0_139] : memref<4x12x20xf32, #tpu.memory_space<vmem>>, vector<1x8x20xf32>
    %255 = vector.shape_cast %254 : vector<1x8x20xf32> to vector<8x20xf32>
    %c0_140 = arith.constant 0 : index
    %c15 = arith.constant 15 : index
    %256 = memref.load %arg4[%c0_140, %c15] : memref<4x25xf32, #tpu.memory_space<smem>>
    %257 = vector.extract_strided_slice %255 {offsets = [0, 0], sizes = [8, 16], strides = [1, 1]} : vector<8x20xf32> to vector<8x16xf32>
    %258 = vector.broadcast %256 : f32 to vector<8x16xf32>
    %259 = arith.mulf %258, %257 : vector<8x16xf32>
    %260 = arith.addf %253, %259 : vector<8x16xf32>
    %c0_141 = arith.constant 0 : index
    %c16 = arith.constant 16 : index
    %261 = memref.load %arg4[%c0_141, %c16] : memref<4x25xf32, #tpu.memory_space<smem>>
    %262 = vector.extract_strided_slice %255 {offsets = [0, 1], sizes = [8, 16], strides = [1, 1]} : vector<8x20xf32> to vector<8x16xf32>
    %263 = vector.broadcast %261 : f32 to vector<8x16xf32>
    %264 = arith.mulf %263, %262 : vector<8x16xf32>
    %265 = arith.addf %260, %264 : vector<8x16xf32>
    %c0_142 = arith.constant 0 : index
    %c17 = arith.constant 17 : index
    %266 = memref.load %arg4[%c0_142, %c17] : memref<4x25xf32, #tpu.memory_space<smem>>
    %267 = vector.extract_strided_slice %255 {offsets = [0, 2], sizes = [8, 16], strides = [1, 1]} : vector<8x20xf32> to vector<8x16xf32>
    %268 = vector.broadcast %266 : f32 to vector<8x16xf32>
    %269 = arith.mulf %268, %267 : vector<8x16xf32>
    %270 = arith.addf %265, %269 : vector<8x16xf32>
    %c0_143 = arith.constant 0 : index
    %c18 = arith.constant 18 : index
    %271 = memref.load %arg4[%c0_143, %c18] : memref<4x25xf32, #tpu.memory_space<smem>>
    %272 = vector.extract_strided_slice %255 {offsets = [0, 3], sizes = [8, 16], strides = [1, 1]} : vector<8x20xf32> to vector<8x16xf32>
    %273 = vector.broadcast %271 : f32 to vector<8x16xf32>
    %274 = arith.mulf %273, %272 : vector<8x16xf32>
    %275 = arith.addf %270, %274 : vector<8x16xf32>
    %c0_144 = arith.constant 0 : index
    %c19 = arith.constant 19 : index
    %276 = memref.load %arg4[%c0_144, %c19] : memref<4x25xf32, #tpu.memory_space<smem>>
    %277 = vector.extract_strided_slice %255 {offsets = [0, 4], sizes = [8, 16], strides = [1, 1]} : vector<8x20xf32> to vector<8x16xf32>
    %278 = vector.broadcast %276 : f32 to vector<8x16xf32>
    %279 = arith.mulf %278, %277 : vector<8x16xf32>
    %280 = arith.addf %275, %279 : vector<8x16xf32>
    %c0_145 = arith.constant 0 : index
    %c4_146 = arith.constant 4 : index
    %c0_147 = arith.constant 0 : index
    %281 = vector.load %arg8[%c0_145, %c4_146, %c0_147] : memref<4x12x20xf32, #tpu.memory_space<vmem>>, vector<1x8x20xf32>
    %282 = vector.shape_cast %281 : vector<1x8x20xf32> to vector<8x20xf32>
    %c0_148 = arith.constant 0 : index
    %c20 = arith.constant 20 : index
    %283 = memref.load %arg4[%c0_148, %c20] : memref<4x25xf32, #tpu.memory_space<smem>>
    %284 = vector.extract_strided_slice %282 {offsets = [0, 0], sizes = [8, 16], strides = [1, 1]} : vector<8x20xf32> to vector<8x16xf32>
    %285 = vector.broadcast %283 : f32 to vector<8x16xf32>
    %286 = arith.mulf %285, %284 : vector<8x16xf32>
    %287 = arith.addf %280, %286 : vector<8x16xf32>
    %c0_149 = arith.constant 0 : index
    %c21 = arith.constant 21 : index
    %288 = memref.load %arg4[%c0_149, %c21] : memref<4x25xf32, #tpu.memory_space<smem>>
    %289 = vector.extract_strided_slice %282 {offsets = [0, 1], sizes = [8, 16], strides = [1, 1]} : vector<8x20xf32> to vector<8x16xf32>
    %290 = vector.broadcast %288 : f32 to vector<8x16xf32>
    %291 = arith.mulf %290, %289 : vector<8x16xf32>
    %292 = arith.addf %287, %291 : vector<8x16xf32>
    %c0_150 = arith.constant 0 : index
    %c22 = arith.constant 22 : index
    %293 = memref.load %arg4[%c0_150, %c22] : memref<4x25xf32, #tpu.memory_space<smem>>
    %294 = vector.extract_strided_slice %282 {offsets = [0, 2], sizes = [8, 16], strides = [1, 1]} : vector<8x20xf32> to vector<8x16xf32>
    %295 = vector.broadcast %293 : f32 to vector<8x16xf32>
    %296 = arith.mulf %295, %294 : vector<8x16xf32>
    %297 = arith.addf %292, %296 : vector<8x16xf32>
    %c0_151 = arith.constant 0 : index
    %c23 = arith.constant 23 : index
    %298 = memref.load %arg4[%c0_151, %c23] : memref<4x25xf32, #tpu.memory_space<smem>>
    %299 = vector.extract_strided_slice %282 {offsets = [0, 3], sizes = [8, 16], strides = [1, 1]} : vector<8x20xf32> to vector<8x16xf32>
    %300 = vector.broadcast %298 : f32 to vector<8x16xf32>
    %301 = arith.mulf %300, %299 : vector<8x16xf32>
    %302 = arith.addf %297, %301 : vector<8x16xf32>
    %c0_152 = arith.constant 0 : index
    %c24 = arith.constant 24 : index
    %303 = memref.load %arg4[%c0_152, %c24] : memref<4x25xf32, #tpu.memory_space<smem>>
    %304 = vector.extract_strided_slice %282 {offsets = [0, 4], sizes = [8, 16], strides = [1, 1]} : vector<8x20xf32> to vector<8x16xf32>
    %305 = vector.broadcast %303 : f32 to vector<8x16xf32>
    %306 = arith.mulf %305, %304 : vector<8x16xf32>
    %307 = arith.addf %302, %306 : vector<8x16xf32>
    %308 = arith.negf %307 : vector<8x16xf32>
    %309 = math.exp %308 : vector<8x16xf32>
    %cst_153 = arith.constant 1.000000e+00 : f32
    %310 = vector.broadcast %cst_153 : f32 to vector<8x16xf32>
    %311 = arith.addf %310, %309 : vector<8x16xf32>
    %312 = arith.divf %310, %311 : vector<8x16xf32>
    %313 = arith.mulf %307, %312 : vector<8x16xf32>
    %c0_154 = arith.constant 0 : index
    %c2_155 = arith.constant 2 : index
    %c0_156 = arith.constant 0 : index
    %c0_157 = arith.constant 0 : index
    %314 = vector.load %arg7[%c0_154, %c2_155, %c0_156, %c0_157] : memref<1x8x8x16xf32, #tpu.memory_space<vmem>>, vector<1x1x8x16xf32>
    %315 = vector.shape_cast %314 : vector<1x1x8x16xf32> to vector<8x16xf32>
    %316 = vector.shape_cast %313 : vector<8x16xf32> to vector<1x1x8x16xf32>
    tpu.vector_store %arg7[%c0_154, %c2_155, %c0_156, %c0_157], %316 {strides = array<i32>} : memref<1x8x8x16xf32, #tpu.memory_space<vmem>>, vector<1x1x8x16xf32>,
    %c1_158 = arith.constant 1 : index
    %c2_159 = arith.constant 2 : index
    %c2_160 = arith.constant 2 : index
    %317 = vector.load %arg8[%c1_158, %c2_159, %c2_160] : memref<4x12x20xf32, #tpu.memory_space<vmem>>, vector<1x8x16xf32>
    %318 = vector.shape_cast %317 : vector<1x8x16xf32> to vector<8x16xf32>
    %c0_161 = arith.constant 0 : index
    %c4_162 = arith.constant 4 : index
    %c0_163 = arith.constant 0 : index
    %c0_164 = arith.constant 0 : index
    %319 = vector.load %arg7[%c0_161, %c4_162, %c0_163, %c0_164] : memref<1x8x8x16xf32, #tpu.memory_space<vmem>>, vector<1x1x8x16xf32>
    %320 = vector.shape_cast %319 : vector<1x1x8x16xf32> to vector<8x16xf32>
    %321 = vector.shape_cast %318 : vector<8x16xf32> to vector<1x1x8x16xf32>
    tpu.vector_store %arg7[%c0_161, %c4_162, %c0_163, %c0_164], %321 {strides = array<i32>} : memref<1x8x8x16xf32, #tpu.memory_space<vmem>>, vector<1x1x8x16xf32>,
    %c1_165 = arith.constant 1 : index
    %322 = memref.load %arg5[%c1_165] : memref<4xf32, #tpu.memory_space<smem>>
    %323 = vector.broadcast %322 : f32 to vector<8x16xf32>
    %c1_166 = arith.constant 1 : index
    %c0_167 = arith.constant 0 : index
    %c0_168 = arith.constant 0 : index
    %324 = vector.load %arg8[%c1_166, %c0_167, %c0_168] : memref<4x12x20xf32, #tpu.memory_space<vmem>>, vector<1x8x20xf32>
    %325 = vector.shape_cast %324 : vector<1x8x20xf32> to vector<8x20xf32>
    %c1_169 = arith.constant 1 : index
    %c0_170 = arith.constant 0 : index
    %326 = memref.load %arg4[%c1_169, %c0_170] : memref<4x25xf32, #tpu.memory_space<smem>>
    %327 = vector.extract_strided_slice %325 {offsets = [0, 0], sizes = [8, 16], strides = [1, 1]} : vector<8x20xf32> to vector<8x16xf32>
    %328 = vector.broadcast %326 : f32 to vector<8x16xf32>
    %329 = arith.mulf %328, %327 : vector<8x16xf32>
    %330 = arith.addf %323, %329 : vector<8x16xf32>
    %c1_171 = arith.constant 1 : index
    %c1_172 = arith.constant 1 : index
    %331 = memref.load %arg4[%c1_171, %c1_172] : memref<4x25xf32, #tpu.memory_space<smem>>
    %332 = vector.extract_strided_slice %325 {offsets = [0, 1], sizes = [8, 16], strides = [1, 1]} : vector<8x20xf32> to vector<8x16xf32>
    %333 = vector.broadcast %331 : f32 to vector<8x16xf32>
    %334 = arith.mulf %333, %332 : vector<8x16xf32>
    %335 = arith.addf %330, %334 : vector<8x16xf32>
    %c1_173 = arith.constant 1 : index
    %c2_174 = arith.constant 2 : index
    %336 = memref.load %arg4[%c1_173, %c2_174] : memref<4x25xf32, #tpu.memory_space<smem>>
    %337 = vector.extract_strided_slice %325 {offsets = [0, 2], sizes = [8, 16], strides = [1, 1]} : vector<8x20xf32> to vector<8x16xf32>
    %338 = vector.broadcast %336 : f32 to vector<8x16xf32>
    %339 = arith.mulf %338, %337 : vector<8x16xf32>
    %340 = arith.addf %335, %339 : vector<8x16xf32>
    %c1_175 = arith.constant 1 : index
    %c3_176 = arith.constant 3 : index
    %341 = memref.load %arg4[%c1_175, %c3_176] : memref<4x25xf32, #tpu.memory_space<smem>>
    %342 = vector.extract_strided_slice %325 {offsets = [0, 3], sizes = [8, 16], strides = [1, 1]} : vector<8x20xf32> to vector<8x16xf32>
    %343 = vector.broadcast %341 : f32 to vector<8x16xf32>
    %344 = arith.mulf %343, %342 : vector<8x16xf32>
    %345 = arith.addf %340, %344 : vector<8x16xf32>
    %c1_177 = arith.constant 1 : index
    %c4_178 = arith.constant 4 : index
    %346 = memref.load %arg4[%c1_177, %c4_178] : memref<4x25xf32, #tpu.memory_space<smem>>
    %347 = vector.extract_strided_slice %325 {offsets = [0, 4], sizes = [8, 16], strides = [1, 1]} : vector<8x20xf32> to vector<8x16xf32>
    %348 = vector.broadcast %346 : f32 to vector<8x16xf32>
    %349 = arith.mulf %348, %347 : vector<8x16xf32>
    %350 = arith.addf %345, %349 : vector<8x16xf32>
    %c1_179 = arith.constant 1 : index
    %c1_180 = arith.constant 1 : index
    %c0_181 = arith.constant 0 : index
    %351 = vector.load %arg8[%c1_179, %c1_180, %c0_181] : memref<4x12x20xf32, #tpu.memory_space<vmem>>, vector<1x8x20xf32>
    %352 = vector.shape_cast %351 : vector<1x8x20xf32> to vector<8x20xf32>
    %c1_182 = arith.constant 1 : index
    %c5_183 = arith.constant 5 : index
    %353 = memref.load %arg4[%c1_182, %c5_183] : memref<4x25xf32, #tpu.memory_space<smem>>
    %354 = vector.extract_strided_slice %352 {offsets = [0, 0], sizes = [8, 16], strides = [1, 1]} : vector<8x20xf32> to vector<8x16xf32>
    %355 = vector.broadcast %353 : f32 to vector<8x16xf32>
    %356 = arith.mulf %355, %354 : vector<8x16xf32>
    %357 = arith.addf %350, %356 : vector<8x16xf32>
    %c1_184 = arith.constant 1 : index
    %c6_185 = arith.constant 6 : index
    %358 = memref.load %arg4[%c1_184, %c6_185] : memref<4x25xf32, #tpu.memory_space<smem>>
    %359 = vector.extract_strided_slice %352 {offsets = [0, 1], sizes = [8, 16], strides = [1, 1]} : vector<8x20xf32> to vector<8x16xf32>
    %360 = vector.broadcast %358 : f32 to vector<8x16xf32>
    %361 = arith.mulf %360, %359 : vector<8x16xf32>
    %362 = arith.addf %357, %361 : vector<8x16xf32>
    %c1_186 = arith.constant 1 : index
    %c7_187 = arith.constant 7 : index
    %363 = memref.load %arg4[%c1_186, %c7_187] : memref<4x25xf32, #tpu.memory_space<smem>>
    %364 = vector.extract_strided_slice %352 {offsets = [0, 2], sizes = [8, 16], strides = [1, 1]} : vector<8x20xf32> to vector<8x16xf32>
    %365 = vector.broadcast %363 : f32 to vector<8x16xf32>
    %366 = arith.mulf %365, %364 : vector<8x16xf32>
    %367 = arith.addf %362, %366 : vector<8x16xf32>
    %c1_188 = arith.constant 1 : index
    %c8_189 = arith.constant 8 : index
    %368 = memref.load %arg4[%c1_188, %c8_189] : memref<4x25xf32, #tpu.memory_space<smem>>
    %369 = vector.extract_strided_slice %352 {offsets = [0, 3], sizes = [8, 16], strides = [1, 1]} : vector<8x20xf32> to vector<8x16xf32>
    %370 = vector.broadcast %368 : f32 to vector<8x16xf32>
    %371 = arith.mulf %370, %369 : vector<8x16xf32>
    %372 = arith.addf %367, %371 : vector<8x16xf32>
    %c1_190 = arith.constant 1 : index
    %c9_191 = arith.constant 9 : index
    %373 = memref.load %arg4[%c1_190, %c9_191] : memref<4x25xf32, #tpu.memory_space<smem>>
    %374 = vector.extract_strided_slice %352 {offsets = [0, 4], sizes = [8, 16], strides = [1, 1]} : vector<8x20xf32> to vector<8x16xf32>
    %375 = vector.broadcast %373 : f32 to vector<8x16xf32>
    %376 = arith.mulf %375, %374 : vector<8x16xf32>
    %377 = arith.addf %372, %376 : vector<8x16xf32>
    %c1_192 = arith.constant 1 : index
    %c2_193 = arith.constant 2 : index
    %c0_194 = arith.constant 0 : index
    %378 = vector.load %arg8[%c1_192, %c2_193, %c0_194] : memref<4x12x20xf32, #tpu.memory_space<vmem>>, vector<1x8x20xf32>
    %379 = vector.shape_cast %378 : vector<1x8x20xf32> to vector<8x20xf32>
    %c1_195 = arith.constant 1 : index
    %c10_196 = arith.constant 10 : index
    %380 = memref.load %arg4[%c1_195, %c10_196] : memref<4x25xf32, #tpu.memory_space<smem>>
    %381 = vector.extract_strided_slice %379 {offsets = [0, 0], sizes = [8, 16], strides = [1, 1]} : vector<8x20xf32> to vector<8x16xf32>
    %382 = vector.broadcast %380 : f32 to vector<8x16xf32>
    %383 = arith.mulf %382, %381 : vector<8x16xf32>
    %384 = arith.addf %377, %383 : vector<8x16xf32>
    %c1_197 = arith.constant 1 : index
    %c11_198 = arith.constant 11 : index
    %385 = memref.load %arg4[%c1_197, %c11_198] : memref<4x25xf32, #tpu.memory_space<smem>>
    %386 = vector.extract_strided_slice %379 {offsets = [0, 1], sizes = [8, 16], strides = [1, 1]} : vector<8x20xf32> to vector<8x16xf32>
    %387 = vector.broadcast %385 : f32 to vector<8x16xf32>
    %388 = arith.mulf %387, %386 : vector<8x16xf32>
    %389 = arith.addf %384, %388 : vector<8x16xf32>
    %c1_199 = arith.constant 1 : index
    %c12_200 = arith.constant 12 : index
    %390 = memref.load %arg4[%c1_199, %c12_200] : memref<4x25xf32, #tpu.memory_space<smem>>
    %391 = vector.extract_strided_slice %379 {offsets = [0, 2], sizes = [8, 16], strides = [1, 1]} : vector<8x20xf32> to vector<8x16xf32>
    %392 = vector.broadcast %390 : f32 to vector<8x16xf32>
    %393 = arith.mulf %392, %391 : vector<8x16xf32>
    %394 = arith.addf %389, %393 : vector<8x16xf32>
    %c1_201 = arith.constant 1 : index
    %c13_202 = arith.constant 13 : index
    %395 = memref.load %arg4[%c1_201, %c13_202] : memref<4x25xf32, #tpu.memory_space<smem>>
    %396 = vector.extract_strided_slice %379 {offsets = [0, 3], sizes = [8, 16], strides = [1, 1]} : vector<8x20xf32> to vector<8x16xf32>
    %397 = vector.broadcast %395 : f32 to vector<8x16xf32>
    %398 = arith.mulf %397, %396 : vector<8x16xf32>
    %399 = arith.addf %394, %398 : vector<8x16xf32>
    %c1_203 = arith.constant 1 : index
    %c14_204 = arith.constant 14 : index
    %400 = memref.load %arg4[%c1_203, %c14_204] : memref<4x25xf32, #tpu.memory_space<smem>>
    %401 = vector.extract_strided_slice %379 {offsets = [0, 4], sizes = [8, 16], strides = [1, 1]} : vector<8x20xf32> to vector<8x16xf32>
    %402 = vector.broadcast %400 : f32 to vector<8x16xf32>
    %403 = arith.mulf %402, %401 : vector<8x16xf32>
    %404 = arith.addf %399, %403 : vector<8x16xf32>
    %c1_205 = arith.constant 1 : index
    %c3_206 = arith.constant 3 : index
    %c0_207 = arith.constant 0 : index
    %405 = vector.load %arg8[%c1_205, %c3_206, %c0_207] : memref<4x12x20xf32, #tpu.memory_space<vmem>>, vector<1x8x20xf32>
    %406 = vector.shape_cast %405 : vector<1x8x20xf32> to vector<8x20xf32>
    %c1_208 = arith.constant 1 : index
    %c15_209 = arith.constant 15 : index
    %407 = memref.load %arg4[%c1_208, %c15_209] : memref<4x25xf32, #tpu.memory_space<smem>>
    %408 = vector.extract_strided_slice %406 {offsets = [0, 0], sizes = [8, 16], strides = [1, 1]} : vector<8x20xf32> to vector<8x16xf32>
    %409 = vector.broadcast %407 : f32 to vector<8x16xf32>
    %410 = arith.mulf %409, %408 : vector<8x16xf32>
    %411 = arith.addf %404, %410 : vector<8x16xf32>
    %c1_210 = arith.constant 1 : index
    %c16_211 = arith.constant 16 : index
    %412 = memref.load %arg4[%c1_210, %c16_211] : memref<4x25xf32, #tpu.memory_space<smem>>
    %413 = vector.extract_strided_slice %406 {offsets = [0, 1], sizes = [8, 16], strides = [1, 1]} : vector<8x20xf32> to vector<8x16xf32>
    %414 = vector.broadcast %412 : f32 to vector<8x16xf32>
    %415 = arith.mulf %414, %413 : vector<8x16xf32>
    %416 = arith.addf %411, %415 : vector<8x16xf32>
    %c1_212 = arith.constant 1 : index
    %c17_213 = arith.constant 17 : index
    %417 = memref.load %arg4[%c1_212, %c17_213] : memref<4x25xf32, #tpu.memory_space<smem>>
    %418 = vector.extract_strided_slice %406 {offsets = [0, 2], sizes = [8, 16], strides = [1, 1]} : vector<8x20xf32> to vector<8x16xf32>
    %419 = vector.broadcast %417 : f32 to vector<8x16xf32>
    %420 = arith.mulf %419, %418 : vector<8x16xf32>
    %421 = arith.addf %416, %420 : vector<8x16xf32>
    %c1_214 = arith.constant 1 : index
    %c18_215 = arith.constant 18 : index
    %422 = memref.load %arg4[%c1_214, %c18_215] : memref<4x25xf32, #tpu.memory_space<smem>>
    %423 = vector.extract_strided_slice %406 {offsets = [0, 3], sizes = [8, 16], strides = [1, 1]} : vector<8x20xf32> to vector<8x16xf32>
    %424 = vector.broadcast %422 : f32 to vector<8x16xf32>
    %425 = arith.mulf %424, %423 : vector<8x16xf32>
    %426 = arith.addf %421, %425 : vector<8x16xf32>
    %c1_216 = arith.constant 1 : index
    %c19_217 = arith.constant 19 : index
    %427 = memref.load %arg4[%c1_216, %c19_217] : memref<4x25xf32, #tpu.memory_space<smem>>
    %428 = vector.extract_strided_slice %406 {offsets = [0, 4], sizes = [8, 16], strides = [1, 1]} : vector<8x20xf32> to vector<8x16xf32>
    %429 = vector.broadcast %427 : f32 to vector<8x16xf32>
    %430 = arith.mulf %429, %428 : vector<8x16xf32>
    %431 = arith.addf %426, %430 : vector<8x16xf32>
    %c1_218 = arith.constant 1 : index
    %c4_219 = arith.constant 4 : index
    %c0_220 = arith.constant 0 : index
    %432 = vector.load %arg8[%c1_218, %c4_219, %c0_220] : memref<4x12x20xf32, #tpu.memory_space<vmem>>, vector<1x8x20xf32>
    %433 = vector.shape_cast %432 : vector<1x8x20xf32> to vector<8x20xf32>
    %c1_221 = arith.constant 1 : index
    %c20_222 = arith.constant 20 : index
    %434 = memref.load %arg4[%c1_221, %c20_222] : memref<4x25xf32, #tpu.memory_space<smem>>
    %435 = vector.extract_strided_slice %433 {offsets = [0, 0], sizes = [8, 16], strides = [1, 1]} : vector<8x20xf32> to vector<8x16xf32>
    %436 = vector.broadcast %434 : f32 to vector<8x16xf32>
    %437 = arith.mulf %436, %435 : vector<8x16xf32>
    %438 = arith.addf %431, %437 : vector<8x16xf32>
    %c1_223 = arith.constant 1 : index
    %c21_224 = arith.constant 21 : index
    %439 = memref.load %arg4[%c1_223, %c21_224] : memref<4x25xf32, #tpu.memory_space<smem>>
    %440 = vector.extract_strided_slice %433 {offsets = [0, 1], sizes = [8, 16], strides = [1, 1]} : vector<8x20xf32> to vector<8x16xf32>
    %441 = vector.broadcast %439 : f32 to vector<8x16xf32>
    %442 = arith.mulf %441, %440 : vector<8x16xf32>
    %443 = arith.addf %438, %442 : vector<8x16xf32>
    %c1_225 = arith.constant 1 : index
    %c22_226 = arith.constant 22 : index
    %444 = memref.load %arg4[%c1_225, %c22_226] : memref<4x25xf32, #tpu.memory_space<smem>>
    %445 = vector.extract_strided_slice %433 {offsets = [0, 2], sizes = [8, 16], strides = [1, 1]} : vector<8x20xf32> to vector<8x16xf32>
    %446 = vector.broadcast %444 : f32 to vector<8x16xf32>
    %447 = arith.mulf %446, %445 : vector<8x16xf32>
    %448 = arith.addf %443, %447 : vector<8x16xf32>
    %c1_227 = arith.constant 1 : index
    %c23_228 = arith.constant 23 : index
    %449 = memref.load %arg4[%c1_227, %c23_228] : memref<4x25xf32, #tpu.memory_space<smem>>
    %450 = vector.extract_strided_slice %433 {offsets = [0, 3], sizes = [8, 16], strides = [1, 1]} : vector<8x20xf32> to vector<8x16xf32>
    %451 = vector.broadcast %449 : f32 to vector<8x16xf32>
    %452 = arith.mulf %451, %450 : vector<8x16xf32>
    %453 = arith.addf %448, %452 : vector<8x16xf32>
    %c1_229 = arith.constant 1 : index
    %c24_230 = arith.constant 24 : index
    %454 = memref.load %arg4[%c1_229, %c24_230] : memref<4x25xf32, #tpu.memory_space<smem>>
    %455 = vector.extract_strided_slice %433 {offsets = [0, 4], sizes = [8, 16], strides = [1, 1]} : vector<8x20xf32> to vector<8x16xf32>
    %456 = vector.broadcast %454 : f32 to vector<8x16xf32>
    %457 = arith.mulf %456, %455 : vector<8x16xf32>
    %458 = arith.addf %453, %457 : vector<8x16xf32>
    %459 = arith.negf %458 : vector<8x16xf32>
    %460 = math.exp %459 : vector<8x16xf32>
    %cst_231 = arith.constant 1.000000e+00 : f32
    %461 = vector.broadcast %cst_231 : f32 to vector<8x16xf32>
    %462 = arith.addf %461, %460 : vector<8x16xf32>
    %463 = arith.divf %461, %462 : vector<8x16xf32>
    %464 = arith.mulf %458, %463 : vector<8x16xf32>
    %c0_232 = arith.constant 0 : index
    %c6_233 = arith.constant 6 : index
    %c0_234 = arith.constant 0 : index
    %c0_235 = arith.constant 0 : index
    %465 = vector.load %arg7[%c0_232, %c6_233, %c0_234, %c0_235] : memref<1x8x8x16xf32, #tpu.memory_space<vmem>>, vector<1x1x8x16xf32>
    %466 = vector.shape_cast %465 : vector<1x1x8x16xf32> to vector<8x16xf32>
    %467 = vector.shape_cast %464 : vector<8x16xf32> to vector<1x1x8x16xf32>
    tpu.vector_store %arg7[%c0_232, %c6_233, %c0_234, %c0_235], %467 {strides = array<i32>} : memref<1x8x8x16xf32, #tpu.memory_space<vmem>>, vector<1x1x8x16xf32>,
    %c2_236 = arith.constant 2 : index
    %c2_237 = arith.constant 2 : index
    %c2_238 = arith.constant 2 : index
    %468 = vector.load %arg8[%c2_236, %c2_237, %c2_238] : memref<4x12x20xf32, #tpu.memory_space<vmem>>, vector<1x8x16xf32>
    %469 = vector.shape_cast %468 : vector<1x8x16xf32> to vector<8x16xf32>
    %c0_239 = arith.constant 0 : index
    %c1_240 = arith.constant 1 : index
    %c0_241 = arith.constant 0 : index
    %c0_242 = arith.constant 0 : index
    %470 = vector.load %arg7[%c0_239, %c1_240, %c0_241, %c0_242] : memref<1x8x8x16xf32, #tpu.memory_space<vmem>>, vector<1x1x8x16xf32>
    %471 = vector.shape_cast %470 : vector<1x1x8x16xf32> to vector<8x16xf32>
    %472 = vector.shape_cast %469 : vector<8x16xf32> to vector<1x1x8x16xf32>
    tpu.vector_store %arg7[%c0_239, %c1_240, %c0_241, %c0_242], %472 {strides = array<i32>} : memref<1x8x8x16xf32, #tpu.memory_space<vmem>>, vector<1x1x8x16xf32>,
    %c2_243 = arith.constant 2 : index
    %473 = memref.load %arg5[%c2_243] : memref<4xf32, #tpu.memory_space<smem>>
    %474 = vector.broadcast %473 : f32 to vector<8x16xf32>
    %c2_244 = arith.constant 2 : index
    %c0_245 = arith.constant 0 : index
    %c0_246 = arith.constant 0 : index
    %475 = vector.load %arg8[%c2_244, %c0_245, %c0_246] : memref<4x12x20xf32, #tpu.memory_space<vmem>>, vector<1x8x20xf32>
    %476 = vector.shape_cast %475 : vector<1x8x20xf32> to vector<8x20xf32>
    %c2_247 = arith.constant 2 : index
    %c0_248 = arith.constant 0 : index
    %477 = memref.load %arg4[%c2_247, %c0_248] : memref<4x25xf32, #tpu.memory_space<smem>>
    %478 = vector.extract_strided_slice %476 {offsets = [0, 0], sizes = [8, 16], strides = [1, 1]} : vector<8x20xf32> to vector<8x16xf32>
    %479 = vector.broadcast %477 : f32 to vector<8x16xf32>
    %480 = arith.mulf %479, %478 : vector<8x16xf32>
    %481 = arith.addf %474, %480 : vector<8x16xf32>
    %c2_249 = arith.constant 2 : index
    %c1_250 = arith.constant 1 : index
    %482 = memref.load %arg4[%c2_249, %c1_250] : memref<4x25xf32, #tpu.memory_space<smem>>
    %483 = vector.extract_strided_slice %476 {offsets = [0, 1], sizes = [8, 16], strides = [1, 1]} : vector<8x20xf32> to vector<8x16xf32>
    %484 = vector.broadcast %482 : f32 to vector<8x16xf32>
    %485 = arith.mulf %484, %483 : vector<8x16xf32>
    %486 = arith.addf %481, %485 : vector<8x16xf32>
    %c2_251 = arith.constant 2 : index
    %c2_252 = arith.constant 2 : index
    %487 = memref.load %arg4[%c2_251, %c2_252] : memref<4x25xf32, #tpu.memory_space<smem>>
    %488 = vector.extract_strided_slice %476 {offsets = [0, 2], sizes = [8, 16], strides = [1, 1]} : vector<8x20xf32> to vector<8x16xf32>
    %489 = vector.broadcast %487 : f32 to vector<8x16xf32>
    %490 = arith.mulf %489, %488 : vector<8x16xf32>
    %491 = arith.addf %486, %490 : vector<8x16xf32>
    %c2_253 = arith.constant 2 : index
    %c3_254 = arith.constant 3 : index
    %492 = memref.load %arg4[%c2_253, %c3_254] : memref<4x25xf32, #tpu.memory_space<smem>>
    %493 = vector.extract_strided_slice %476 {offsets = [0, 3], sizes = [8, 16], strides = [1, 1]} : vector<8x20xf32> to vector<8x16xf32>
    %494 = vector.broadcast %492 : f32 to vector<8x16xf32>
    %495 = arith.mulf %494, %493 : vector<8x16xf32>
    %496 = arith.addf %491, %495 : vector<8x16xf32>
    %c2_255 = arith.constant 2 : index
    %c4_256 = arith.constant 4 : index
    %497 = memref.load %arg4[%c2_255, %c4_256] : memref<4x25xf32, #tpu.memory_space<smem>>
    %498 = vector.extract_strided_slice %476 {offsets = [0, 4], sizes = [8, 16], strides = [1, 1]} : vector<8x20xf32> to vector<8x16xf32>
    %499 = vector.broadcast %497 : f32 to vector<8x16xf32>
    %500 = arith.mulf %499, %498 : vector<8x16xf32>
    %501 = arith.addf %496, %500 : vector<8x16xf32>
    %c2_257 = arith.constant 2 : index
    %c1_258 = arith.constant 1 : index
    %c0_259 = arith.constant 0 : index
    %502 = vector.load %arg8[%c2_257, %c1_258, %c0_259] : memref<4x12x20xf32, #tpu.memory_space<vmem>>, vector<1x8x20xf32>
    %503 = vector.shape_cast %502 : vector<1x8x20xf32> to vector<8x20xf32>
    %c2_260 = arith.constant 2 : index
    %c5_261 = arith.constant 5 : index
    %504 = memref.load %arg4[%c2_260, %c5_261] : memref<4x25xf32, #tpu.memory_space<smem>>
    %505 = vector.extract_strided_slice %503 {offsets = [0, 0], sizes = [8, 16], strides = [1, 1]} : vector<8x20xf32> to vector<8x16xf32>
    %506 = vector.broadcast %504 : f32 to vector<8x16xf32>
    %507 = arith.mulf %506, %505 : vector<8x16xf32>
    %508 = arith.addf %501, %507 : vector<8x16xf32>
    %c2_262 = arith.constant 2 : index
    %c6_263 = arith.constant 6 : index
    %509 = memref.load %arg4[%c2_262, %c6_263] : memref<4x25xf32, #tpu.memory_space<smem>>
    %510 = vector.extract_strided_slice %503 {offsets = [0, 1], sizes = [8, 16], strides = [1, 1]} : vector<8x20xf32> to vector<8x16xf32>
    %511 = vector.broadcast %509 : f32 to vector<8x16xf32>
    %512 = arith.mulf %511, %510 : vector<8x16xf32>
    %513 = arith.addf %508, %512 : vector<8x16xf32>
    %c2_264 = arith.constant 2 : index
    %c7_265 = arith.constant 7 : index
    %514 = memref.load %arg4[%c2_264, %c7_265] : memref<4x25xf32, #tpu.memory_space<smem>>
    %515 = vector.extract_strided_slice %503 {offsets = [0, 2], sizes = [8, 16], strides = [1, 1]} : vector<8x20xf32> to vector<8x16xf32>
    %516 = vector.broadcast %514 : f32 to vector<8x16xf32>
    %517 = arith.mulf %516, %515 : vector<8x16xf32>
    %518 = arith.addf %513, %517 : vector<8x16xf32>
    %c2_266 = arith.constant 2 : index
    %c8_267 = arith.constant 8 : index
    %519 = memref.load %arg4[%c2_266, %c8_267] : memref<4x25xf32, #tpu.memory_space<smem>>
    %520 = vector.extract_strided_slice %503 {offsets = [0, 3], sizes = [8, 16], strides = [1, 1]} : vector<8x20xf32> to vector<8x16xf32>
    %521 = vector.broadcast %519 : f32 to vector<8x16xf32>
    %522 = arith.mulf %521, %520 : vector<8x16xf32>
    %523 = arith.addf %518, %522 : vector<8x16xf32>
    %c2_268 = arith.constant 2 : index
    %c9_269 = arith.constant 9 : index
    %524 = memref.load %arg4[%c2_268, %c9_269] : memref<4x25xf32, #tpu.memory_space<smem>>
    %525 = vector.extract_strided_slice %503 {offsets = [0, 4], sizes = [8, 16], strides = [1, 1]} : vector<8x20xf32> to vector<8x16xf32>
    %526 = vector.broadcast %524 : f32 to vector<8x16xf32>
    %527 = arith.mulf %526, %525 : vector<8x16xf32>
    %528 = arith.addf %523, %527 : vector<8x16xf32>
    %c2_270 = arith.constant 2 : index
    %c2_271 = arith.constant 2 : index
    %c0_272 = arith.constant 0 : index
    %529 = vector.load %arg8[%c2_270, %c2_271, %c0_272] : memref<4x12x20xf32, #tpu.memory_space<vmem>>, vector<1x8x20xf32>
    %530 = vector.shape_cast %529 : vector<1x8x20xf32> to vector<8x20xf32>
    %c2_273 = arith.constant 2 : index
    %c10_274 = arith.constant 10 : index
    %531 = memref.load %arg4[%c2_273, %c10_274] : memref<4x25xf32, #tpu.memory_space<smem>>
    %532 = vector.extract_strided_slice %530 {offsets = [0, 0], sizes = [8, 16], strides = [1, 1]} : vector<8x20xf32> to vector<8x16xf32>
    %533 = vector.broadcast %531 : f32 to vector<8x16xf32>
    %534 = arith.mulf %533, %532 : vector<8x16xf32>
    %535 = arith.addf %528, %534 : vector<8x16xf32>
    %c2_275 = arith.constant 2 : index
    %c11_276 = arith.constant 11 : index
    %536 = memref.load %arg4[%c2_275, %c11_276] : memref<4x25xf32, #tpu.memory_space<smem>>
    %537 = vector.extract_strided_slice %530 {offsets = [0, 1], sizes = [8, 16], strides = [1, 1]} : vector<8x20xf32> to vector<8x16xf32>
    %538 = vector.broadcast %536 : f32 to vector<8x16xf32>
    %539 = arith.mulf %538, %537 : vector<8x16xf32>
    %540 = arith.addf %535, %539 : vector<8x16xf32>
    %c2_277 = arith.constant 2 : index
    %c12_278 = arith.constant 12 : index
    %541 = memref.load %arg4[%c2_277, %c12_278] : memref<4x25xf32, #tpu.memory_space<smem>>
    %542 = vector.extract_strided_slice %530 {offsets = [0, 2], sizes = [8, 16], strides = [1, 1]} : vector<8x20xf32> to vector<8x16xf32>
    %543 = vector.broadcast %541 : f32 to vector<8x16xf32>
    %544 = arith.mulf %543, %542 : vector<8x16xf32>
    %545 = arith.addf %540, %544 : vector<8x16xf32>
    %c2_279 = arith.constant 2 : index
    %c13_280 = arith.constant 13 : index
    %546 = memref.load %arg4[%c2_279, %c13_280] : memref<4x25xf32, #tpu.memory_space<smem>>
    %547 = vector.extract_strided_slice %530 {offsets = [0, 3], sizes = [8, 16], strides = [1, 1]} : vector<8x20xf32> to vector<8x16xf32>
    %548 = vector.broadcast %546 : f32 to vector<8x16xf32>
    %549 = arith.mulf %548, %547 : vector<8x16xf32>
    %550 = arith.addf %545, %549 : vector<8x16xf32>
    %c2_281 = arith.constant 2 : index
    %c14_282 = arith.constant 14 : index
    %551 = memref.load %arg4[%c2_281, %c14_282] : memref<4x25xf32, #tpu.memory_space<smem>>
    %552 = vector.extract_strided_slice %530 {offsets = [0, 4], sizes = [8, 16], strides = [1, 1]} : vector<8x20xf32> to vector<8x16xf32>
    %553 = vector.broadcast %551 : f32 to vector<8x16xf32>
    %554 = arith.mulf %553, %552 : vector<8x16xf32>
    %555 = arith.addf %550, %554 : vector<8x16xf32>
    %c2_283 = arith.constant 2 : index
    %c3_284 = arith.constant 3 : index
    %c0_285 = arith.constant 0 : index
    %556 = vector.load %arg8[%c2_283, %c3_284, %c0_285] : memref<4x12x20xf32, #tpu.memory_space<vmem>>, vector<1x8x20xf32>
    %557 = vector.shape_cast %556 : vector<1x8x20xf32> to vector<8x20xf32>
    %c2_286 = arith.constant 2 : index
    %c15_287 = arith.constant 15 : index
    %558 = memref.load %arg4[%c2_286, %c15_287] : memref<4x25xf32, #tpu.memory_space<smem>>
    %559 = vector.extract_strided_slice %557 {offsets = [0, 0], sizes = [8, 16], strides = [1, 1]} : vector<8x20xf32> to vector<8x16xf32>
    %560 = vector.broadcast %558 : f32 to vector<8x16xf32>
    %561 = arith.mulf %560, %559 : vector<8x16xf32>
    %562 = arith.addf %555, %561 : vector<8x16xf32>
    %c2_288 = arith.constant 2 : index
    %c16_289 = arith.constant 16 : index
    %563 = memref.load %arg4[%c2_288, %c16_289] : memref<4x25xf32, #tpu.memory_space<smem>>
    %564 = vector.extract_strided_slice %557 {offsets = [0, 1], sizes = [8, 16], strides = [1, 1]} : vector<8x20xf32> to vector<8x16xf32>
    %565 = vector.broadcast %563 : f32 to vector<8x16xf32>
    %566 = arith.mulf %565, %564 : vector<8x16xf32>
    %567 = arith.addf %562, %566 : vector<8x16xf32>
    %c2_290 = arith.constant 2 : index
    %c17_291 = arith.constant 17 : index
    %568 = memref.load %arg4[%c2_290, %c17_291] : memref<4x25xf32, #tpu.memory_space<smem>>
    %569 = vector.extract_strided_slice %557 {offsets = [0, 2], sizes = [8, 16], strides = [1, 1]} : vector<8x20xf32> to vector<8x16xf32>
    %570 = vector.broadcast %568 : f32 to vector<8x16xf32>
    %571 = arith.mulf %570, %569 : vector<8x16xf32>
    %572 = arith.addf %567, %571 : vector<8x16xf32>
    %c2_292 = arith.constant 2 : index
    %c18_293 = arith.constant 18 : index
    %573 = memref.load %arg4[%c2_292, %c18_293] : memref<4x25xf32, #tpu.memory_space<smem>>
    %574 = vector.extract_strided_slice %557 {offsets = [0, 3], sizes = [8, 16], strides = [1, 1]} : vector<8x20xf32> to vector<8x16xf32>
    %575 = vector.broadcast %573 : f32 to vector<8x16xf32>
    %576 = arith.mulf %575, %574 : vector<8x16xf32>
    %577 = arith.addf %572, %576 : vector<8x16xf32>
    %c2_294 = arith.constant 2 : index
    %c19_295 = arith.constant 19 : index
    %578 = memref.load %arg4[%c2_294, %c19_295] : memref<4x25xf32, #tpu.memory_space<smem>>
    %579 = vector.extract_strided_slice %557 {offsets = [0, 4], sizes = [8, 16], strides = [1, 1]} : vector<8x20xf32> to vector<8x16xf32>
    %580 = vector.broadcast %578 : f32 to vector<8x16xf32>
    %581 = arith.mulf %580, %579 : vector<8x16xf32>
    %582 = arith.addf %577, %581 : vector<8x16xf32>
    %c2_296 = arith.constant 2 : index
    %c4_297 = arith.constant 4 : index
    %c0_298 = arith.constant 0 : index
    %583 = vector.load %arg8[%c2_296, %c4_297, %c0_298] : memref<4x12x20xf32, #tpu.memory_space<vmem>>, vector<1x8x20xf32>
    %584 = vector.shape_cast %583 : vector<1x8x20xf32> to vector<8x20xf32>
    %c2_299 = arith.constant 2 : index
    %c20_300 = arith.constant 20 : index
    %585 = memref.load %arg4[%c2_299, %c20_300] : memref<4x25xf32, #tpu.memory_space<smem>>
    %586 = vector.extract_strided_slice %584 {offsets = [0, 0], sizes = [8, 16], strides = [1, 1]} : vector<8x20xf32> to vector<8x16xf32>
    %587 = vector.broadcast %585 : f32 to vector<8x16xf32>
    %588 = arith.mulf %587, %586 : vector<8x16xf32>
    %589 = arith.addf %582, %588 : vector<8x16xf32>
    %c2_301 = arith.constant 2 : index
    %c21_302 = arith.constant 21 : index
    %590 = memref.load %arg4[%c2_301, %c21_302] : memref<4x25xf32, #tpu.memory_space<smem>>
    %591 = vector.extract_strided_slice %584 {offsets = [0, 1], sizes = [8, 16], strides = [1, 1]} : vector<8x20xf32> to vector<8x16xf32>
    %592 = vector.broadcast %590 : f32 to vector<8x16xf32>
    %593 = arith.mulf %592, %591 : vector<8x16xf32>
    %594 = arith.addf %589, %593 : vector<8x16xf32>
    %c2_303 = arith.constant 2 : index
    %c22_304 = arith.constant 22 : index
    %595 = memref.load %arg4[%c2_303, %c22_304] : memref<4x25xf32, #tpu.memory_space<smem>>
    %596 = vector.extract_strided_slice %584 {offsets = [0, 2], sizes = [8, 16], strides = [1, 1]} : vector<8x20xf32> to vector<8x16xf32>
    %597 = vector.broadcast %595 : f32 to vector<8x16xf32>
    %598 = arith.mulf %597, %596 : vector<8x16xf32>
    %599 = arith.addf %594, %598 : vector<8x16xf32>
    %c2_305 = arith.constant 2 : index
    %c23_306 = arith.constant 23 : index
    %600 = memref.load %arg4[%c2_305, %c23_306] : memref<4x25xf32, #tpu.memory_space<smem>>
    %601 = vector.extract_strided_slice %584 {offsets = [0, 3], sizes = [8, 16], strides = [1, 1]} : vector<8x20xf32> to vector<8x16xf32>
    %602 = vector.broadcast %600 : f32 to vector<8x16xf32>
    %603 = arith.mulf %602, %601 : vector<8x16xf32>
    %604 = arith.addf %599, %603 : vector<8x16xf32>
    %c2_307 = arith.constant 2 : index
    %c24_308 = arith.constant 24 : index
    %605 = memref.load %arg4[%c2_307, %c24_308] : memref<4x25xf32, #tpu.memory_space<smem>>
    %606 = vector.extract_strided_slice %584 {offsets = [0, 4], sizes = [8, 16], strides = [1, 1]} : vector<8x20xf32> to vector<8x16xf32>
    %607 = vector.broadcast %605 : f32 to vector<8x16xf32>
    %608 = arith.mulf %607, %606 : vector<8x16xf32>
    %609 = arith.addf %604, %608 : vector<8x16xf32>
    %610 = arith.negf %609 : vector<8x16xf32>
    %611 = math.exp %610 : vector<8x16xf32>
    %cst_309 = arith.constant 1.000000e+00 : f32
    %612 = vector.broadcast %cst_309 : f32 to vector<8x16xf32>
    %613 = arith.addf %612, %611 : vector<8x16xf32>
    %614 = arith.divf %612, %613 : vector<8x16xf32>
    %615 = arith.mulf %609, %614 : vector<8x16xf32>
    %c0_310 = arith.constant 0 : index
    %c3_311 = arith.constant 3 : index
    %c0_312 = arith.constant 0 : index
    %c0_313 = arith.constant 0 : index
    %616 = vector.load %arg7[%c0_310, %c3_311, %c0_312, %c0_313] : memref<1x8x8x16xf32, #tpu.memory_space<vmem>>, vector<1x1x8x16xf32>
    %617 = vector.shape_cast %616 : vector<1x1x8x16xf32> to vector<8x16xf32>
    %618 = vector.shape_cast %615 : vector<8x16xf32> to vector<1x1x8x16xf32>
    tpu.vector_store %arg7[%c0_310, %c3_311, %c0_312, %c0_313], %618 {strides = array<i32>} : memref<1x8x8x16xf32, #tpu.memory_space<vmem>>, vector<1x1x8x16xf32>,
    %c3_314 = arith.constant 3 : index
    %c2_315 = arith.constant 2 : index
    %c2_316 = arith.constant 2 : index
    %619 = vector.load %arg8[%c3_314, %c2_315, %c2_316] : memref<4x12x20xf32, #tpu.memory_space<vmem>>, vector<1x8x16xf32>
    %620 = vector.shape_cast %619 : vector<1x8x16xf32> to vector<8x16xf32>
    %c0_317 = arith.constant 0 : index
    %c5_318 = arith.constant 5 : index
    %c0_319 = arith.constant 0 : index
    %c0_320 = arith.constant 0 : index
    %621 = vector.load %arg7[%c0_317, %c5_318, %c0_319, %c0_320] : memref<1x8x8x16xf32, #tpu.memory_space<vmem>>, vector<1x1x8x16xf32>
    %622 = vector.shape_cast %621 : vector<1x1x8x16xf32> to vector<8x16xf32>
    %623 = vector.shape_cast %620 : vector<8x16xf32> to vector<1x1x8x16xf32>
    tpu.vector_store %arg7[%c0_317, %c5_318, %c0_319, %c0_320], %623 {strides = array<i32>} : memref<1x8x8x16xf32, #tpu.memory_space<vmem>>, vector<1x1x8x16xf32>,
    %c3_321 = arith.constant 3 : index
    %624 = memref.load %arg5[%c3_321] : memref<4xf32, #tpu.memory_space<smem>>
    %625 = vector.broadcast %624 : f32 to vector<8x16xf32>
    %c3_322 = arith.constant 3 : index
    %c0_323 = arith.constant 0 : index
    %c0_324 = arith.constant 0 : index
    %626 = vector.load %arg8[%c3_322, %c0_323, %c0_324] : memref<4x12x20xf32, #tpu.memory_space<vmem>>, vector<1x8x20xf32>
    %627 = vector.shape_cast %626 : vector<1x8x20xf32> to vector<8x20xf32>
    %c3_325 = arith.constant 3 : index
    %c0_326 = arith.constant 0 : index
    %628 = memref.load %arg4[%c3_325, %c0_326] : memref<4x25xf32, #tpu.memory_space<smem>>
    %629 = vector.extract_strided_slice %627 {offsets = [0, 0], sizes = [8, 16], strides = [1, 1]} : vector<8x20xf32> to vector<8x16xf32>
    %630 = vector.broadcast %628 : f32 to vector<8x16xf32>
    %631 = arith.mulf %630, %629 : vector<8x16xf32>
    %632 = arith.addf %625, %631 : vector<8x16xf32>
    %c3_327 = arith.constant 3 : index
    %c1_328 = arith.constant 1 : index
    %633 = memref.load %arg4[%c3_327, %c1_328] : memref<4x25xf32, #tpu.memory_space<smem>>
    %634 = vector.extract_strided_slice %627 {offsets = [0, 1], sizes = [8, 16], strides = [1, 1]} : vector<8x20xf32> to vector<8x16xf32>
    %635 = vector.broadcast %633 : f32 to vector<8x16xf32>
    %636 = arith.mulf %635, %634 : vector<8x16xf32>
    %637 = arith.addf %632, %636 : vector<8x16xf32>
    %c3_329 = arith.constant 3 : index
    %c2_330 = arith.constant 2 : index
    %638 = memref.load %arg4[%c3_329, %c2_330] : memref<4x25xf32, #tpu.memory_space<smem>>
    %639 = vector.extract_strided_slice %627 {offsets = [0, 2], sizes = [8, 16], strides = [1, 1]} : vector<8x20xf32> to vector<8x16xf32>
    %640 = vector.broadcast %638 : f32 to vector<8x16xf32>
    %641 = arith.mulf %640, %639 : vector<8x16xf32>
    %642 = arith.addf %637, %641 : vector<8x16xf32>
    %c3_331 = arith.constant 3 : index
    %c3_332 = arith.constant 3 : index
    %643 = memref.load %arg4[%c3_331, %c3_332] : memref<4x25xf32, #tpu.memory_space<smem>>
    %644 = vector.extract_strided_slice %627 {offsets = [0, 3], sizes = [8, 16], strides = [1, 1]} : vector<8x20xf32> to vector<8x16xf32>
    %645 = vector.broadcast %643 : f32 to vector<8x16xf32>
    %646 = arith.mulf %645, %644 : vector<8x16xf32>
    %647 = arith.addf %642, %646 : vector<8x16xf32>
    %c3_333 = arith.constant 3 : index
    %c4_334 = arith.constant 4 : index
    %648 = memref.load %arg4[%c3_333, %c4_334] : memref<4x25xf32, #tpu.memory_space<smem>>
    %649 = vector.extract_strided_slice %627 {offsets = [0, 4], sizes = [8, 16], strides = [1, 1]} : vector<8x20xf32> to vector<8x16xf32>
    %650 = vector.broadcast %648 : f32 to vector<8x16xf32>
    %651 = arith.mulf %650, %649 : vector<8x16xf32>
    %652 = arith.addf %647, %651 : vector<8x16xf32>
    %c3_335 = arith.constant 3 : index
    %c1_336 = arith.constant 1 : index
    %c0_337 = arith.constant 0 : index
    %653 = vector.load %arg8[%c3_335, %c1_336, %c0_337] : memref<4x12x20xf32, #tpu.memory_space<vmem>>, vector<1x8x20xf32>
    %654 = vector.shape_cast %653 : vector<1x8x20xf32> to vector<8x20xf32>
    %c3_338 = arith.constant 3 : index
    %c5_339 = arith.constant 5 : index
    %655 = memref.load %arg4[%c3_338, %c5_339] : memref<4x25xf32, #tpu.memory_space<smem>>
    %656 = vector.extract_strided_slice %654 {offsets = [0, 0], sizes = [8, 16], strides = [1, 1]} : vector<8x20xf32> to vector<8x16xf32>
    %657 = vector.broadcast %655 : f32 to vector<8x16xf32>
    %658 = arith.mulf %657, %656 : vector<8x16xf32>
    %659 = arith.addf %652, %658 : vector<8x16xf32>
    %c3_340 = arith.constant 3 : index
    %c6_341 = arith.constant 6 : index
    %660 = memref.load %arg4[%c3_340, %c6_341] : memref<4x25xf32, #tpu.memory_space<smem>>
    %661 = vector.extract_strided_slice %654 {offsets = [0, 1], sizes = [8, 16], strides = [1, 1]} : vector<8x20xf32> to vector<8x16xf32>
    %662 = vector.broadcast %660 : f32 to vector<8x16xf32>
    %663 = arith.mulf %662, %661 : vector<8x16xf32>
    %664 = arith.addf %659, %663 : vector<8x16xf32>
    %c3_342 = arith.constant 3 : index
    %c7_343 = arith.constant 7 : index
    %665 = memref.load %arg4[%c3_342, %c7_343] : memref<4x25xf32, #tpu.memory_space<smem>>
    %666 = vector.extract_strided_slice %654 {offsets = [0, 2], sizes = [8, 16], strides = [1, 1]} : vector<8x20xf32> to vector<8x16xf32>
    %667 = vector.broadcast %665 : f32 to vector<8x16xf32>
    %668 = arith.mulf %667, %666 : vector<8x16xf32>
    %669 = arith.addf %664, %668 : vector<8x16xf32>
    %c3_344 = arith.constant 3 : index
    %c8_345 = arith.constant 8 : index
    %670 = memref.load %arg4[%c3_344, %c8_345] : memref<4x25xf32, #tpu.memory_space<smem>>
    %671 = vector.extract_strided_slice %654 {offsets = [0, 3], sizes = [8, 16], strides = [1, 1]} : vector<8x20xf32> to vector<8x16xf32>
    %672 = vector.broadcast %670 : f32 to vector<8x16xf32>
    %673 = arith.mulf %672, %671 : vector<8x16xf32>
    %674 = arith.addf %669, %673 : vector<8x16xf32>
    %c3_346 = arith.constant 3 : index
    %c9_347 = arith.constant 9 : index
    %675 = memref.load %arg4[%c3_346, %c9_347] : memref<4x25xf32, #tpu.memory_space<smem>>
    %676 = vector.extract_strided_slice %654 {offsets = [0, 4], sizes = [8, 16], strides = [1, 1]} : vector<8x20xf32> to vector<8x16xf32>
    %677 = vector.broadcast %675 : f32 to vector<8x16xf32>
    %678 = arith.mulf %677, %676 : vector<8x16xf32>
    %679 = arith.addf %674, %678 : vector<8x16xf32>
    %c3_348 = arith.constant 3 : index
    %c2_349 = arith.constant 2 : index
    %c0_350 = arith.constant 0 : index
    %680 = vector.load %arg8[%c3_348, %c2_349, %c0_350] : memref<4x12x20xf32, #tpu.memory_space<vmem>>, vector<1x8x20xf32>
    %681 = vector.shape_cast %680 : vector<1x8x20xf32> to vector<8x20xf32>
    %c3_351 = arith.constant 3 : index
    %c10_352 = arith.constant 10 : index
    %682 = memref.load %arg4[%c3_351, %c10_352] : memref<4x25xf32, #tpu.memory_space<smem>>
    %683 = vector.extract_strided_slice %681 {offsets = [0, 0], sizes = [8, 16], strides = [1, 1]} : vector<8x20xf32> to vector<8x16xf32>
    %684 = vector.broadcast %682 : f32 to vector<8x16xf32>
    %685 = arith.mulf %684, %683 : vector<8x16xf32>
    %686 = arith.addf %679, %685 : vector<8x16xf32>
    %c3_353 = arith.constant 3 : index
    %c11_354 = arith.constant 11 : index
    %687 = memref.load %arg4[%c3_353, %c11_354] : memref<4x25xf32, #tpu.memory_space<smem>>
    %688 = vector.extract_strided_slice %681 {offsets = [0, 1], sizes = [8, 16], strides = [1, 1]} : vector<8x20xf32> to vector<8x16xf32>
    %689 = vector.broadcast %687 : f32 to vector<8x16xf32>
    %690 = arith.mulf %689, %688 : vector<8x16xf32>
    %691 = arith.addf %686, %690 : vector<8x16xf32>
    %c3_355 = arith.constant 3 : index
    %c12_356 = arith.constant 12 : index
    %692 = memref.load %arg4[%c3_355, %c12_356] : memref<4x25xf32, #tpu.memory_space<smem>>
    %693 = vector.extract_strided_slice %681 {offsets = [0, 2], sizes = [8, 16], strides = [1, 1]} : vector<8x20xf32> to vector<8x16xf32>
    %694 = vector.broadcast %692 : f32 to vector<8x16xf32>
    %695 = arith.mulf %694, %693 : vector<8x16xf32>
    %696 = arith.addf %691, %695 : vector<8x16xf32>
    %c3_357 = arith.constant 3 : index
    %c13_358 = arith.constant 13 : index
    %697 = memref.load %arg4[%c3_357, %c13_358] : memref<4x25xf32, #tpu.memory_space<smem>>
    %698 = vector.extract_strided_slice %681 {offsets = [0, 3], sizes = [8, 16], strides = [1, 1]} : vector<8x20xf32> to vector<8x16xf32>
    %699 = vector.broadcast %697 : f32 to vector<8x16xf32>
    %700 = arith.mulf %699, %698 : vector<8x16xf32>
    %701 = arith.addf %696, %700 : vector<8x16xf32>
    %c3_359 = arith.constant 3 : index
    %c14_360 = arith.constant 14 : index
    %702 = memref.load %arg4[%c3_359, %c14_360] : memref<4x25xf32, #tpu.memory_space<smem>>
    %703 = vector.extract_strided_slice %681 {offsets = [0, 4], sizes = [8, 16], strides = [1, 1]} : vector<8x20xf32> to vector<8x16xf32>
    %704 = vector.broadcast %702 : f32 to vector<8x16xf32>
    %705 = arith.mulf %704, %703 : vector<8x16xf32>
    %706 = arith.addf %701, %705 : vector<8x16xf32>
    %c3_361 = arith.constant 3 : index
    %c3_362 = arith.constant 3 : index
    %c0_363 = arith.constant 0 : index
    %707 = vector.load %arg8[%c3_361, %c3_362, %c0_363] : memref<4x12x20xf32, #tpu.memory_space<vmem>>, vector<1x8x20xf32>
    %708 = vector.shape_cast %707 : vector<1x8x20xf32> to vector<8x20xf32>
    %c3_364 = arith.constant 3 : index
    %c15_365 = arith.constant 15 : index
    %709 = memref.load %arg4[%c3_364, %c15_365] : memref<4x25xf32, #tpu.memory_space<smem>>
    %710 = vector.extract_strided_slice %708 {offsets = [0, 0], sizes = [8, 16], strides = [1, 1]} : vector<8x20xf32> to vector<8x16xf32>
    %711 = vector.broadcast %709 : f32 to vector<8x16xf32>
    %712 = arith.mulf %711, %710 : vector<8x16xf32>
    %713 = arith.addf %706, %712 : vector<8x16xf32>
    %c3_366 = arith.constant 3 : index
    %c16_367 = arith.constant 16 : index
    %714 = memref.load %arg4[%c3_366, %c16_367] : memref<4x25xf32, #tpu.memory_space<smem>>
    %715 = vector.extract_strided_slice %708 {offsets = [0, 1], sizes = [8, 16], strides = [1, 1]} : vector<8x20xf32> to vector<8x16xf32>
    %716 = vector.broadcast %714 : f32 to vector<8x16xf32>
    %717 = arith.mulf %716, %715 : vector<8x16xf32>
    %718 = arith.addf %713, %717 : vector<8x16xf32>
    %c3_368 = arith.constant 3 : index
    %c17_369 = arith.constant 17 : index
    %719 = memref.load %arg4[%c3_368, %c17_369] : memref<4x25xf32, #tpu.memory_space<smem>>
    %720 = vector.extract_strided_slice %708 {offsets = [0, 2], sizes = [8, 16], strides = [1, 1]} : vector<8x20xf32> to vector<8x16xf32>
    %721 = vector.broadcast %719 : f32 to vector<8x16xf32>
    %722 = arith.mulf %721, %720 : vector<8x16xf32>
    %723 = arith.addf %718, %722 : vector<8x16xf32>
    %c3_370 = arith.constant 3 : index
    %c18_371 = arith.constant 18 : index
    %724 = memref.load %arg4[%c3_370, %c18_371] : memref<4x25xf32, #tpu.memory_space<smem>>
    %725 = vector.extract_strided_slice %708 {offsets = [0, 3], sizes = [8, 16], strides = [1, 1]} : vector<8x20xf32> to vector<8x16xf32>
    %726 = vector.broadcast %724 : f32 to vector<8x16xf32>
    %727 = arith.mulf %726, %725 : vector<8x16xf32>
    %728 = arith.addf %723, %727 : vector<8x16xf32>
    %c3_372 = arith.constant 3 : index
    %c19_373 = arith.constant 19 : index
    %729 = memref.load %arg4[%c3_372, %c19_373] : memref<4x25xf32, #tpu.memory_space<smem>>
    %730 = vector.extract_strided_slice %708 {offsets = [0, 4], sizes = [8, 16], strides = [1, 1]} : vector<8x20xf32> to vector<8x16xf32>
    %731 = vector.broadcast %729 : f32 to vector<8x16xf32>
    %732 = arith.mulf %731, %730 : vector<8x16xf32>
    %733 = arith.addf %728, %732 : vector<8x16xf32>
    %c3_374 = arith.constant 3 : index
    %c4_375 = arith.constant 4 : index
    %c0_376 = arith.constant 0 : index
    %734 = vector.load %arg8[%c3_374, %c4_375, %c0_376] : memref<4x12x20xf32, #tpu.memory_space<vmem>>, vector<1x8x20xf32>
    %735 = vector.shape_cast %734 : vector<1x8x20xf32> to vector<8x20xf32>
    %c3_377 = arith.constant 3 : index
    %c20_378 = arith.constant 20 : index
    %736 = memref.load %arg4[%c3_377, %c20_378] : memref<4x25xf32, #tpu.memory_space<smem>>
    %737 = vector.extract_strided_slice %735 {offsets = [0, 0], sizes = [8, 16], strides = [1, 1]} : vector<8x20xf32> to vector<8x16xf32>
    %738 = vector.broadcast %736 : f32 to vector<8x16xf32>
    %739 = arith.mulf %738, %737 : vector<8x16xf32>
    %740 = arith.addf %733, %739 : vector<8x16xf32>
    %c3_379 = arith.constant 3 : index
    %c21_380 = arith.constant 21 : index
    %741 = memref.load %arg4[%c3_379, %c21_380] : memref<4x25xf32, #tpu.memory_space<smem>>
    %742 = vector.extract_strided_slice %735 {offsets = [0, 1], sizes = [8, 16], strides = [1, 1]} : vector<8x20xf32> to vector<8x16xf32>
    %743 = vector.broadcast %741 : f32 to vector<8x16xf32>
    %744 = arith.mulf %743, %742 : vector<8x16xf32>
    %745 = arith.addf %740, %744 : vector<8x16xf32>
    %c3_381 = arith.constant 3 : index
    %c22_382 = arith.constant 22 : index
    %746 = memref.load %arg4[%c3_381, %c22_382] : memref<4x25xf32, #tpu.memory_space<smem>>
    %747 = vector.extract_strided_slice %735 {offsets = [0, 2], sizes = [8, 16], strides = [1, 1]} : vector<8x20xf32> to vector<8x16xf32>
    %748 = vector.broadcast %746 : f32 to vector<8x16xf32>
    %749 = arith.mulf %748, %747 : vector<8x16xf32>
    %750 = arith.addf %745, %749 : vector<8x16xf32>
    %c3_383 = arith.constant 3 : index
    %c23_384 = arith.constant 23 : index
    %751 = memref.load %arg4[%c3_383, %c23_384] : memref<4x25xf32, #tpu.memory_space<smem>>
    %752 = vector.extract_strided_slice %735 {offsets = [0, 3], sizes = [8, 16], strides = [1, 1]} : vector<8x20xf32> to vector<8x16xf32>
    %753 = vector.broadcast %751 : f32 to vector<8x16xf32>
    %754 = arith.mulf %753, %752 : vector<8x16xf32>
    %755 = arith.addf %750, %754 : vector<8x16xf32>
    %c3_385 = arith.constant 3 : index
    %c24_386 = arith.constant 24 : index
    %756 = memref.load %arg4[%c3_385, %c24_386] : memref<4x25xf32, #tpu.memory_space<smem>>
    %757 = vector.extract_strided_slice %735 {offsets = [0, 4], sizes = [8, 16], strides = [1, 1]} : vector<8x20xf32> to vector<8x16xf32>
    %758 = vector.broadcast %756 : f32 to vector<8x16xf32>
    %759 = arith.mulf %758, %757 : vector<8x16xf32>
    %760 = arith.addf %755, %759 : vector<8x16xf32>
    %761 = arith.negf %760 : vector<8x16xf32>
    %762 = math.exp %761 : vector<8x16xf32>
    %cst_387 = arith.constant 1.000000e+00 : f32
    %763 = vector.broadcast %cst_387 : f32 to vector<8x16xf32>
    %764 = arith.addf %763, %762 : vector<8x16xf32>
    %765 = arith.divf %763, %764 : vector<8x16xf32>
    %766 = arith.mulf %760, %765 : vector<8x16xf32>
    %c0_388 = arith.constant 0 : index
    %c7_389 = arith.constant 7 : index
    %c0_390 = arith.constant 0 : index
    %c0_391 = arith.constant 0 : index
    %767 = vector.load %arg7[%c0_388, %c7_389, %c0_390, %c0_391] : memref<1x8x8x16xf32, #tpu.memory_space<vmem>>, vector<1x1x8x16xf32>
    %768 = vector.shape_cast %767 : vector<1x1x8x16xf32> to vector<8x16xf32>
    %769 = vector.shape_cast %766 : vector<8x16xf32> to vector<1x1x8x16xf32>
    tpu.vector_store %arg7[%c0_388, %c7_389, %c0_390, %c0_391], %769 {strides = array<i32>} : memref<1x8x8x16xf32, #tpu.memory_space<vmem>>, vector<1x1x8x16xf32>,
    return
  }
  func.func @transform_0(%arg0: i32, %arg1: i32) -> (i32, i32) {
    %c0_i32 = arith.constant 0 : i32
    %c0_i32_0 = arith.constant 0 : i32
    %c0_i32_1 = arith.constant 0 : i32
    return %c0_i32, %c0_i32_0 : i32, i32
  }
  func.func @transform_1(%arg0: i32, %arg1: i32) -> i32 {
    %c0_i32 = arith.constant 0 : i32
    %c0_i32_0 = arith.constant 0 : i32
    return %c0_i32 : i32
  }
  func.func @transform_2(%arg0: i32, %arg1: i32) -> (i32, i32) {
    %c0_i32 = arith.constant 0 : i32
    %c0_i32_0 = arith.constant 0 : i32
    %c0_i32_1 = arith.constant 0 : i32
    return %c0_i32, %c0_i32_0 : i32, i32
  }
  func.func @transform_3(%arg0: i32, %arg1: i32) -> i32 {
    %c0_i32 = arith.constant 0 : i32
    %c0_i32_0 = arith.constant 0 : i32
    return %c0_i32 : i32
  }
  func.func @transform_4(%arg0: i32, %arg1: i32) -> (i32, i32, i32, i32) {
    %c0_i32 = arith.constant 0 : i32
    %c0_i32_0 = arith.constant 0 : i32
    %c0_i32_1 = arith.constant 0 : i32
    %c0_i32_2 = arith.constant 0 : i32
    return %arg0, %c0_i32, %c0_i32_0, %c0_i32_1 : i32, i32, i32, i32
  }
  func.func @transform_5(%arg0: i32, %arg1: i32) -> (i32, i32, i32, i32) {
    %c0_i32 = arith.constant 0 : i32
    %c0_i32_0 = arith.constant 0 : i32
    %c0_i32_1 = arith.constant 0 : i32
    return %arg0, %c0_i32, %arg1, %c0_i32_0 : i32, i32, i32, i32
  }
}

</mosaic_0001>

<bundles_post_ra>
// kernel: tpu_custom_call.1
= control target key start
LH: loop header
LB: loop body
LE: loop exit
PB: predicated region body
PF: predicated region fallthrough
CT: control target
= control target key end

     0   :  { %s3184_s0 = inlined_call_operand.hbm [shape: f32[4,4], index: 0, kind: input, shape index: {}]   ;;  %s3185_s1 = inlined_call_operand.vmem [shape: f32[4], index: 1, kind: input, shape index: {}]   ;;  %s3186_s2 = inlined_call_operand.hbm [shape: f32[4,25], index: 2, kind: input, shape index: {}]   ;;  %s3187_s3 = inlined_call_operand.vmem [shape: f32[4], index: 3, kind: input, shape index: {}]   ;;  %s3188_s4 = inlined_call_operand.hbm [shape: f32[2,4,16,16], index: 4, kind: input, shape index: {}]   ;;  %s3189_s5 = inlined_call_operand.hbm [shape: f32[2,8,16,16], index: 5, kind: output, shape index: {}]  }
   0x1   :  { %3195 = sst [smem:[#allocation25_spill]] %s3184_s0 }
   0x2   :  { %3196 = sst [smem:[#allocation26_spill]] %s3185_s1 }
   0x3   :  { %3197 = sst [smem:[#allocation27_spill]] %s3186_s2 }
   0x4   :  { %3198 = sst [smem:[#allocation28_spill]] %s3187_s3 }
   0x5   :  { %3199 = sst [smem:[#allocation29_spill]] %s3189_s5 }
   0x6   :  { %10 = vsyncpa [#allocation6], 0 }
   0x7   :  { %11 = vsyncpa [#allocation7], 0 }
   0x8   :  { %12 = vsyncpa [#allocation10], 0 }
   0x9   :  { %13 = vsyncpa [#allocation12], 0 }
   0xa   :  { %14 = vsyncpa [#allocation4], 0 }
   0xb   :  { %16 = vsyncpa [#allocation4 + $0x1], 0 }
   0xc   :  { %17 = vsyncpa [#allocation5], 0 }
   0xd   :  { %19 = vsyncpa [#allocation5 + $0x1], 0  ;;  %s2490_s18 = smov 0   ;;  %s2492_s19 = smov 0  }
   0xe   :  { %s2494_s20 = smov 0   ;;  %s2496_s21 = smov 0  }
   0xf   :  { %s2498_s22 = smov 0   ;;  %s2500_s23 = smov 0  }
  0x10   :  { %s2502_s24 = smov 0   ;;  %s2504_s25 = smov 0  }
  0x11   :  { %s2506_s26 = smov 0   ;;  %s2508_s27 = smov 0  }
  0x12   :  { %s2510_s28 = smov 0  }
  0x13 LB: > { %3200 = sst [smem:[#allocation21_spill]] %s2399_s18  ;;  %s1749_s29 = sadd.s32 4294967295, %s2439_s28   ;;  %s2439_s28 = sphi %s2510_s28, %s25_s28   ;;  %s2435_s27 = sphi %s2508_s27, %s3229_s27   ;;  %s2431_s26 = sphi %s2506_s26, %s3221_s26   ;;  %s2427_s25 = sphi %s2504_s25, %s3228_s25   ;;  %s2423_s24 = sphi %s2502_s24, %s3220_s24   ;;  %s2419_s23 = sphi %s2500_s23, %s3227_s23   ;;  %s2415_s22 = sphi %s2498_s22, %s3226_s22   ;;  %s2411_s21 = sphi %s2496_s21, %s3225_s21   ;;  %s2407_s20 = sphi %s2494_s20, %s3224_s20   ;;  %s2403_s19 = sphi %s2492_s19, %s3223_s19   ;;  %s2399_s18 = sphi %s2490_s18, %s3222_s18  }
  0x14   : > { %3201 = sst [smem:[#allocation22_spill]] %s2431_s26  ;;  %s1750_s30 = sadd.s32 4294967294, %s2439_s28  }
  0x15   : > { %p141_p0 = scmp.ne.s32.totalorder %s2415_s22, %s2411_s21  ;;  %p2546_p1 = scmp.eq.s32.totalorder %s1749_s29, 0 }
  0x16   : > { %p166_p2 = scmp.ne.s32.totalorder %s2407_s20, %s2403_s19  ;;  %p167_p3 = scmp.eq.s32.totalorder %s1749_s29, 3 }
  0x17   : > { %p2554_p4 = por %p2546_p1, %p141_p0  ;;  %p172_p5 = scmp.ne.s32.totalorder %s2403_s19, %s2399_s18 }
  0x18   : > { %p2560_p6 = por %p167_p3, %p166_p2  ;;  %p173_p7 = scmp.eq.s32.totalorder %s1750_s30, 3 }
  0x19   : > { %p1751_p8 = scmp.ge.s32.totalorder %s2439_s28, 1  ;;  %p180_p9 = scmp.lt.s32.totalorder %s2439_s28, 5 }
  0x1a   : > { %p2566_p10 = por %p173_p7, %p172_p5  ;;  %s3208_s1 = sld [smem:[#allocation26_spill]] }
  0x1b   : > { %p2570_p11 = pnand %p1751_p8, %p180_p9  ;;  %s3210_s3 = sld [smem:[#allocation28_spill]] }
  0x1c   : > { %s3205_s9 = scalar_select %p2566_p10, 1, 0 }
  0x1d   : > { %p2023_p12 = pneg %p2570_p11  ;;  %s2441_s21 = smov [#allocation3]  }
  0x1e   : > { %3206 = sst [smem:[#allocation23_spill]] %s3205_s9 }
  0x1f   : > { %p2581_p13 = pnand %p2023_p12, %p2546_p1  ;;  %s3211_s0 = sld [smem:[#allocation25_spill]] }
  0x20   : > { %s202_s13 = sshll.u32 %s3208_s1, 4  ;;  %s203_s13 = int_to_ptr.vmem [resolvable:$true] %s202_s13 }
  0x21   : > { %s222_s17 = sshll.u32 %s3210_s3, 4  ;;  %s2234_s11 = scalar_lea.vmem %s203_s13, 16  ;;  %s223_s17 = int_to_ptr.vmem [resolvable:$true] %s222_s17 }
  0x22   : > { %p2235_p0 = scmp.ne.s32.totalorder %s203_s13, %s2234_s11  ;;  %p2236_p2 = pneg %p2581_p13 }
  0x23   : > { %p2242_p7 = scmp.lt.s32.totalorder %s203_s13, %s203_s13  ;;  %p2243_p8 = scmp.lt.s32.totalorder %s2234_s11, %s2234_s11 }
  0x24   : > { %p2237_p3 = pnand %p2236_p2, %p2235_p0 }
  0x25   : > { %2026 = dma.hbm_to_smem (!%p2581_p13), %s3211_s0, 64, %s2441_s21, [#allocation6]  }
  0x26   : > { %p2238_p5 = pneg %p2237_p3  ;;  %p2244_p9 = por %p2243_p8, %p2242_p7 }
  0x28   : > { %p2245_p12 = pnand %p2244_p9, %p2238_p5 }
  0x2a   : > { %2248 = shalt.err (!%p2245_p12)
}
  0x2b   : > { %s2442_s12 = smov [#allocation8]   ;;  %s2443_s15 = smov [#allocation9]  }
  0x2c   : > { %2029 = dma.vmem_to_smem (!%p2581_p13), %s203_s13, 16, %s2442_s12, [#allocation7]  }
  0x2d   : > { %s3212_s2 = sld [smem:[#allocation27_spill]]  ;;  %s2260_s29 = scalar_lea.vmem %s223_s17, 16 }
  0x2e   : > { %p2261_p0 = scmp.ne.s32.totalorder %s223_s17, %s2260_s29  ;;  %p2268_p5 = scmp.lt.s32.totalorder %s223_s17, %s223_s17 }
  0x2f   : > { %p2269_p8 = scmp.lt.s32.totalorder %s2260_s29, %s2260_s29 }
  0x30   : > { %p2263_p3 = pnand %p2261_p0, %p2236_p2 }
  0x31   : > { %p2270_p9 = por %p2269_p8, %p2268_p5 }
  0x32   : > { %p2264_p7 = pneg %p2263_p3 }
  0x33   : > { %2032 = dma.hbm_to_smem (!%p2581_p13), %s3212_s2, 64, %s2443_s15, [#allocation10]  }
  0x34   : > { %p2271_p12 = pnand %p2270_p9, %p2264_p7 }
  0x36   : > { %2274 = shalt.err (!%p2271_p12)
}
  0x37   : > { %s2444_s30 = smov [#allocation11]   ;;  %s34_s13 = sadd.s32 1, %s2431_s26 }
  0x38   : > { %2035 = dma.vmem_to_smem (!%p2581_p13), %s223_s17, 16, %s2444_s30, [#allocation12]  }
  0x39   : > { %p35_p2 = scmp.ge.s32.totalorder %s34_s13, 2  ;;  %s37_s11 = sadd.s32 1, %s2435_s27 }
  0x3a   : > { %s128_s12 = sadd.s32 1, %s2419_s23  ;;  %p135_p0 = scmp.ne.s32.totalorder %s2419_s23, %s2415_s22 }
  0x3b   : > { %s3231_s13 = smov (%p35_p2, %s34_s13), 0  ;;  %s3233_s11 = smov (!%p35_p2, %s37_s11), %s2435_s27 }
  0x3c   : > { %3213 = sst [smem:[#allocation24_spill]] %s3231_s13  ;;  %p136_p3 = scmp.eq.s32.totalorder %s2439_s28, 0 }
  0x3d   : > { %s152_s14 = ssub.s32 %s2431_s26, %s3231_s13  ;;  %p39_p7 = scmp.ge.s32.totalorder %s3233_s11, 2 }
  0x3e   : > { %s156_s15 = sadd.s32 1, %s2407_s20  ;;  %p2622_p5 = por %p136_p3, %p135_p0 }
  0x3f   : > { %p2048_p13 = scmp.lt.s32.totalorder %s2439_s28, 4  ;;  %s3235_s11 = smov (%p39_p7, %s3233_s11), 0 }
  0x40   : > { %s233_s16 = sand.u32 1, %s2419_s23   ;;  %s2002_s21 = sshll.u32 %s2435_s27, 10 }
  0x41   : > { %s125_s29 = ssub.s32 %s2435_s27, %s3235_s11  ;;  %s1757_s0 = sshll.u32 %s233_s16, 6 }
  0x42   : > { %p126_p8 = scmp.eq.s32.totalorder %s125_s29, 0  ;;  %s153_s30 = sor.u32 %s152_s14, %s125_s29 }
  0x43   : > { %p154_p9 = scmp.eq.s32.totalorder %s153_s30, 0  ;;  %s243_s26 = scalar_lea.hbm %s3188_s4, %s2002_s21 }
  0x44   : > { %s2634_s1 = scalar_select %p126_p8, %s2419_s23, %s128_s12  }
  0x45   : > { %s2637_s2 = scalar_select %p154_p9, %s2407_s20, %s156_s15  }
  0x46   : > { %s237_s9 = scalar_lea.vmem [#allocation13], %s1757_s0  ;;  %p2646_p12 = pnand %p2048_p13, %p2622_p5 }
  0x47   : > { %s244_s18 = sshll.u32 %s237_s9, 4  ;;  %s234_s14 = scalar_lea.sflag [#allocation4], %s233_s16  ;;  %s245_s18 = int_to_ptr.vmem [resolvable:$true] %s244_s18 }
  0x48   : > { %p2277_p2 = pneg %p2646_p12  ;;  %s2288_s12 = scalar_lea.vmem %s245_s18, 1024 }
  0x49   : > { %p2289_p0 = scmp.ne.s32.totalorder %s245_s18, %s2288_s12  ;;  %s2445_s15 = smov [#allocation13]  }
  0x4a   : > { %s2293_s3 = sshll.u32 %s2445_s15, 4  ;;  %s2294_s3 = int_to_ptr.vmem [resolvable:$false] %s2293_s3 }
  0x4b   : > { %p2291_p3 = pnand %p2289_p0, %p2277_p2  ;;  %s2295_s0 = scalar_lea.vmem %s2294_s3, 2048 }
  0x4c   : > { %p2296_p8 = scmp.lt.s32.totalorder %s245_s18, %s2294_s3  ;;  %p2297_p9 = scmp.lt.s32.totalorder %s2295_s0, %s2288_s12 }
  0x4d   : > { %p2292_p7 = pneg %p2291_p3 }
  0x4e   : > { %p2298_p10 = por %p2297_p9, %p2296_p8 }
  0x50   : > { %p2299_p5 = pnand %p2298_p10, %p2292_p7 }
  0x52   : > { %2302 = shalt.err (!%p2299_p5)
}
  0x53   : > { %s2446_s9 = smov 128   ;;  %s2447_s13 = smov 8  }
  0x54   : > { %2039 = dma.hbm_to_vmem [thread:$0]  (!%p2646_p12), %s243_s26, 1024, %s245_s18, %s234_s14, %s2446_s9, %s2446_s9, %s2447_s13  }
  0x55   : > { %256 = sbr.rel (%p2570_p11) target bundleno = 971 (0x3cb), region = 40 }
  0x5a   : > { %2374 = dma.done.wait (%p2546_p1), [#allocation6], 64  }
  0x5b   : > { %2376 = vsyncadd (%p2546_p1), [#allocation6], 4294967232 }
  0x5c   : > { %2378 = dma.done.wait (%p2546_p1), [#allocation7], 16  }
  0x5d   : > { %2380 = vsyncadd (%p2546_p1), [#allocation7], 4294967280 }
  0x5e   : > { %2382 = dma.done.wait (%p2546_p1), [#allocation10], 64  }
  0x5f   : > { %2384 = vsyncadd (%p2546_p1), [#allocation10], 4294967232 }
  0x60   : > { %2386 = dma.done.wait (%p2546_p1), [#allocation12], 16  }
  0x61   : > { %2388 = vsyncadd (%p2546_p1), [#allocation12], 4294967280  ;;  %s274_s5 = sand.u32 1, %s2415_s22  }
  0x62   : > { %s2673_s18 = sshll.u32 %s274_s5, 6  ;;  %s275_s26 = scalar_lea.sflag [#allocation4], %s274_s5 }
  0x63   : > { %s278_s10 = scalar_lea.vmem [#allocation13], %s2673_s18 }
  0x64   : > { %2390 = dma.done.wait (%p2554_p4), %s275_s26, 1024  }
  0x65   : > { %2392 = vsyncadd (%p2554_p4), %s275_s26, 4294966272 }
  0x66   : > { %283 = sfence }
  0x67   : > { %s1767_s17 = sshll.u32 %s2423_s24, 3  ;;  %vm307_vm0 = vcmask 162816   ;;  %vm309_vm1 = vcmask 158720   ;;  %s1787_s6 = sld [smem:[#allocation8 + $0x2]]  ;;  %v2448_v0 = vmov 0.0   ;;  %vm357_vm2 = vcmask 146448  }
  0x68   : > { %313 = vst.msk [vmem:[#allocation2 + $0x20] sm:$0xff] %vm307_vm0, %v2448_v0  ;;  %308 = vst.msk [vmem:[#allocation2] sm:$0xff] %vm307_vm0, %v2448_v0  ;;  %s1788_s16 = sld [smem:[#allocation3 + $0x100]]  ;;  %s2685_s7 = scalar_lea.vmem %s278_s10, %s1767_s17 [#allocation13] }
  0x69   : > { %314 = vst.msk [vmem:[#allocation2 + $0x28] sm:$0xf] %vm309_vm1, %v2448_v0  ;;  %310 = vst.msk [vmem:[#allocation2 + $0x8] sm:$0xf] %vm309_vm1, %v2448_v0  ;;  %s1789_s21 = sld [smem:[#allocation3 + $0x101]]  ;;  %v397_v1 = vld [vmem:[%s2685_s7] sm:$0xff] }
  0x6a   : > { %311 = vst.msk [vmem:[#allocation2 + $0x10] sm:$0xff] %vm307_vm0, %v2448_v0  ;;  %315 = vst.msk [vmem:[#allocation2 + $0x30] sm:$0xff] %vm307_vm0, %v2448_v0  ;;  %s1791_s29 = sld [smem:[#allocation3 + $0x102]]  ;;  %v1790_v2 = vld [vmem:[%s2685_s7 + $0x10] sm:$0xff]  ;;  %v1792_v5 = vld [vmem:[%s2685_s7 + $0x20] sm:$0xff]  ;;  %p1805_p1 = scmp.le.s32.totalorder %s2423_s24, 0 }
  0x6b   : > { %312 = vst.msk [vmem:[#allocation2 + $0x18] sm:$0xf] %vm309_vm1, %v2448_v0  ;;  %316 = vst.msk [vmem:[#allocation2 + $0x38] sm:$0xf] %vm309_vm1, %v2448_v0  ;;  %s1793_s30 = sld [smem:[#allocation3 + $0x103]]  ;;  %v1794_v10 = vld [vmem:[%s2685_s7 + $0x30] sm:$0xff] }
  0x6c   : > { %s2688_s14 = sld [smem:[#allocation8]] }
  0x6d   : > { %s319_s12 = sld [smem:[#allocation3]]  ;;  %v395_v3 = vstv %s1787_s6 }
  0x6e   : > { %v398_v4 = vstv %s1788_s16  ;;  %s1768_s15 = sld [smem:[#allocation3 + $0x1]] }
  0x6f   : > { %v399_v6 = vmul.f32 %v398_v4, %v397_v1  ;;  %v403_v7 = vstv %s1789_s21  ;;  %s1771_s3 = sld [smem:[#allocation3 + $0x2]] }
  0x70   : > { %v404_v8 = vmul.f32 %v1790_v2, %v403_v7  ;;  %v408_v9 = vstv %s1791_s29  ;;  %s1774_s0 = sld [smem:[#allocation3 + $0x3]] }
  0x71   : > { %v400_v11 = vadd.f32 %v399_v6, %v395_v3  ;;  %v409_v12 = vmul.f32 %v1792_v5, %v408_v9  ;;  %v413_v13 = vstv %s1793_s30  ;;  %s2693_s9 = sld [smem:[#allocation8 + $0x3]] }
  0x72   : > { %s1797_s13 = sld [smem:[#allocation3 + $0x180]]  ;;  %v414_v15 = vmul.f32 %v1794_v10, %v413_v13  ;;  %v318_v16 = vstv %s2688_s14 }
  0x73   : > { %v405_v14 = vadd.f32 %v404_v8, %v400_v11  ;;  %v322_v17 = vstv %s319_s12  ;;  %s1798_s5 = sld [smem:[#allocation3 + $0x181]]  ;;  %s2449_s12 = smov 2  }
  0x74   : > { %v323_v18 = vmul.f32 %v397_v1, %v322_v17  ;;  %v329_v19 = vstv %s1768_s15  ;;  %s1800_s26 = sld [smem:[#allocation3 + $0x182]]  ;;  %s303_s15 = sand.u32 1, %s2403_s19  }
  0x75   : > { %v410_v20 = vadd.f32 %v409_v12, %v405_v14  ;;  %v330_v21 = vmul.f32 %v1790_v2, %v329_v19  ;;  %v336_v22 = vstv %s1771_s3  ;;  %s1802_s6 = sld [smem:[#allocation3 + $0x183]]  ;;  %s1766_s3 = sshll.u32 %s303_s15, 6 }
  0x76   : > { %v324_v23 = vadd.f32 %v323_v18, %v318_v16  ;;  %v337_v24 = vmul.f32 %v1792_v5, %v336_v22  ;;  %v343_v25 = vstv %s1774_s0  ;;  %s2696_s16 = sld [smem:[#allocation8 + $0x1]]  ;;  %s2703_s0 = scalar_lea.vmem [#allocation14], %s1766_s3 }
  0x77   : > { %v415_v26 = vadd.f32 %v414_v15, %v410_v20  ;;  %s1779_s21 = sld [smem:[#allocation3 + $0x80]]  ;;  %v344_v28 = vmul.f32 %v1794_v10, %v343_v25  ;;  %v430_v29 = vstv %s2693_s9  ;;  %s1806_s9 = sadd.s32 (!%p1805_p1), 4294967294, %s1767_s17 }
  0x78   : > { %v331_v27 = vadd.f32 %v330_v21, %v324_v23  ;;  %v433_v30 = vstv %s1797_s13  ;;  %s1780_s29 = sld [smem:[#allocation3 + $0x81]] }
  0x79   : > { %v1795_v31 = vmul.f32 -1.442695, %v415_v26  ;;  %v434_v32 = vmul.f32 %v433_v30, %v397_v1  ;;  %v438_v33 = vstv %s1798_s5  ;;  %s1782_s30 = sld [smem:[#allocation3 + $0x82]] }
  0x7a   : > { %v338_v34 = vadd.f32 %v337_v24, %v331_v27  ;;  %v439_v35 = vmul.f32 %v1790_v2, %v438_v33  ;;  %v443_v36 = vstv %s1800_s26  ;;  %s1784_s14 = sld [smem:[#allocation3 + $0x83]]  ;;  %s2710_s26 = scalar_lea.vmem (!%p1805_p1), %s278_s10, %s1806_s9 [#allocation13] }
  0x7b   : > { %2159 = vpow2.f32 %v1795_v31  ;;  %v435_v37 = vadd.f32 %v434_v32, %v430_v29  ;;  %v444_v38 = vmul.f32 %v1792_v5, %v443_v36  ;;  %v448_v39 = vstv %s1802_s6  ;;  %s1823_s13 = sld [smem:[#allocation8 + $0x2]] (!%p1805_p1) }
  0x7c   : > { %v345_v40 = vadd.f32 %v344_v28, %v338_v34  ;;  %v449_v42 = vmul.f32 %v1794_v10, %v448_v39  ;;  %v360_v43 = vstv %s2696_s16  ;;  %s1824_s5 = sld [smem:[#allocation3 + $0x100]] (!%p1805_p1) }
  0x7d   : > { %v440_v41 = vadd.f32 %v439_v35, %v435_v37  ;;  %v363_v44 = vstv %s1779_s21  ;;  %s1825_s6 = sld [smem:[#allocation3 + $0x101]] (!%p1805_p1) }
  0x7e   : > { %v1777_v45 = vmul.f32 -1.442695, %v345_v40  ;;  %v364_v46 = vmul.f32 %v397_v1, %v363_v44  ;;  %v368_v47 = vstv %s1780_s29  ;;  %s1827_s16 = sld [smem:[#allocation3 + $0x102]] (!%p1805_p1) }
  0x7f   : > { %v445_v48 = vadd.f32 %v444_v38, %v440_v41  ;;  %v369_v49 = vmul.f32 %v1790_v2, %v368_v47  ;;  %v373_v50 = vstv %s1782_s30  ;;  %s1829_s21 = sld [smem:[#allocation3 + $0x103]] (!%p1805_p1) }
  0x80   : > { %2161 = vpow2.f32 %v1777_v45  ;;  %v365_v51 = vadd.f32 %v364_v46, %v360_v43  ;;  %v374_v52 = vmul.f32 %v1792_v5, %v373_v50  ;;  %v378_v53 = vstv %s1784_s14  ;;  %s2713_s29 = sld [smem:[#allocation8]] (!%p1805_p1) }
  0x81   : > { %v450_v54 = vadd.f32 %v449_v42, %v445_v48  ;;  %v379_v56 = vmul.f32 %v1794_v10, %v378_v53  ;;  %s471_s30 = sld [smem:[#allocation3]] (!%p1805_p1) }
  0x82   : > { %v370_v55 = vadd.f32 %v369_v49, %v365_v51  ;;  %s1807_s18 = sld [smem:[#allocation3 + $0x1]] (!%p1805_p1) }
  0x83   : > { %v1804_v57 = vmul.f32 -1.442695, %v450_v54  ;;  %s1809_s10 = sld [smem:[#allocation3 + $0x2]] (!%p1805_p1) }
  0x84   : > { %v375_v58 = vadd.f32 %v374_v52, %v370_v55  ;;  %s2718_s17 = sld [smem:[#allocation3 + $0x3]] (!%p1805_p1) }
  0x85   : > { %2163 = vpow2.f32 %v1804_v57  ;;  %s2721_s14 = sld [smem:[#allocation8 + $0x3]] (!%p1805_p1) }
  0x86   : > { %v380_v59 = vadd.f32 %v379_v56, %v375_v58  ;;  %s1834_s3 = sld [smem:[#allocation3 + $0x181]] (!%p1805_p1) }
  0x87   : > { %s2726_s9 = sld [smem:[#allocation3 + $0x182]] (!%p1805_p1) }
  0x88   : > { %v2160_v60 = vpop.eup %2159  ;;  %v1786_v61 = vmul.f32 -1.442695, %v380_v59 }
  0x89   : > { %v419_v62 = vadd.f32 1.0, %v2160_v60 }
  0x8a   : > { %2165 = vpow2.f32 %v1786_v61 }
  0x8b   : > { %2167 = vrcp.f32 %v419_v62 }
  0x8d   : > { %v2162_v63 = vpop.eup %2161 }
  0x8e   : > { %v349_v0 = vadd.f32 1.0, %v2162_v63 }
  0x90   : > { %2169 = vrcp.f32 %v349_v0 }
  0x92   : > { %v2164_v1 = vpop.eup %2163 }
  0x93   : > { %v454_v2 = vadd.f32 1.0, %v2164_v1 }
  0x95   : > { %2171 = vrcp.f32 %v454_v2 }
  0x97   : > { %v2166_v3 = vpop.eup %2165 }
  0x98   : > { %v2168_v4 = vpop.eup %2167  ;;  %v384_v5 = vadd.f32 1.0, %v2166_v3 }
  0x99   : > { %v422_v6 = vmul.f32 %v2168_v4, %v415_v26 }
  0x9a   : > { %2173 = vrcp.f32 %v384_v5 }
  0x9b   : > { %424 = vrot.lane.b32.xlu1 %v422_v6, %s2449_s12 }
  0x9d   : > { %v2170_v7 = vpop.eup %2169 }
  0x9e   : > { %v352_v8 = vmul.f32 %v2170_v7, %v345_v40 }
  0xa0   : > { %354 = vrot.lane.b32.xlu0 %v352_v8, %s2449_s12 }
  0xa2   : > { %v2172_v9 = vpop.eup %2171 }
  0xa3   : > { %v457_v10 = vmul.f32 %v2172_v9, %v450_v54 }
  0xa5   : > { %459 = vrot.lane.b32.xlu1 %v457_v10, %s2449_s12 }
  0xa7   : > { %v2174_v11 = vpop.eup %2173 }
  0xa8   : > { %v387_v12 = vmul.f32 %v2174_v11, %v380_v59 }
  0xaa   : > { %389 = vrot.lane.b32.xlu0 %v387_v12, %s2449_s12  ;;  %s1833_s12 = sld [smem:[#allocation3 + $0x180]] (!%p1805_p1) }
 0x10d   : > { %v425_v13 = vpop.permute.xlu1 %424 }
 0x10e   : > { %428 = vst.msk [vmem:[#allocation2 + $0x22] sm:$0xff] %vm357_vm2, %v425_v13 }
 0x112   : > { %v355_v14 = vpop.permute.xlu0 %354 }
 0x113   : > { %358 = vst.msk [vmem:[#allocation2 + $0x2] sm:$0xff] %vm357_vm2, %v355_v14 }
 0x117   : > { %v460_v15 = vpop.permute.xlu1 %459 }
 0x118   : > { %463 = vst.msk [vmem:[#allocation2 + $0x32] sm:$0xff] %vm357_vm2, %v460_v15 }
 0x119   : > { %467 = sbr.rel (%p1805_p1) target bundleno = 455 (0x1c7), region = 64 }
 0x11c   : > { %v390_v16 = vpop.permute.xlu0 %389 }
 0x11d   : > { %393 = vst.msk [vmem:[#allocation2 + $0x12] sm:$0xff] %vm357_vm2, %v390_v16 }
 0x11e   : > { %v548_v17 = vld [vmem:[%s2710_s26] sm:$0x3]  ;;  %v1826_v18 = vld [vmem:[%s2710_s26 + $0x10] sm:$0x3]  ;;  %v546_v19 = vstv %s1823_s13  ;;  %v549_v20 = vstv %s1824_s5  ;;  %s2729_s13 = sld [smem:[#allocation3 + $0x183]]  ;;  %vm509_vm3 = vcmask 140304  }
 0x11f   : > { %v1828_v21 = vld [vmem:[%s2710_s26 + $0x20] sm:$0x3]  ;;  %v550_v22 = vmul.f32 %v549_v20, %v548_v17  ;;  %v554_v23 = vstv %s1825_s6  ;;  %v559_v25 = vstv %s1827_s16  ;;  %v1830_v26 = vld [vmem:[%s2710_s26 + $0x30] sm:$0x3]  ;;  %s2733_s5 = sld [smem:[#allocation8 + $0x1]] }
 0x120   : > { %v555_v24 = vmul.f32 %v1826_v18, %v554_v23  ;;  %v560_v28 = vmul.f32 %v1828_v21, %v559_v25  ;;  %v564_v29 = vstv %s1829_s21  ;;  %v473_v30 = vld [vmem:[%s2710_s26] sm:$0x3]  ;;  %v1808_v31 = vld [vmem:[%s2710_s26 + $0x10] sm:$0x3]  ;;  %v470_v34 = vstv %s2713_s29  ;;  %s1815_s6 = sld [smem:[#allocation3 + $0x80]] }
 0x121   : > { %v551_v27 = vadd.f32 %v550_v22, %v546_v19  ;;  %v565_v33 = vmul.f32 %v1830_v26, %v564_v29  ;;  %v474_v35 = vstv %s471_s30  ;;  %v1810_v36 = vld [vmem:[%s2710_s26 + $0x20] sm:$0x3]  ;;  %v481_v38 = vstv %s1807_s18  ;;  %v1812_v42 = vld [vmem:[%s2710_s26 + $0x30] sm:$0x3]  ;;  %s1816_s16 = sld [smem:[#allocation3 + $0x81]] }
 0x122   : > { %v475_v37 = vmul.f32 %v474_v35, %v473_v30  ;;  %v482_v40 = vmul.f32 %v1808_v31, %v481_v38  ;;  %v488_v41 = vstv %s1809_s10  ;;  %v495_v45 = vstv %s2718_s17  ;;  %v582_v46 = vld [vmem:[%s2710_s26] sm:$0x3]  ;;  %v1835_v48 = vld [vmem:[%s2710_s26 + $0x10] sm:$0x3]  ;;  %s1818_s21 = sld [smem:[#allocation3 + $0x82]] }
 0x123   : > { %v556_v32 = vadd.f32 %v555_v24, %v551_v27  ;;  %v489_v44 = vmul.f32 %v1810_v36, %v488_v41  ;;  %v496_v50 = vmul.f32 %v1812_v42, %v495_v45  ;;  %v580_v51 = vstv %s2721_s14  ;;  %v1837_v53 = vld [vmem:[%s2710_s26 + $0x20] sm:$0x3]  ;;  %v1839_v60 = vld [vmem:[%s2710_s26 + $0x30] sm:$0x3]  ;;  %s1820_s29 = sld [smem:[#allocation3 + $0x83]] }
 0x124   : > { %v476_v43 = vadd.f32 %v475_v37, %v470_v34  ;;  %v583_v52 = vstv %s1833_s12  ;;  %v588_v56 = vstv %s1834_s3  ;;  %v593_v59 = vstv %s2726_s9  ;;  %v514_v0 = vld [vmem:[%s2710_s26] sm:$0x3] }
 0x125   : > { %v561_v39 = vadd.f32 %v560_v28, %v556_v32  ;;  %v584_v55 = vmul.f32 %v583_v52, %v582_v46  ;;  %v589_v58 = vmul.f32 %v1835_v48, %v588_v56  ;;  %v594_v62 = vmul.f32 %v1837_v53, %v593_v59  ;;  %v1817_v2 = vld [vmem:[%s2710_s26 + $0x10] sm:$0x3]  ;;  %v1819_v7 = vld [vmem:[%s2710_s26 + $0x20] sm:$0x3] }
 0x126   : > { %v483_v49 = vadd.f32 %v482_v40, %v476_v43  ;;  %v598_v63 = vstv %s2729_s13  ;;  %v512_v5 = vstv %s2733_s5  ;;  %v515_v6 = vstv %s1815_s6  ;;  %v1821_v14 = vld [vmem:[%s2710_s26 + $0x30] sm:$0x3]  ;;  %s2450_s26 = smov 2  }
 0x127   : > { %v566_v47 = vadd.f32 %v565_v33, %v561_v39  ;;  %v585_v61 = vadd.f32 %v584_v55, %v580_v51  ;;  %v599_v4 = vmul.f32 %v1839_v60, %v598_v63  ;;  %v516_v9 = vmul.f32 %v515_v6, %v514_v0 }
 0x128   : > { %v490_v57 = vadd.f32 %v489_v44, %v483_v49  ;;  %v520_v10 = vstv %s1816_s16  ;;  %v525_v13 = vstv %s1818_s21 }
 0x129   : > { %v1831_v54 = vmul.f32 -1.442695, %v566_v47  ;;  %v590_v3 = vadd.f32 %v589_v58, %v585_v61  ;;  %v521_v12 = vmul.f32 %v1817_v2, %v520_v10  ;;  %v517_v15 = vadd.f32 %v516_v9, %v512_v5 }
 0x12a   : > { %v497_v1 = vadd.f32 %v496_v50, %v490_v57  ;;  %v526_v16 = vmul.f32 %v1819_v7, %v525_v13  ;;  %v530_v17 = vstv %s1820_s29 }
 0x12b   : > { %2175 = vpow2.f32 %v1831_v54  ;;  %v595_v11 = vadd.f32 %v594_v62, %v590_v3  ;;  %v522_v19 = vadd.f32 %v521_v12, %v517_v15  ;;  %v531_v20 = vmul.f32 %v1821_v14, %v530_v17 }
 0x12c   : > { %v1813_v8 = vmul.f32 -1.442695, %v497_v1 }
 0x12d   : > { %v600_v18 = vadd.f32 %v599_v4, %v595_v11  ;;  %v527_v22 = vadd.f32 %v526_v16, %v522_v19 }
 0x12e   : > { %2177 = vpow2.f32 %v1813_v8 }
 0x12f   : > { %v1840_v21 = vmul.f32 -1.442695, %v600_v18  ;;  %v532_v23 = vadd.f32 %v531_v20, %v527_v22 }
 0x131   : > { %2179 = vpow2.f32 %v1840_v21  ;;  %v1822_v25 = vmul.f32 -1.442695, %v532_v23 }
 0x133   : > { %2181 = vpow2.f32 %v1822_v25 }
 0x138   : > { %v2176_v24 = vpop.eup %2175 }
 0x139   : > { %v570_v26 = vadd.f32 1.0, %v2176_v24 }
 0x13b   : > { %2183 = vrcp.f32 %v570_v26  ;;  %v2178_v27 = vpop.eup %2177 }
 0x13c   : > { %v501_v28 = vadd.f32 1.0, %v2178_v27 }
 0x13e   : > { %2185 = vrcp.f32 %v501_v28  ;;  %v2180_v29 = vpop.eup %2179 }
 0x13f   : > { %v604_v30 = vadd.f32 1.0, %v2180_v29 }
 0x140   : > { %v2182_v31 = vpop.eup %2181 }
 0x141   : > { %2187 = vrcp.f32 %v604_v30  ;;  %v536_v33 = vadd.f32 1.0, %v2182_v31 }
 0x143   : > { %2189 = vrcp.f32 %v536_v33 }
 0x148   : > { %v2184_v32 = vpop.eup %2183 }
 0x149   : > { %v573_v34 = vmul.f32 %v2184_v32, %v566_v47 }
 0x14b   : > { %575 = vrot.lane.b32.xlu1 %v573_v34, %s2450_s26  ;;  %v2186_v35 = vpop.eup %2185 }
 0x14c   : > { %v504_v36 = vmul.f32 %v2186_v35, %v497_v1 }
 0x14e   : > { %506 = vrot.lane.b32.xlu0 %v504_v36, %s2450_s26  ;;  %v2188_v37 = vpop.eup %2187 }
 0x14f   : > { %v607_v38 = vmul.f32 %v2188_v37, %v600_v18 }
 0x150   : > { %v2190_v39 = vpop.eup %2189 }
 0x151   : > { %609 = vrot.lane.b32.xlu1 %v607_v38, %s2450_s26  ;;  %v539_v40 = vmul.f32 %v2190_v39, %v532_v23 }
 0x153   : > { %541 = vrot.lane.b32.xlu0 %v539_v40, %s2450_s26 }
 0x1bd   : > { %v576_v41 = vpop.permute.xlu1 %575 }
 0x1be   : > { %578 = vst.msk [vmem:[#allocation2 + $0x20] sm:$0x3] %vm509_vm3, %v576_v41 }
 0x1c0   : > { %v507_v42 = vpop.permute.xlu0 %506 }
 0x1c1   : > { %510 = vst.msk [vmem:[#allocation2] sm:$0x3] %vm509_vm3, %v507_v42 }
 0x1c3   : > { %v610_v43 = vpop.permute.xlu1 %609 }
 0x1c4   : > { %612 = vst.msk [vmem:[#allocation2 + $0x30] sm:$0x3] %vm509_vm3, %v610_v43 }
 0x1c5   : > { %v542_v44 = vpop.permute.xlu0 %541 }
 0x1c6   : > { %544 = vst.msk [vmem:[#allocation2 + $0x10] sm:$0x3] %vm509_vm3, %v542_v44 }
 0x1c7 PF: > { %p1841_p4 = scmp.ge.s32.totalorder %s2423_s24, 1 }
 0x1c8   : > { %s1864_s30 = sld [smem:[#allocation8 + $0x2]] (!%p1841_p4) }
 0x1c9   : > { %616 = sbr.rel (%p1841_p4) target bundleno = 639 (0x27f), region = 68  ;;  %s1865_s18 = sld [smem:[#allocation3 + $0x100]] (!%p1841_p4) }
 0x1ca   : > { %s1867_s10 = sld [smem:[#allocation3 + $0x101]] (!%p1841_p4) }
 0x1cb   : > { %s1869_s17 = sld [smem:[#allocation3 + $0x102]] (!%p1841_p4) }
 0x1cc   : > { %s1871_s14 = sld [smem:[#allocation3 + $0x103]] (!%p1841_p4) }
 0x1cd   : > { %s2748_s12 = sld [smem:[#allocation8]] (!%p1841_p4) }
 0x1ce   : > { %v1866_v45 = vld [vmem:[%s2685_s7 + $0x8] sm:$0x3]  ;;  %v1868_v46 = vld [vmem:[%s2685_s7 + $0x18] sm:$0x3]  ;;  %s620_s3 = sld [smem:[#allocation3]]  ;;  %v695_v47 = vstv %s1864_s30  ;;  %vm658_vm4 = vcmask 140304  }
 0x1cf   : > { %v698_v48 = vstv %s1865_s18  ;;  %v1870_v49 = vld [vmem:[%s2685_s7 + $0x28] sm:$0x3]  ;;  %s1844_s9 = sld [smem:[#allocation3 + $0x1]]  ;;  %v1872_v54 = vld [vmem:[%s2685_s7 + $0x38] sm:$0x3] }
 0x1d0   : > { %v699_v50 = vmul.f32 %v1866_v45, %v698_v48  ;;  %v703_v51 = vstv %s1867_s10  ;;  %s1847_s13 = sld [smem:[#allocation3 + $0x2]]  ;;  %v1843_v58 = vld [vmem:[%s2685_s7 + $0x8] sm:$0x3]  ;;  %v1846_v59 = vld [vmem:[%s2685_s7 + $0x18] sm:$0x3] }
 0x1d1   : > { %v704_v52 = vmul.f32 %v1868_v46, %v703_v51  ;;  %v708_v53 = vstv %s1869_s17  ;;  %s2753_s5 = sld [smem:[#allocation3 + $0x3]]  ;;  %v1849_v0 = vld [vmem:[%s2685_s7 + $0x28] sm:$0x3]  ;;  %v1852_v6 = vld [vmem:[%s2685_s7 + $0x38] sm:$0x3] }
 0x1d2   : > { %v700_v55 = vadd.f32 %v699_v50, %v695_v47  ;;  %v709_v56 = vmul.f32 %v1870_v49, %v708_v53  ;;  %v713_v57 = vstv %s1871_s14  ;;  %s2756_s6 = sld [smem:[#allocation8 + $0x3]]  ;;  %v1876_v10 = vld [vmem:[%s2685_s7 + $0x8] sm:$0x3]  ;;  %v1878_v12 = vld [vmem:[%s2685_s7 + $0x18] sm:$0x3] }
 0x1d3   : > { %s1875_s16 = sld [smem:[#allocation3 + $0x180]]  ;;  %v714_v61 = vmul.f32 %v1872_v54, %v713_v57  ;;  %v619_v62 = vstv %s2748_s12  ;;  %v1880_v17 = vld [vmem:[%s2685_s7 + $0x28] sm:$0x3]  ;;  %v1882_v24 = vld [vmem:[%s2685_s7 + $0x38] sm:$0x3] }
 0x1d4   : > { %v705_v60 = vadd.f32 %v704_v52, %v700_v55  ;;  %v623_v63 = vstv %s620_s3  ;;  %s1877_s21 = sld [smem:[#allocation3 + $0x181]]  ;;  %v1856_v28 = vld [vmem:[%s2685_s7 + $0x8] sm:$0x3]  ;;  %v1858_v30 = vld [vmem:[%s2685_s7 + $0x18] sm:$0x3] }
 0x1d5   : > { %v624_v1 = vmul.f32 %v1843_v58, %v623_v63  ;;  %v630_v2 = vstv %s1844_s9  ;;  %s2761_s29 = sld [smem:[#allocation3 + $0x182]]  ;;  %v1860_v35 = vld [vmem:[%s2685_s7 + $0x28] sm:$0x3]  ;;  %v1862_v42 = vld [vmem:[%s2685_s7 + $0x38] sm:$0x3]  ;;  %s2451_s7 = smov 2  }
 0x1d6   : > { %v710_v3 = vadd.f32 %v709_v56, %v705_v60  ;;  %v631_v4 = vmul.f32 %v1846_v59, %v630_v2  ;;  %v637_v5 = vstv %s1847_s13  ;;  %s2764_s26 = sld [smem:[#allocation3 + $0x183]] }
 0x1d7   : > { %v625_v7 = vadd.f32 %v624_v1, %v619_v62  ;;  %v638_v8 = vmul.f32 %v1849_v0, %v637_v5  ;;  %v644_v9 = vstv %s2753_s5  ;;  %s2768_s30 = sld [smem:[#allocation8 + $0x1]] }
 0x1d8   : > { %v715_v11 = vadd.f32 %v714_v61, %v710_v3  ;;  %s1855_s18 = sld [smem:[#allocation3 + $0x80]]  ;;  %v645_v14 = vmul.f32 %v1852_v6, %v644_v9  ;;  %v729_v15 = vstv %s2756_s6 }
 0x1d9   : > { %v632_v13 = vadd.f32 %v631_v4, %v625_v7  ;;  %v732_v16 = vstv %s1875_s16  ;;  %s1857_s10 = sld [smem:[#allocation3 + $0x81]] }
 0x1da   : > { %v1873_v18 = vmul.f32 -1.442695, %v715_v11  ;;  %v733_v19 = vmul.f32 %v1876_v10, %v732_v16  ;;  %v737_v20 = vstv %s1877_s21  ;;  %s1859_s17 = sld [smem:[#allocation3 + $0x82]] }
 0x1db   : > { %v639_v21 = vadd.f32 %v638_v8, %v632_v13  ;;  %v738_v22 = vmul.f32 %v1878_v12, %v737_v20  ;;  %v742_v23 = vstv %s2761_s29  ;;  %s1861_s14 = sld [smem:[#allocation3 + $0x83]] }
 0x1dc   : > { %2191 = vpow2.f32 %v1873_v18  ;;  %v734_v25 = vadd.f32 %v733_v19, %v729_v15  ;;  %v743_v26 = vmul.f32 %v1880_v17, %v742_v23  ;;  %v747_v27 = vstv %s2764_s26 }
 0x1dd   : > { %v646_v29 = vadd.f32 %v645_v14, %v639_v21  ;;  %v748_v32 = vmul.f32 %v1882_v24, %v747_v27  ;;  %v661_v33 = vstv %s2768_s30 }
 0x1de   : > { %v739_v31 = vadd.f32 %v738_v22, %v734_v25  ;;  %v664_v34 = vstv %s1855_s18 }
 0x1df   : > { %v1853_v36 = vmul.f32 -1.442695, %v646_v29  ;;  %v665_v37 = vmul.f32 %v1856_v28, %v664_v34  ;;  %v669_v38 = vstv %s1857_s10 }
 0x1e0   : > { %v744_v39 = vadd.f32 %v743_v26, %v739_v31  ;;  %v670_v40 = vmul.f32 %v1858_v30, %v669_v38  ;;  %v674_v41 = vstv %s1859_s17 }
 0x1e1   : > { %2193 = vpow2.f32 %v1853_v36  ;;  %v666_v43 = vadd.f32 %v665_v37, %v661_v33  ;;  %v675_v44 = vmul.f32 %v1860_v35, %v674_v41  ;;  %v679_v45 = vstv %s1861_s14 }
 0x1e2   : > { %v749_v46 = vadd.f32 %v748_v32, %v744_v39  ;;  %v680_v48 = vmul.f32 %v1862_v42, %v679_v45 }
 0x1e3   : > { %v671_v47 = vadd.f32 %v670_v40, %v666_v43 }
 0x1e4   : > { %v1883_v49 = vmul.f32 -1.442695, %v749_v46 }
 0x1e5   : > { %v676_v50 = vadd.f32 %v675_v44, %v671_v47 }
 0x1e6   : > { %2195 = vpow2.f32 %v1883_v49 }
 0x1e7   : > { %v681_v51 = vadd.f32 %v680_v48, %v676_v50 }
 0x1e9   : > { %v2192_v52 = vpop.eup %2191  ;;  %v1863_v53 = vmul.f32 -1.442695, %v681_v51 }
 0x1ea   : > { %v719_v54 = vadd.f32 1.0, %v2192_v52 }
 0x1eb   : > { %2197 = vpow2.f32 %v1863_v53 }
 0x1ec   : > { %2199 = vrcp.f32 %v719_v54 }
 0x1ee   : > { %v2194_v55 = vpop.eup %2193 }
 0x1ef   : > { %v650_v56 = vadd.f32 1.0, %v2194_v55 }
 0x1f1   : > { %2201 = vrcp.f32 %v650_v56 }
 0x1f3   : > { %v2196_v57 = vpop.eup %2195 }
 0x1f4   : > { %v753_v58 = vadd.f32 1.0, %v2196_v57 }
 0x1f6   : > { %2203 = vrcp.f32 %v753_v58 }
 0x1f8   : > { %v2198_v59 = vpop.eup %2197 }
 0x1f9   : > { %v2200_v60 = vpop.eup %2199  ;;  %v685_v61 = vadd.f32 1.0, %v2198_v59 }
 0x1fa   : > { %v722_v62 = vmul.f32 %v2200_v60, %v715_v11 }
 0x1fb   : > { %2205 = vrcp.f32 %v685_v61 }
 0x1fc   : > { %724 = vrot.lane.b32.xlu1 %v722_v62, %s2451_s7 }
 0x1fe   : > { %v2202_v63 = vpop.eup %2201 }
 0x1ff   : > { %v653_v0 = vmul.f32 %v2202_v63, %v646_v29 }
 0x201   : > { %655 = vrot.lane.b32.xlu0 %v653_v0, %s2451_s7 }
 0x203   : > { %v2204_v1 = vpop.eup %2203 }
 0x204   : > { %v756_v2 = vmul.f32 %v2204_v1, %v749_v46 }
 0x206   : > { %758 = vrot.lane.b32.xlu1 %v756_v2, %s2451_s7 }
 0x208   : > { %v2206_v3 = vpop.eup %2205 }
 0x209   : > { %v688_v4 = vmul.f32 %v2206_v3, %v681_v51 }
 0x20b   : > { %690 = vrot.lane.b32.xlu0 %v688_v4, %s2451_s7 }
 0x26e   : > { %v725_v5 = vpop.permute.xlu1 %724 }
 0x26f   : > { %727 = vst.msk [vmem:[#allocation2 + $0x2a] sm:$0x3] %vm658_vm4, %v725_v5 }
 0x273   : > { %v656_v6 = vpop.permute.xlu0 %655 }
 0x274   : > { %659 = vst.msk [vmem:[#allocation2 + $0xa] sm:$0x3] %vm658_vm4, %v656_v6 }
 0x278   : > { %v759_v7 = vpop.permute.xlu1 %758 }
 0x279   : > { %761 = vst.msk [vmem:[#allocation2 + $0x3a] sm:$0x3] %vm658_vm4, %v759_v7 }
 0x27d   : > { %v691_v8 = vpop.permute.xlu0 %690 }
 0x27e   : > { %693 = vst.msk [vmem:[#allocation2 + $0x1a] sm:$0x3] %vm658_vm4, %v691_v8 }
 0x27f PF: > { %v2781_v9 = vld [vmem:[#allocation2 + $0x2] sm:$0xff]  ;;  %s1885_s12 = sld [smem:[#allocation9 + $0x2]]  ;;  %s2452_s3 = smov 126   ;;  %v2813_v38 = vld [vmem:[#allocation2 + $0x10] sm:$0xff]  ;;  %vm767_vm5 = vcmask 130048  }
 0x280   : > { %764 = vrot.lane.b32.xlu0 %v2781_v9, %s2452_s3  ;;  %s1884_s9 = sld [smem:[#allocation9 + $0x1]]  ;;  %v2785_v10 = vld [vmem:[#allocation2] sm:$0xff]  ;;  %s2453_s26 = smov 127   ;;  %v2821_v44 = vld [vmem:[#allocation2 + $0x30] sm:$0xff] }
 0x281   : > { %s1886_s13 = sld [smem:[#allocation9 + $0x3]]  ;;  %v2793_v19 = vld [vmem:[#allocation2 + $0x1] sm:$0xff]  ;;  %s2454_s10 = smov 125   ;;  %v2843_v1 = vld [vmem:[#allocation2 + $0x11] sm:$0xff] }
 0x282   : > { %s1887_s5 = sld [smem:[#allocation9 + $0x4]]  ;;  %s2455_s17 = smov 124   ;;  %v2811_v36 = vld [vmem:[#allocation2 + $0x3] sm:$0xff]  ;;  %v2851_v7 = vld [vmem:[#allocation2 + $0x31] sm:$0xff] }
 0x283   : > { %s1889_s6 = sld [smem:[#allocation9 + $0x6]]  ;;  %v2819_v42 = vld [vmem:[#allocation2 + $0x20] sm:$0xff] }
 0x284   : > { %s1890_s16 = sld [smem:[#allocation9 + $0x7]]  ;;  %v2849_v5 = vld [vmem:[#allocation2 + $0x21] sm:$0xff] }
 0x285   : > { %v785_v11 = vstv %s1885_s12  ;;  %s1891_s21 = sld [smem:[#allocation9 + $0x8]] }
 0x286   : > { %v786_v12 = vmul.f32 %v785_v11, %v2785_v10  ;;  %v777_v13 = vstv %s1884_s9  ;;  %s1892_s29 = sld [smem:[#allocation9 + $0x9]] }
 0x287   : > { %v778_v14 = vmul.f32 %v777_v13, %v2785_v10  ;;  %v793_v15 = vstv %s1886_s13  ;;  %s1894_s30 = sld [smem:[#allocation9 + $0xb]] }
 0x288   : > { %788 = vrot.lane.b32.xlu1 %v786_v12, %s2452_s3  ;;  %v794_v16 = vmul.f32 %v793_v15, %v2785_v10  ;;  %v801_v17 = vstv %s1887_s5  ;;  %s1895_s18 = sld [smem:[#allocation9 + $0xc]] }
 0x289   : > { %780 = vrot.lane.b32.xlu0 %v778_v14, %s2453_s26  ;;  %v802_v18 = vmul.f32 %v801_v17, %v2785_v10  ;;  %v814_v20 = vstv %s1889_s6  ;;  %s1896_s14 = sld [smem:[#allocation9 + $0xd]] }
 0x28a   : > { %v822_v21 = vstv %s1890_s16  ;;  %v815_v22 = vmul.f32 %v814_v20, %v2793_v19  ;;  %s1897_s7 = sld [smem:[#allocation9 + $0xe]] }
 0x28b   : > { %v823_v23 = vmul.f32 %v822_v21, %v2793_v19  ;;  %v830_v24 = vstv %s1891_s21  ;;  %s1899_s12 = sld [smem:[#allocation9 + $0x10]] }
 0x28c   : > { %796 = vrot.lane.b32.xlu1 %v794_v16, %s2454_s10  ;;  %v838_v25 = vstv %s1892_s29  ;;  %v831_v26 = vmul.f32 %v830_v24, %v2793_v19  ;;  %s1913_s9 = sld [smem:[#allocation9 + $0x81]] }
 0x28d   : > { %804 = vrot.lane.b32.xlu0 %v802_v18, %s2455_s17  ;;  %v839_v27 = vmul.f32 %v838_v25, %v2793_v19  ;;  %v851_v28 = vstv %s1894_s30  ;;  %s1942_s13 = sld [smem:[#allocation9 + $0x101]] }
 0x28e   : > { %v859_v29 = vstv %s1895_s18  ;;  %v852_v30 = vmul.f32 %v851_v28, %v2781_v9  ;;  %s1971_s5 = sld [smem:[#allocation9 + $0x181]] }
 0x28f   : > { %v860_v31 = vmul.f32 %v859_v29, %v2781_v9  ;;  %v867_v32 = vstv %s1896_s14  ;;  %s1914_s6 = sld [smem:[#allocation9 + $0x82]] }
 0x290   : > { %817 = vrot.lane.b32.xlu1 %v815_v22, %s2453_s26  ;;  %v875_v33 = vstv %s1897_s7  ;;  %v868_v34 = vmul.f32 %v867_v32, %v2781_v9  ;;  %s1943_s16 = sld [smem:[#allocation9 + $0x102]] }
 0x291   : > { %825 = vrot.lane.b32.xlu0 %v823_v23, %s2452_s3  ;;  %v876_v35 = vmul.f32 %v875_v33, %v2781_v9  ;;  %v888_v37 = vstv %s1899_s12  ;;  %s1972_s21 = sld [smem:[#allocation9 + $0x182]] }
 0x292   : > { %v980_v39 = vstv %s1913_s9  ;;  %v889_v40 = vmul.f32 %v888_v37, %v2811_v36  ;;  %s1915_s29 = sld [smem:[#allocation9 + $0x83]] }
 0x293   : > { %v981_v41 = vmul.f32 %v980_v39, %v2813_v38  ;;  %v1183_v43 = vstv %s1942_s13  ;;  %s1944_s30 = sld [smem:[#allocation9 + $0x103]]  ;;  %v2881_v39 = vld [vmem:[#allocation2 + $0x32] sm:$0xff] }
 0x294   : > { %833 = vrot.lane.b32.xlu1 %v831_v26, %s2454_s10  ;;  %v1386_v45 = vstv %s1971_s5  ;;  %v1184_v46 = vmul.f32 %v1183_v43, %v2819_v42  ;;  %s1973_s18 = sld [smem:[#allocation9 + $0x183]] }
 0x295   : > { %841 = vrot.lane.b32.xlu0 %v839_v27, %s2455_s17  ;;  %v1387_v47 = vmul.f32 %v1386_v45, %v2821_v44  ;;  %v988_v48 = vstv %s1914_s6  ;;  %s1916_s14 = sld [smem:[#allocation9 + $0x84]] }
 0x296   : > { %v1191_v49 = vstv %s1943_s16  ;;  %v989_v50 = vmul.f32 %v988_v48, %v2813_v38  ;;  %s1945_s7 = sld [smem:[#allocation9 + $0x104]] }
 0x297   : > { %v1192_v51 = vmul.f32 %v1191_v49, %v2819_v42  ;;  %v1394_v52 = vstv %s1972_s21  ;;  %s1974_s12 = sld [smem:[#allocation9 + $0x184]] }
 0x298   : > { %854 = vrot.lane.b32.xlu1 %v852_v30, %s2453_s26  ;;  %v996_v53 = vstv %s1915_s29  ;;  %v1395_v54 = vmul.f32 %v1394_v52, %v2821_v44  ;;  %s1918_s9 = sld [smem:[#allocation9 + $0x86]] }
 0x299   : > { %862 = vrot.lane.b32.xlu0 %v860_v31, %s2452_s3  ;;  %v997_v55 = vmul.f32 %v996_v53, %v2813_v38  ;;  %v1199_v56 = vstv %s1944_s30  ;;  %s1947_s13 = sld [smem:[#allocation9 + $0x106]]  ;;  %v2873_v31 = vld [vmem:[#allocation2 + $0x12] sm:$0xff] }
 0x29a   : > { %v1402_v57 = vstv %s1973_s18  ;;  %v1200_v58 = vmul.f32 %v1199_v56, %v2819_v42  ;;  %s1976_s5 = sld [smem:[#allocation9 + $0x186]] }
 0x29b   : > { %v1403_v59 = vmul.f32 %v1402_v57, %v2821_v44  ;;  %v1004_v60 = vstv %s1916_s14  ;;  %s1919_s6 = sld [smem:[#allocation9 + $0x87]] }
 0x29c   : > { %870 = vrot.lane.b32.xlu1 %v868_v34, %s2454_s10  ;;  %v1207_v61 = vstv %s1945_s7  ;;  %v1005_v62 = vmul.f32 %v1004_v60, %v2813_v38  ;;  %s1948_s16 = sld [smem:[#allocation9 + $0x107]] }
 0x29d   : > { %878 = vrot.lane.b32.xlu0 %v876_v35, %s2455_s17  ;;  %v1208_v63 = vmul.f32 %v1207_v61, %v2819_v42  ;;  %v1410_v0 = vstv %s1974_s12  ;;  %s1977_s21 = sld [smem:[#allocation9 + $0x187]]  ;;  %v2879_v35 = vld [vmem:[#allocation2 + $0x22] sm:$0xff] }
 0x29e   : > { %v1017_v2 = vstv %s1918_s9  ;;  %v1411_v3 = vmul.f32 %v1410_v0, %v2821_v44  ;;  %s1920_s29 = sld [smem:[#allocation9 + $0x88]] }
 0x29f   : > { %v1018_v4 = vmul.f32 %v1017_v2, %v2843_v1  ;;  %v1220_v6 = vstv %s1947_s13  ;;  %s1949_s30 = sld [smem:[#allocation9 + $0x108]] }
 0x2a0   : > { %891 = vrot.lane.b32.xlu1 %v889_v40, %s2453_s26  ;;  %v1423_v8 = vstv %s1976_s5  ;;  %v1221_v11 = vmul.f32 %v1220_v6, %v2849_v5  ;;  %s1978_s18 = sld [smem:[#allocation9 + $0x188]]  ;;  %v2911_v6 = vld [vmem:[#allocation2 + $0x33] sm:$0xff] }
 0x2a1   : > { %983 = vrot.lane.b32.xlu0 %v981_v41, %s2453_s26  ;;  %v1424_v12 = vmul.f32 %v1423_v8, %v2851_v7  ;;  %v1025_v13 = vstv %s1919_s6  ;;  %s1921_s14 = sld [smem:[#allocation9 + $0x89]] }
 0x2a2   : > { %v1228_v14 = vstv %s1948_s16  ;;  %v1026_v15 = vmul.f32 %v1025_v13, %v2843_v1  ;;  %s1950_s7 = sld [smem:[#allocation9 + $0x109]] }
 0x2a3   : > { %v1229_v16 = vmul.f32 %v1228_v14, %v2849_v5  ;;  %v1431_v17 = vstv %s1977_s21  ;;  %s1979_s12 = sld [smem:[#allocation9 + $0x189]] }
 0x2a4   : > { %1186 = vrot.lane.b32.xlu1 %v1184_v46, %s2453_s26  ;;  %v1033_v18 = vstv %s1920_s29  ;;  %v1432_v20 = vmul.f32 %v1431_v17, %v2851_v7  ;;  %s1923_s9 = sld [smem:[#allocation9 + $0x8b]] }
 0x2a5   : > { %1389 = vrot.lane.b32.xlu0 %v1387_v47, %s2453_s26  ;;  %v1034_v21 = vmul.f32 %v1033_v18, %v2843_v1  ;;  %v1236_v22 = vstv %s1949_s30  ;;  %s1952_s13 = sld [smem:[#allocation9 + $0x10b]] }
 0x2a6   : > { %v1439_v23 = vstv %s1978_s18  ;;  %v1237_v24 = vmul.f32 %v1236_v22, %v2849_v5  ;;  %s1981_s5 = sld [smem:[#allocation9 + $0x18b]] }
 0x2a7   : > { %v1440_v25 = vmul.f32 %v1439_v23, %v2851_v7  ;;  %v1041_v26 = vstv %s1921_s14  ;;  %s1924_s6 = sld [smem:[#allocation9 + $0x8c]] }
 0x2a8   : > { %991 = vrot.lane.b32.xlu1 %v989_v50, %s2452_s3  ;;  %v1244_v27 = vstv %s1950_s7  ;;  %v1042_v28 = vmul.f32 %v1041_v26, %v2843_v1  ;;  %s1953_s16 = sld [smem:[#allocation9 + $0x10c]] }
 0x2a9   : > { %1194 = vrot.lane.b32.xlu0 %v1192_v51, %s2452_s3  ;;  %v1245_v29 = vmul.f32 %v1244_v27, %v2849_v5  ;;  %v1447_v30 = vstv %s1979_s12  ;;  %s1982_s21 = sld [smem:[#allocation9 + $0x18c]] }
 0x2aa   : > { %v1054_v32 = vstv %s1923_s9  ;;  %v1448_v33 = vmul.f32 %v1447_v30, %v2851_v7  ;;  %s1925_s29 = sld [smem:[#allocation9 + $0x8d]] }
 0x2ab   : > { %v1055_v34 = vmul.f32 %v1054_v32, %v2873_v31  ;;  %v1257_v37 = vstv %s1952_s13  ;;  %s1954_s30 = sld [smem:[#allocation9 + $0x10d]] }
 0x2ac   : > { %1397 = vrot.lane.b32.xlu1 %v1395_v54, %s2452_s3  ;;  %v1460_v40 = vstv %s1981_s5  ;;  %v1258_v41 = vmul.f32 %v1257_v37, %v2879_v35  ;;  %s1983_s18 = sld [smem:[#allocation9 + $0x18d]] }
 0x2ad   : > { %999 = vrot.lane.b32.xlu0 %v997_v55, %s2454_s10  ;;  %v1461_v43 = vmul.f32 %v1460_v40, %v2881_v39  ;;  %v1062_v45 = vstv %s1924_s6  ;;  %s1926_s14 = sld [smem:[#allocation9 + $0x8e]] }
 0x2ae   : > { %v1265_v46 = vstv %s1953_s16  ;;  %v1063_v47 = vmul.f32 %v1062_v45, %v2873_v31  ;;  %s1955_s7 = sld [smem:[#allocation9 + $0x10e]] }
 0x2af   : > { %v1266_v48 = vmul.f32 %v1265_v46, %v2879_v35  ;;  %v1468_v49 = vstv %s1982_s21  ;;  %s1984_s12 = sld [smem:[#allocation9 + $0x18e]] }
 0x2b0   : > { %1202 = vrot.lane.b32.xlu1 %v1200_v58, %s2454_s10  ;;  %v1070_v50 = vstv %s1925_s29  ;;  %v1469_v51 = vmul.f32 %v1468_v49, %v2881_v39  ;;  %s1928_s9 = sld [smem:[#allocation9 + $0x90]] }
 0x2b1   : > { %1405 = vrot.lane.b32.xlu0 %v1403_v59, %s2454_s10  ;;  %v1071_v52 = vmul.f32 %v1070_v50, %v2873_v31  ;;  %v1273_v53 = vstv %s1954_s30  ;;  %s1957_s13 = sld [smem:[#allocation9 + $0x110]] }
 0x2b2   : > { %v1476_v54 = vstv %s1983_s18  ;;  %v1274_v55 = vmul.f32 %v1273_v53, %v2879_v35  ;;  %s1986_s5 = sld [smem:[#allocation9 + $0x190]] }
 0x2b3   : > { %v1477_v56 = vmul.f32 %v1476_v54, %v2881_v39  ;;  %v1078_v57 = vstv %s1926_s14  ;;  %s1900_s6 = sld [smem:[#allocation9 + $0x11]] }
 0x2b4   : > { %1007 = vrot.lane.b32.xlu1 %v1005_v62, %s2455_s17  ;;  %v1281_v58 = vstv %s1955_s7  ;;  %v1079_v59 = vmul.f32 %v1078_v57, %v2873_v31  ;;  %v2903_v62 = vld [vmem:[#allocation2 + $0x13] sm:$0xff]  ;;  %s1929_s16 = sld [smem:[#allocation9 + $0x91]] }
 0x2b5   : > { %1210 = vrot.lane.b32.xlu0 %v1208_v63, %s2455_s17  ;;  %v1282_v60 = vmul.f32 %v1281_v58, %v2879_v35  ;;  %v1484_v61 = vstv %s1984_s12  ;;  %s1958_s21 = sld [smem:[#allocation9 + $0x111]]  ;;  %v2969_v58 = vld [vmem:[#allocation2 + $0x4] sm:$0xff] }
 0x2b6   : > { %v1091_v63 = vstv %s1928_s9  ;;  %v1485_v0 = vmul.f32 %v1484_v61, %v2881_v39  ;;  %s1987_s29 = sld [smem:[#allocation9 + $0x191]] }
 0x2b7   : > { %v1092_v2 = vmul.f32 %v1091_v63, %v2903_v62  ;;  %s1901_s30 = sld [smem:[#allocation9 + $0x12]]  ;;  %v2974_v63 = vld [vmem:[#allocation2 + $0x14] sm:$0xff] }
 0x2b8   : > { %1413 = vrot.lane.b32.xlu1 %v1411_v3, %s2455_s17  ;;  %v2909_v3 = vld [vmem:[#allocation2 + $0x23] sm:$0xff]  ;;  %v1497_v8 = vstv %s1986_s5  ;;  %s772_s18 = sld [smem:[#allocation9]] }
 0x2b9   : > { %1020 = vrot.lane.b32.xlu0 %v1018_v4, %s2453_s26  ;;  %v1294_v4 = vstv %s1957_s13  ;;  %v896_v13 = vstv %s1900_s6  ;;  %s1930_s14 = sld [smem:[#allocation9 + $0x92]] }
 0x2ba   : > { %v1099_v14 = vstv %s1929_s16  ;;  %s2919_s7 = sld [smem:[#allocation11]] }
 0x2bb   : > { %v1302_v17 = vstv %s1958_s21  ;;  %s1959_s12 = sld [smem:[#allocation9 + $0x112]] }
 0x2bc   : > { %1223 = vrot.lane.b32.xlu1 %v1221_v11, %s2453_s26  ;;  %v1295_v11 = vmul.f32 %v1294_v4, %v2909_v3  ;;  %v1505_v18 = vstv %s1987_s29  ;;  %s1988_s9 = sld [smem:[#allocation9 + $0x192]] }
 0x2bd   : > { %1426 = vrot.lane.b32.xlu0 %v1424_v12, %s2453_s26  ;;  %v1498_v12 = vmul.f32 %v1497_v8, %v2911_v6  ;;  %v904_v22 = vstv %s1901_s30  ;;  %s1902_s13 = sld [smem:[#allocation9 + $0x13]] }
 0x2be   : > { %v773_v23 = vstv %s772_s18  ;;  %s1931_s5 = sld [smem:[#allocation9 + $0x93]]  ;;  %v905_v26 = vmul.f32 %v904_v22, %v2811_v36 }
 0x2bf   : > { %v774_v27 = vmul.f32 %v773_v23, %v2785_v10  ;;  %s2932_s6 = sld [smem:[#allocation9 + $0x5]] }
 0x2c0   : > { %1028 = vrot.lane.b32.xlu1 %v1026_v15, %s2452_s3  ;;  %v897_v15 = vmul.f32 %v896_v13, %v2811_v36  ;;  %s2937_s16 = sld [smem:[#allocation9 + $0x113]] }
 0x2c1   : > { %1231 = vrot.lane.b32.xlu0 %v1229_v16, %s2452_s3  ;;  %v1100_v16 = vmul.f32 %v1099_v14, %v2903_v62  ;;  %v1310_v30 = vstv %s1959_s12  ;;  %s2939_s21 = sld [smem:[#allocation9 + $0x193]] }
 0x2c2   : > { %v1513_v32 = vstv %s1988_s9  ;;  %v1311_v10 = vmul.f32 %v1310_v30, %v2909_v3  ;;  %s2945_s29 = sld [smem:[#allocation9 + $0x15]] }
 0x2c3   : > { %v912_v37 = vstv %s1902_s13  ;;  %s2947_s30 = sld [smem:[#allocation9 + $0x95]] }
 0x2c4   : > { %1434 = vrot.lane.b32.xlu1 %v1432_v20, %s2452_s3  ;;  %v1303_v20 = vmul.f32 %v1302_v17, %v2909_v3  ;;  %v913_v46 = vmul.f32 %v912_v37, %v2811_v36  ;;  %s2955_s18 = sld [smem:[#allocation9 + $0x115]] }
 0x2c5   : > { %1036 = vrot.lane.b32.xlu0 %v1034_v21, %s2454_s10  ;;  %v1506_v21 = vmul.f32 %v1505_v18, %v2911_v6  ;;  %s2965_s12 = sld [smem:[#allocation9 + $0x16]] }
 0x2c6   : > { %v1318_v49 = vstv %s2937_s16  ;;  %s2972_s9 = sld [smem:[#allocation9 + $0x80]] }
 0x2c7   : > { %s2977_s13 = sld [smem:[#allocation9 + $0x96]] }
 0x2c8   : > { %1239 = vrot.lane.b32.xlu1 %v1237_v24, %s2454_s10  ;;  %s2990_s16 = sld [smem:[#allocation9 + $0x116]] }
 0x2c9   : > { %1442 = vrot.lane.b32.xlu0 %v1440_v25, %s2454_s10  ;;  %v1107_v25 = vstv %s1930_s14  ;;  %s2958_s14 = sld [smem:[#allocation9 + $0x195]] }
 0x2cb   : > { %v933_v23 = vstv %s2965_s12  ;;  %s3019_s12 = sld [smem:[#allocation11 + $0x3]] }
 0x2cc   : > { %1044 = vrot.lane.b32.xlu1 %v1042_v28, %s2455_s17  ;;  %v1108_v28 = vmul.f32 %v1107_v25, %v2903_v62 }
 0x2cd   : > { %1247 = vrot.lane.b32.xlu0 %v1245_v29, %s2455_s17  ;;  %v770_v29 = vstv %s2919_s7  ;;  %s2960_s7 = sld [smem:[#allocation9 + $0xa]] }
 0x2d0   : > { %1450 = vrot.lane.b32.xlu1 %v1448_v33, %s2455_s17  ;;  %v775_v33 = vadd.f32 %v774_v27, %v770_v29 }
 0x2d1   : > { %1057 = vrot.lane.b32.xlu0 %v1055_v34, %s2453_s26  ;;  %v1514_v34 = vmul.f32 %v1513_v32, %v2911_v6  ;;  %v934_v32 = vmul.f32 %v933_v23, %v2969_v58 }
 0x2d3   : > { %v847_v18 = vstv %s2960_s7  ;;  %s3014_s7 = sld [smem:[#allocation11 + $0x2]] }
 0x2d4   : > { %1260 = vrot.lane.b32.xlu1 %v1258_v41, %s2453_s26  ;;  %v1115_v41 = vstv %s1931_s5  ;;  %s2979_s5 = sld [smem:[#allocation9 + $0xf]] }
 0x2d5   : > { %1463 = vrot.lane.b32.xlu0 %v1461_v43, %s2453_s26 }
 0x2d8   : > { %1065 = vrot.lane.b32.xlu1 %v1063_v47, %s2452_s3  ;;  %v1116_v47 = vmul.f32 %v1115_v41, %v2903_v62 }
 0x2d9   : > { %1268 = vrot.lane.b32.xlu0 %v1266_v48, %s2452_s3  ;;  %v810_v48 = vstv %s2932_s6  ;;  %s2983_s6 = sld [smem:[#allocation11 + $0x1]] }
 0x2dc   : > { %1471 = vrot.lane.b32.xlu1 %v1469_v51, %s2452_s3 }
 0x2dd   : > { %1073 = vrot.lane.b32.xlu0 %v1071_v52, %s2454_s10  ;;  %v1521_v52 = vstv %s2939_s21  ;;  %s2995_s21 = sld [smem:[#allocation9 + $0x196]] }
 0x2de   : > { %v1522_v57 = vmul.f32 %v1521_v52, %v2911_v6 }
 0x2e0   : > { %1276 = vrot.lane.b32.xlu1 %v1274_v55, %s2454_s10  ;;  %v811_v55 = vmul.f32 %v810_v48, %v2793_v19  ;;  %v884_v48 = vstv %s2979_s5  ;;  %s3052_s5 = sld [smem:[#allocation9 + $0x118]] }
 0x2e1   : > { %1479 = vrot.lane.b32.xlu0 %v1477_v56, %s2454_s10  ;;  %v1319_v56 = vmul.f32 %v1318_v49, %v2909_v3 }
 0x2e3   : > { %v1542_v41 = vstv %s2995_s21  ;;  %s1917_s21 = sld [smem:[#allocation9 + $0x85]] }
 0x2e4   : > { %1081 = vrot.lane.b32.xlu1 %v1079_v59, %s2455_s17  ;;  %v925_v59 = vstv %s2945_s29  ;;  %s2998_s29 = sld [smem:[#allocation9 + $0x100]] }
 0x2e5   : > { %1284 = vrot.lane.b32.xlu0 %v1282_v60, %s2455_s17  ;;  %v926_v4 = vmul.f32 %v925_v59, %v2969_v58 }
 0x2e8   : > { %1487 = vrot.lane.b32.xlu1 %v1485_v0, %s2455_s17  ;;  %v1128_v0 = vstv %s2947_s30  ;;  %s3002_s30 = sld [smem:[#allocation9 + $0x180]] }
 0x2e9   : > { %1094 = vrot.lane.b32.xlu0 %v1092_v2, %s2453_s26  ;;  %v1129_v8 = vmul.f32 %v1128_v0, %v2974_v63 }
 0x2ec   : > { %1297 = vrot.lane.b32.xlu1 %v1295_v11, %s2453_s26  ;;  %v2987_v11 = vld [vmem:[#allocation2 + $0x24] sm:$0xff] }
 0x2ed   : > { %1500 = vrot.lane.b32.xlu0 %v1498_v12, %s2453_s26  ;;  %v1331_v12 = vstv %s2955_s18  ;;  %s3008_s18 = sld [smem:[#allocation9 + $0x17]] }
 0x2f0   : > { %899 = vrot.lane.b32.xlu1 %v897_v15, %s2452_s3  ;;  %v2992_v15 = vld [vmem:[#allocation2 + $0x34] sm:$0xff] }
 0x2f1   : > { %1102 = vrot.lane.b32.xlu0 %v1100_v16, %s2452_s3  ;;  %v1534_v16 = vstv %s2958_s14  ;;  %s3012_s14 = sld [smem:[#allocation9 + $0x97]]  ;;  %v1543_v49 = vmul.f32 %v1542_v41, %v2992_v15 }
 0x2f2   : > { %v765_v24 = vpop.permute.xlu0 %764  ;;  %v1535_v22 = vmul.f32 %v1534_v16, %v2992_v15 }
 0x2f3   : > { %768 = vst.msk [vmem:[%s2703_s0] sm:$0xff] %vm767_vm5, %v765_v24  ;;  %v976_v24 = vstv %s2972_s9  ;;  %s3025_s9 = sld [smem:[#allocation9 + $0x117]] }
 0x2f4   : > { %1305 = vrot.lane.b32.xlu1 %v1303_v20, %s2452_s3 }
 0x2f5   : > { %1508 = vrot.lane.b32.xlu0 %v1506_v21, %s2452_s3  ;;  %v1332_v21 = vmul.f32 %v1331_v12, %v2987_v11 }
 0x2f8   : > { %907 = vrot.lane.b32.xlu1 %v905_v26, %s2454_s10  ;;  %v848_v26 = vmul.f32 %v847_v18, %v2781_v9 }
 0x2f9   : > { %1110 = vrot.lane.b32.xlu0 %v1108_v28, %s2454_s10  ;;  %v1136_v28 = vstv %s2977_s13  ;;  %s3028_s13 = sld [smem:[#allocation9 + $0x197]] }
 0x2fa   : > { %v789_v40 = vpop.permute.xlu1 %788  ;;  %v1137_v9 = vmul.f32 %v1136_v28, %v2974_v63 }
 0x2fb   : > { %v781_v43 = vpop.permute.xlu0 %780 }
 0x2fc   : > { %v783_v45 = vadd.f32 %v781_v43, %v775_v33  ;;  %1313 = vrot.lane.b32.xlu1 %v1311_v10, %s2454_s10  ;;  %v977_v33 = vmul.f32 %v976_v24, %v2813_v38  ;;  %v973_v10 = vstv %s2983_s6  ;;  %v1179_v43 = vstv %s2998_s29  ;;  %s3042_s6 = sld [smem:[#allocation9 + $0x98]] }
 0x2fd   : > { %1516 = vrot.lane.b32.xlu0 %v1514_v34, %s2454_s10  ;;  %v1339_v34 = vstv %s2990_s16  ;;  %s3056_s16 = sld [smem:[#allocation9 + $0x198]] }
 0x2fe   : > { %v797_v50 = vpop.permute.xlu1 %796  ;;  %v791_v51 = vadd.f32 %v789_v40, %v783_v45  ;;  %s1946_s29 = sld [smem:[#allocation9 + $0x105]] }
 0x2ff   : > { %v805_v53 = vpop.permute.xlu0 %804 }
 0x300   : > { %v799_v54 = vadd.f32 %v797_v50, %v791_v51  ;;  %915 = vrot.lane.b32.xlu1 %v913_v46, %s2455_s17  ;;  %v978_v46 = vadd.f32 %v977_v33, %v973_v10  ;;  %v941_v50 = vstv %s3008_s18  ;;  %s1980_s18 = sld [smem:[#allocation9 + $0x18a]] }
 0x301   : > { %1118 = vrot.lane.b32.xlu0 %v1116_v47, %s2455_s17  ;;  %v1340_v47 = vmul.f32 %v1339_v34, %v2987_v11  ;;  %v942_v0 = vmul.f32 %v941_v50, %v2969_v58 }
 0x302   : > { %v807_v60 = vadd.f32 %v805_v53, %v799_v54  ;;  %v818_v61 = vpop.permute.xlu1 %817  ;;  %v1180_v53 = vmul.f32 %v1179_v43, %v2819_v42  ;;  %v1382_v54 = vstv %s3002_s30  ;;  %v1152_v24 = vstv %s3042_s6  ;;  %s1975_s30 = sld [smem:[#allocation9 + $0x185]]  ;;  %s1998_s6 = sshll.u32 %s2427_s25, 4 }
 0x303   : > { %v826_v19 = vpop.permute.xlu0 %825  ;;  %v1383_v42 = vmul.f32 %v1382_v54, %v2821_v44  ;;  %v1013_v43 = vstv %s1917_s21  ;;  %s1589_s21 = sshll.u32 %s2703_s0, 4  ;;  %s3116_s21 = int_to_ptr.vmem [resolvable:$true] %s1589_s21 }
 0x304   : > { %v812_v2 = vadd.f32 %v811_v55, %v807_v60  ;;  %1321 = vrot.lane.b32.xlu1 %v1319_v56, %s2455_s17  ;;  %v1144_v55 = vstv %s3012_s14  ;;  %v885_v60 = vmul.f32 %v884_v48, %v2811_v36  ;;  %v1379_v36 = vstv %s3019_s12  ;;  %s1956_s14 = sld [smem:[#allocation9 + $0x10f]] }
 0x305   : > { %1524 = vrot.lane.b32.xlu0 %v1522_v57, %s2455_s17  ;;  %v1176_v57 = vstv %s3014_s7  ;;  %v1014_v48 = vmul.f32 %v1013_v43, %v2843_v1  ;;  %v1216_v50 = vstv %s1946_s29  ;;  %s1985_s7 = sld [smem:[#allocation9 + $0x18f]] }
 0x306   : > { %v820_v13 = vadd.f32 %v818_v61, %v812_v2  ;;  %v834_v14 = vpop.permute.xlu1 %833  ;;  %v1347_v2 = vstv %s3025_s9  ;;  %s1903_s12 = sld [smem:[#allocation9 + $0x14]] }
 0x307   : > { %v842_v17 = vpop.permute.xlu0 %841  ;;  %v1348_v44 = vmul.f32 %v1347_v2, %v2987_v11  ;;  %s1932_s9 = sld [smem:[#allocation9 + $0x94]] }
 0x308   : > { %v828_v20 = vadd.f32 %v826_v19, %v820_v13  ;;  %928 = vrot.lane.b32.xlu1 %v926_v4, %s2453_s26  ;;  %v1145_v19 = vmul.f32 %v1144_v55, %v2974_v63  ;;  %v1550_v13 = vstv %s3028_s13  ;;  %s1961_s13 = sld [smem:[#allocation9 + $0x114]] }
 0x309   : > { %1131 = vrot.lane.b32.xlu0 %v1129_v8, %s2453_s26  ;;  %v1181_v8 = vadd.f32 %v1180_v53, %v1176_v57  ;;  %v1551_v18 = vmul.f32 %v1550_v13, %v2992_v15 }
 0x30a   : > { %v836_v25 = vadd.f32 %v834_v14, %v828_v20  ;;  %v855_v27 = vpop.permute.xlu1 %854 }
 0x30b   : > { %v863_v29 = vpop.permute.xlu0 %862 }
 0x30c   : > { %v844_v30 = vadd.f32 %v842_v17, %v836_v25  ;;  %1334 = vrot.lane.b32.xlu1 %v1332_v21, %s2453_s26  ;;  %v1384_v17 = vadd.f32 %v1383_v42, %v1379_v36 }
 0x30d   : > { %1537 = vrot.lane.b32.xlu0 %v1535_v22, %s2453_s26  ;;  %s3037_s26 = sld [smem:[#allocation9 + $0x18]] }
 0x30e   : > { %v849_v37 = vadd.f32 %v848_v26, %v844_v30  ;;  %v871_v40 = vpop.permute.xlu1 %870  ;;  %v1153_v30 = vmul.f32 %v1152_v24, %v2974_v63 }
 0x30f   : > { %v879_v38 = vpop.permute.xlu0 %878 }
 0x310   : > { %v857_v45 = vadd.f32 %v855_v27, %v849_v37  ;;  %936 = vrot.lane.b32.xlu1 %v934_v32, %s2452_s3  ;;  %v1355_v32 = vstv %s3052_s5  ;;  %s1586_s5 = sadd.s32 %s2423_s24, %s1998_s6  ;;  %s3124_s24 = scalar_lea.sflag [#allocation5], %s303_s15 }
 0x311   : > { %1139 = vrot.lane.b32.xlu0 %v1137_v9, %s2452_s3  ;;  %v1558_v9 = vstv %s3056_s16  ;;  %s1999_s16 = sshll.u32 %s1586_s5, 7 }
 0x312   : > { %v865_v51 = vadd.f32 %v863_v29, %v857_v45  ;;  %v892_v52 = vpop.permute.xlu1 %891  ;;  %v1559_v41 = vmul.f32 %v1558_v9, %v2992_v15 }
 0x313   : > { %v984_v56 = vpop.permute.xlu0 %983  ;;  %v949_v20 = vstv %s3037_s26  ;;  %s1990_s26 = sld [smem:[#allocation9 + $0x194]] }
 0x314   : > { %v873_v59 = vadd.f32 %v871_v40, %v865_v51  ;;  %v986_v61 = vadd.f32 %v984_v56, %v978_v46  ;;  %1342 = vrot.lane.b32.xlu1 %v1340_v47, %s2452_s3  ;;  %v950_v28 = vmul.f32 %v949_v20, %v2969_v58  ;;  %v1356_v40 = vmul.f32 %v1355_v32, %v2987_v11 }
 0x315   : > { %1545 = vrot.lane.b32.xlu0 %v1543_v49, %s2452_s3  ;;  %v1419_v51 = vstv %s1975_s30  ;;  %v1217_v56 = vmul.f32 %v1216_v50, %v2849_v5 }
 0x316   : > { %v881_v4 = vadd.f32 %v879_v38, %v873_v59  ;;  %v1187_v12 = vpop.permute.xlu1 %1186  ;;  %v1420_v57 = vmul.f32 %v1419_v51, %v2851_v7 }
 0x317   : > { %v1390_v14 = vpop.permute.xlu0 %1389  ;;  %v1189_v22 = vadd.f32 %v1187_v12, %v1181_v8 }
 0x318   : > { %v886_v16 = vadd.f32 %v885_v60, %v881_v4  ;;  %944 = vrot.lane.b32.xlu1 %v942_v0, %s2454_s10  ;;  %v1392_v29 = vadd.f32 %v1390_v14, %v1384_v17 }
 0x319   : > { %1147 = vrot.lane.b32.xlu0 %v1145_v19, %s2454_s10 }
 0x31a   : > { %v3063_v21 = vadd.f32 %v892_v52, %v886_v16  ;;  %v992_v23 = vpop.permute.xlu1 %991 }
 0x31b   : > { %v994_v25 = vadd.f32 %v992_v23, %v986_v61  ;;  %v1195_v26 = vpop.permute.xlu0 %1194 }
 0x31c   : > { %v1197_v27 = vadd.f32 %v1195_v26, %v1189_v22  ;;  %1350 = vrot.lane.b32.xlu1 %v1348_v44, %s2454_s10 }
 0x31d   : > { %1553 = vrot.lane.b32.xlu0 %v1551_v18, %s2454_s10  ;;  %s1922_s10 = sld [smem:[#allocation9 + $0x8a]] }
 0x31e   : > { %v1398_v33 = vpop.permute.xlu1 %1397 }
 0x31f   : > { %v1400_v10 = vadd.f32 %v1398_v33, %v1392_v29  ;;  %v1000_v34 = vpop.permute.xlu0 %999  ;;  %v1456_v33 = vstv %s1980_s18  ;;  %s2456_s18 = smov [#allocation14]  }
 0x320   : > { %v1002_v37 = vadd.f32 %v1000_v34, %v994_v25  ;;  %952 = vrot.lane.b32.xlu1 %v950_v28, %s2455_s17  ;;  %v1457_v43 = vmul.f32 %v1456_v33, %v2881_v39 }
 0x321   : > { %1155 = vrot.lane.b32.xlu0 %v1153_v30, %s2455_s17 }
 0x322   : > { %v1203_v38 = vpop.permute.xlu1 %1202 }
 0x323   : > { %v1205_v45 = vadd.f32 %v1203_v38, %v1197_v27  ;;  %v1406_v46 = vpop.permute.xlu0 %1405  ;;  %v1050_v23 = vstv %s1922_s10  ;;  %s3216_s10 = sld [smem:[#allocation29_spill]] }
 0x324   : > { %v1408_v47 = vadd.f32 %v1406_v46, %v1400_v10  ;;  %1358 = vrot.lane.b32.xlu1 %v1356_v40, %s2455_s17  ;;  %v1051_v29 = vmul.f32 %v1050_v23, %v2873_v31 }
 0x325   : > { %1561 = vrot.lane.b32.xlu0 %v1559_v41, %s2455_s17  ;;  %s1951_s17 = sld [smem:[#allocation9 + $0x10a]] }
 0x326   : > { %v1008_v49 = vpop.permute.xlu1 %1007 }
 0x327   : > { %v1010_v52 = vadd.f32 %v1008_v49, %v1002_v37  ;;  %v1211_v53 = vpop.permute.xlu0 %1210 }
 0x328   : > { %v1213_v54 = vadd.f32 %v1211_v53, %v1205_v45  ;;  %967 = vrot.lane.b32.xlu1 %v2873_v31, %s2452_s3 }
 0x329   : > { %v1015_v55 = vadd.f32 %v1014_v48, %v1010_v52  ;;  %1170 = vrot.lane.b32.xlu0 %v2879_v35, %s2452_s3  ;;  %s3114_s25 = scalar_lea.hbm %s3216_s10, %s1999_s16 }
 0x32a   : > { %v1414_v59 = vpop.permute.xlu1 %1413  ;;  %v1218_v0 = vadd.f32 %v1217_v56, %v1213_v54  ;;  %v1290_v54 = vstv %s1956_s14 }
 0x32b   : > { %v1416_v60 = vadd.f32 %v1414_v59, %v1408_v47  ;;  %v1021_v1 = vpop.permute.xlu0 %1020  ;;  %v1253_v30 = vstv %s1951_s17  ;;  %s2303_s17 = scalar_lea.vmem %s3116_s21, 1024 }
 0x32c   : > { %v1023_v61 = vadd.f32 %v1021_v1, %v1015_v55  ;;  %1373 = vrot.lane.b32.xlu1 %v2881_v39, %s2452_s3  ;;  %s1927_s3 = sld [smem:[#allocation9 + $0x8f]]  ;;  %v1254_v40 = vmul.f32 %v1253_v30, %v2879_v35  ;;  %v1291_v39 = vmul.f32 %v1290_v54, %v2909_v3  ;;  %v1493_v1 = vstv %s1985_s7  ;;  %p2304_p10 = scmp.ne.s32.totalorder %s3116_s21, %s2303_s17 }
 0x32d   : > { %v1421_v42 = vadd.f32 %v1420_v57, %v1416_v60 }
 0x32e   : > { %v1224_v19 = vpop.permute.xlu1 %1223  ;;  %p2305_p11 = pnand %p2304_p10, %p2560_p6 }
 0x32f   : > { %v1226_v2 = vadd.f32 %v1224_v19, %v1218_v0  ;;  %v1427_v4 = vpop.permute.xlu0 %1426 }
 0x330   : > { %v1429_v8 = vadd.f32 %v1427_v4, %v1421_v42  ;;  %p2306_p13 = pneg %p2305_p11 }
 0x332   : > { %v1029_v12 = vpop.permute.xlu1 %1028  ;;  %v1087_v51 = vstv %s1927_s3  ;;  %s2307_s3 = sshll.u32 %s2456_s18, 4  ;;  %s2308_s3 = int_to_ptr.vmem [resolvable:$false] %s2307_s3 }
 0x333   : > { %v1232_v5 = vpop.permute.xlu0 %1231  ;;  %v1031_v22 = vadd.f32 %v1029_v12, %v1023_v61  ;;  %v1088_v35 = vmul.f32 %v1087_v51, %v2903_v62  ;;  %s2309_s14 = scalar_lea.vmem %s2308_s3, 2048  ;;  %p2310_p12 = scmp.lt.s32.totalorder %s3116_s21, %s2308_s3 }
 0x334   : > { %v1234_v36 = vadd.f32 %v1232_v5, %v1226_v2  ;;  %p2311_p2 = scmp.lt.s32.totalorder %s2309_s14, %s2303_s17 }
 0x336   : > { %v1435_v7 = vpop.permute.xlu1 %1434  ;;  %p2312_p0 = por %p2311_p2, %p2310_p12 }
 0x337   : > { %v1037_v13 = vpop.permute.xlu0 %1036  ;;  %v1437_v27 = vadd.f32 %v1435_v7, %v1429_v8  ;;  %v1494_v8 = vmul.f32 %v1493_v1, %v2911_v6  ;;  %v921_v6 = vstv %s1903_s12 }
 0x338   : > { %v1039_v25 = vadd.f32 %v1037_v13, %v1031_v22  ;;  %v922_v30 = vmul.f32 %v921_v6, %v2969_v58  ;;  %p2313_p3 = pnand %p2312_p0, %p2306_p13 }
 0x33a   : > { %v1240_v14 = vpop.permute.xlu1 %1239 }
 0x33b   : > { %v1443_v16 = vpop.permute.xlu0 %1442  ;;  %v1242_v32 = vadd.f32 %v1240_v14, %v1234_v36 }
 0x33c   : > { %v1445_v10 = vadd.f32 %v1443_v16, %v1437_v27 }
 0x33e   : > { %v1045_v44 = vpop.permute.xlu1 %1044 }
 0x33f   : > { %v1248_v17 = vpop.permute.xlu0 %1247  ;;  %v1047_v28 = vadd.f32 %v1045_v44, %v1039_v25 }
 0x340   : > { %v1250_v37 = vadd.f32 %v1248_v17, %v1242_v32 }
 0x341   : > { %v1052_v38 = vadd.f32 %v1051_v29, %v1047_v28 }
 0x342   : > { %v1451_v18 = vpop.permute.xlu1 %1450  ;;  %v1255_v47 = vadd.f32 %v1254_v40, %v1250_v37 }
 0x343   : > { %v1058_v20 = vpop.permute.xlu0 %1057  ;;  %v1453_v41 = vadd.f32 %v1451_v18, %v1445_v10 }
 0x344   : > { %v1060_v31 = vadd.f32 %v1058_v20, %v1052_v38  ;;  %v1530_v38 = vstv %s1990_s26 }
 0x345   : > { %v1458_v48 = vadd.f32 %v1457_v43, %v1453_v41  ;;  %v1531_v58 = vmul.f32 %v1530_v38, %v2992_v15 }
 0x346   : > { %v1261_v24 = vpop.permute.xlu1 %1260 }
 0x347   : > { %v1464_v26 = vpop.permute.xlu0 %1463  ;;  %v1263_v49 = vadd.f32 %v1261_v24, %v1255_v47 }
 0x348   : > { %v1466_v56 = vadd.f32 %v1464_v26, %v1458_v48  ;;  %v1124_v26 = vstv %s1932_s9 }
 0x349   : > { %v1125_v10 = vmul.f32 %v1124_v26, %v2974_v63 }
 0x34a   : > { %v1066_v9 = vpop.permute.xlu1 %1065 }
 0x34b   : > { %v1269_v34 = vpop.permute.xlu0 %1268  ;;  %v1068_v52 = vadd.f32 %v1066_v9, %v1060_v31 }
 0x34c   : > { %v1271_v55 = vadd.f32 %v1269_v34, %v1263_v49  ;;  %v1327_v34 = vstv %s1961_s13 }
 0x34d   : > { %v1328_v47 = vmul.f32 %v1327_v34, %v2987_v11 }
 0x34e   : > { %v1472_v45 = vpop.permute.xlu1 %1471 }
 0x34f   : > { %v1074_v46 = vpop.permute.xlu0 %1073  ;;  %v1474_v61 = vadd.f32 %v1472_v45, %v1466_v56 }
 0x350   : > { %v1076_v57 = vadd.f32 %v1074_v46, %v1068_v52 }
 0x352   : > { %v1277_v50 = vpop.permute.xlu1 %1276 }
 0x353   : > { %v1480_v53 = vpop.permute.xlu0 %1479  ;;  %v1279_v59 = vadd.f32 %v1277_v50, %v1271_v55 }
 0x354   : > { %v1482_v2 = vadd.f32 %v1480_v53, %v1474_v61 }
 0x356   : > { %v1082_v60 = vpop.permute.xlu1 %1081 }
 0x357   : > { %v1084_v0 = vadd.f32 %v1082_v60, %v1076_v57  ;;  %v1285_v42 = vpop.permute.xlu0 %1284 }
 0x358   : > { %v1287_v19 = vadd.f32 %v1285_v42, %v1279_v59 }
 0x359   : > { %v1089_v4 = vadd.f32 %v1088_v35, %v1084_v0 }
 0x35a   : > { %v1488_v12 = vpop.permute.xlu1 %1487  ;;  %v1292_v5 = vadd.f32 %v1291_v39, %v1287_v19 }
 0x35b   : > { %v1490_v36 = vadd.f32 %v1488_v12, %v1482_v2  ;;  %v1095_v7 = vpop.permute.xlu0 %1094 }
 0x35c   : > { %v1097_v22 = vadd.f32 %v1095_v7, %v1089_v4 }
 0x35d   : > { %v1495_v13 = vadd.f32 %v1494_v8, %v1490_v36 }
 0x35e   : > { %v1298_v14 = vpop.permute.xlu1 %1297 }
 0x35f   : > { %v1501_v62 = vpop.permute.xlu0 %1500  ;;  %v1300_v28 = vadd.f32 %v1298_v14, %v1292_v5 }
 0x360   : > { %v1503_v32 = vadd.f32 %v1501_v62, %v1495_v13 }
 0x362   : > { %v900_v16 = vpop.permute.xlu1 %899 }
 0x363   : > { %v1103_v44 = vpop.permute.xlu0 %1102  ;;  %v902_v24 = vadd.f32 %v900_v16, %v3063_v21 }
 0x364   : > { %v1105_v27 = vadd.f32 %v1103_v44, %v1097_v22 }
 0x366   : > { %v1306_v17 = vpop.permute.xlu1 %1305 }
 0x367   : > { %v1509_v3 = vpop.permute.xlu0 %1508  ;;  %v1308_v37 = vadd.f32 %v1306_v17, %v1300_v28 }
 0x368   : > { %v1511_v43 = vadd.f32 %v1509_v3, %v1503_v32 }
 0x36a   : > { %v908_v18 = vpop.permute.xlu1 %907 }
 0x36b   : > { %v1111_v20 = vpop.permute.xlu0 %1110  ;;  %v910_v29 = vadd.f32 %v908_v18, %v902_v24 }
 0x36c   : > { %v1113_v33 = vadd.f32 %v1111_v20, %v1105_v27 }
 0x36e   : > { %v1314_v23 = vpop.permute.xlu1 %1313 }
 0x36f   : > { %v1517_v25 = vpop.permute.xlu0 %1516  ;;  %v1316_v21 = vadd.f32 %v1314_v23, %v1308_v37 }
 0x370   : > { %v1519_v31 = vadd.f32 %v1517_v25, %v1511_v43 }
 0x372   : > { %v916_v9 = vpop.permute.xlu1 %915 }
 0x373   : > { %v918_v40 = vadd.f32 %v916_v9, %v910_v29  ;;  %v1119_v41 = vpop.permute.xlu0 %1118 }
 0x374   : > { %v1121_v45 = vadd.f32 %v1119_v41, %v1113_v33 }
 0x375   : > { %v923_v46 = vadd.f32 %v922_v30, %v918_v40 }
 0x376   : > { %v1322_v48 = vpop.permute.xlu1 %1321  ;;  %v1126_v49 = vadd.f32 %v1125_v10, %v1121_v45 }
 0x377   : > { %v1324_v50 = vadd.f32 %v1322_v48, %v1316_v21  ;;  %v1525_v51 = vpop.permute.xlu0 %1524 }
 0x378   : > { %v1527_v52 = vadd.f32 %v1525_v51, %v1519_v31 }
 0x379   : > { %v1329_v63 = vadd.f32 %v1328_v47, %v1324_v50 }
 0x37a   : > { %v929_v53 = vpop.permute.xlu1 %928  ;;  %v1532_v54 = vadd.f32 %v1531_v58, %v1527_v52 }
 0x37b   : > { %v1132_v55 = vpop.permute.xlu0 %1131  ;;  %v931_v61 = vadd.f32 %v929_v53, %v923_v46 }
 0x37c   : > { %v1134_v0 = vadd.f32 %v1132_v55, %v1126_v49 }
 0x37e   : > { %v1335_v56 = vpop.permute.xlu1 %1334 }
 0x37f   : > { %v1538_v57 = vpop.permute.xlu0 %1537  ;;  %v1337_v4 = vadd.f32 %v1335_v56, %v1329_v63 }
 0x380   : > { %v1540_v12 = vadd.f32 %v1538_v57, %v1532_v54 }
 0x382   : > { %v937_v35 = vpop.permute.xlu1 %936 }
 0x383   : > { %v1140_v59 = vpop.permute.xlu0 %1139  ;;  %v939_v19 = vadd.f32 %v937_v35, %v931_v61 }
 0x384   : > { %v1142_v2 = vadd.f32 %v1140_v59, %v1134_v0 }
 0x386   : > { %v1343_v60 = vpop.permute.xlu1 %1342 }
 0x387   : > { %v1546_v39 = vpop.permute.xlu0 %1545  ;;  %v1345_v7 = vadd.f32 %v1343_v60, %v1337_v4 }
 0x388   : > { %v1548_v62 = vadd.f32 %v1546_v39, %v1540_v12 }
 0x38a   : > { %v945_v1 = vpop.permute.xlu1 %944 }
 0x38b   : > { %v1148_v11 = vpop.permute.xlu0 %1147  ;;  %v947_v8 = vadd.f32 %v945_v1, %v939_v19 }
 0x38c   : > { %v1150_v5 = vadd.f32 %v1148_v11, %v1142_v2 }
 0x38e   : > { %v1351_v42 = vpop.permute.xlu1 %1350 }
 0x38f   : > { %v1554_v15 = vpop.permute.xlu0 %1553  ;;  %v1353_v44 = vadd.f32 %v1351_v42, %v1345_v7 }
 0x390   : > { %v1556_v3 = vadd.f32 %v1554_v15, %v1548_v62 }
 0x392   : > { %v953_v36 = vpop.permute.xlu1 %952 }
 0x393   : > { %v955_v13 = vadd.f32 %v953_v36, %v947_v8  ;;  %v1156_v14 = vpop.permute.xlu0 %1155 }
 0x394   : > { %v1158_v16 = vadd.f32 %v1156_v14, %v1150_v5 }
 0x395   : > { %v1908_v17 = vmul.f32 -1.442695, %v955_v13 }
 0x396   : > { %v1937_v18 = vmul.f32 -1.442695, %v1158_v16  ;;  %v1359_v20 = vpop.permute.xlu1 %1358 }
 0x397   : > { %2207 = vpow2.f32 %v1908_v17  ;;  %v1361_v22 = vadd.f32 %v1359_v20, %v1353_v44  ;;  %v1562_v23 = vpop.permute.xlu0 %1561 }
 0x398   : > { %2209 = vpow2.f32 %v1937_v18  ;;  %v1564_v6 = vadd.f32 %v1562_v23, %v1556_v3 }
 0x399   : > { %v1966_v24 = vmul.f32 -1.442695, %v1361_v22 }
 0x39a   : > { %v1995_v25 = vmul.f32 -1.442695, %v1564_v6  ;;  %v968_v26 = vpop.permute.xlu1 %967 }
 0x39b   : > { %2211 = vpow2.f32 %v1966_v24  ;;  %1910 = vst.msk [vmem:[%s2703_s0 + $0x20] sm:$0xff] %vm767_vm5, %v968_v26  ;;  %v1171_v27 = vpop.permute.xlu0 %1170 }
 0x39c   : > { %2213 = vpow2.f32 %v1995_v25  ;;  %1939 = vst.msk [vmem:[%s2703_s0 + $0x8] sm:$0xff] %vm767_vm5, %v1171_v27 }
 0x39e   : > { %v1374_v28 = vpop.permute.xlu1 %1373 }
 0x39f   : > { %1968 = vst.msk [vmem:[%s2703_s0 + $0x28] sm:$0xff] %vm767_vm5, %v1374_v28 }
 0x3a4   : > { %v2208_v29 = vpop.eup %2207 }
 0x3a5   : > { %v2210_v30 = vpop.eup %2209  ;;  %v959_v32 = vadd.f32 1.0, %v2208_v29 }
 0x3a6   : > { %v1162_v33 = vadd.f32 1.0, %v2210_v30 }
 0x3a7   : > { %2215 = vrcp.f32 %v959_v32 }
 0x3a8   : > { %v2212_v9 = vpop.eup %2211  ;;  %2217 = vrcp.f32 %v1162_v33 }
 0x3a9   : > { %v2214_v10 = vpop.eup %2213  ;;  %v1365_v34 = vadd.f32 1.0, %v2212_v9 }
 0x3aa   : > { %v1568_v37 = vadd.f32 1.0, %v2214_v10 }
 0x3ab   : > { %2219 = vrcp.f32 %v1365_v34 }
 0x3ac   : > { %2221 = vrcp.f32 %v1568_v37 }
 0x3b4   : > { %v2216_v40 = vpop.eup %2215 }
 0x3b5   : > { %v2218_v41 = vpop.eup %2217  ;;  %v962_v38 = vmul.f32 %v2216_v40, %v955_v13 }
 0x3b6   : > { %v1165_v43 = vmul.f32 %v2218_v41, %v1158_v16 }
 0x3b7   : > { %1909 = vst.msk [vmem:[%s2703_s0 + $0x10] sm:$0xff] %vm767_vm5, %v962_v38 }
 0x3b8   : > { %v2220_v45 = vpop.eup %2219  ;;  %1938 = vst.msk [vmem:[%s2703_s0 + $0x30] sm:$0xff] %vm767_vm5, %v1165_v43 }
 0x3b9   : > { %v2222_v21 = vpop.eup %2221  ;;  %v1368_v46 = vmul.f32 %v2220_v45, %v1361_v22 }
 0x3ba   : > { %v1571_v47 = vmul.f32 %v2222_v21, %v1564_v6 }
 0x3bb   : > { %1967 = vst.msk [vmem:[%s2703_s0 + $0x18] sm:$0xff] %vm767_vm5, %v1368_v46 }
 0x3bc   : > { %1996 = vst.msk [vmem:[%s2703_s0 + $0x38] sm:$0xff] %vm767_vm5, %v1571_v47 }
 0x3bd   : > { %2316 = shalt.err (!%p2313_p3)
}
 0x3be   : > { %s2317_s15 = scalar_lea.hbm %s3114_s25, 1024  ;;  %s2321_s12 = scalar_lea.hbm %s3216_s10, 4096 }
 0x3bf   : > { %p2318_p7 = scmp.ne.s32.totalorder %s3114_s25, %s2317_s15  ;;  %p2322_p5 = scmp.lt.s32.totalorder %s3114_s25, %s3216_s10 }
 0x3c0   : > { %p2323_p1 = scmp.lt.s32.totalorder %s2321_s12, %s2317_s15 }
 0x3c1   : > { %p2319_p8 = pnand %p2318_p7, %p2560_p6 }
 0x3c2   : > { %p2324_p4 = por %p2323_p1, %p2322_p5 }
 0x3c3   : > { %p2320_p9 = pneg %p2319_p8 }
 0x3c5   : > { %p2325_p10 = pnand %p2324_p4, %p2320_p9 }
 0x3c7   : > { %2328 = shalt.err (!%p2325_p10)
}
 0x3c8   : > { %s2457_s26 = smov 128   ;;  %s2458_s6 = smov 256  }
 0x3c9   : > { %s2459_s5 = smov 8  }
 0x3ca   : > { %2021 = dma.vmem_to_hbm [thread:$0]  (%p2560_p6), %s3116_s21, 1024, %s3114_s25, %s3124_s24, %s2457_s26, %s2458_s6, %s2459_s5  }
 0x3cb PF: > { %s3217_s16 = sld [smem:[#allocation21_spill]]  ;;  %p2053_p11 = scmp.ge.s32.totalorder %s2439_s28, 2 }
 0x3cc   : > { %s3218_s29 = sld [smem:[#allocation23_spill]] }
 0x3d1   : > { %s1604_s30 = sand.u32 1, %s3217_s16  }
 0x3d2   : > { %p3219_p13 = scmp.ne.s32.totalorder %s3218_s29, 0  ;;  %s1605_s17 = scalar_lea.sflag [#allocation5], %s1604_s30 }
 0x3d4   : > { %p2041_p12 = pnand %p2053_p11, %p3219_p13 }
 0x3d6   : > { %p2042_p2 = pneg %p2041_p12 }
 0x3d8   : > { %2394 = dma.done.wait (%p2042_p2), %s1605_s17, 1024  }
 0x3d9   : > { %2396 = vsyncadd (%p2042_p2), %s1605_s17, 4294966272  ;;  %s25_s28 = sadd.s32 1, %s2439_s28   ;;  %s3220_s24 = sld [smem:[#allocation22_spill]] }
 0x3da   : > { %p22_p0 = scmp.ge.s32.totalorder %s25_s28, 6   ;;  %s3221_s26 = sld [smem:[#allocation24_spill]] }
 0x3db   : > { %s3222_s18 = smov %s2403_s19  ;;  %s3223_s19 = smov %s2407_s20 }
 0x3dc   : > { %s3224_s20 = smov %s2637_s2  ;;  %s3225_s21 = smov %s2415_s22 }
 0x3dd   : > { %s3226_s22 = smov %s2419_s23  ;;  %s3227_s23 = smov %s2634_s1 }
 0x3de   : > { %s3228_s25 = smov %s2435_s27  ;;  %s3229_s27 = smov %s3235_s11 }
 0x3df   :  { %24 = sbr.rel (!%p22_p0) target bundleno = 19 (0x13), region = 133 }
 0x3e4   :  { %1610 = vsyncpa [#allocation4], 1 }
 0x3e5   :  { %1612 = vsyncpa [#allocation4 + $0x1], 1 }
 0x3e6   :  { %1613 = vsyncpa [#allocation5], 1 }
 0x3e7   :  { %1615 = vsyncpa [#allocation5 + $0x1], 1 }
 0x3e8   :  { %1616 = vsyncpa [#allocation6], 1 }
 0x3e9   :  { %1618 = vsyncpa [#allocation6 + $0x1], 1 }
 0x3ea   :  { %1619 = vsyncpa [#allocation10], 1 }
 0x3eb   :  { %1620 = vsyncpa [#allocation7], 1 }
 0x3ec   :  { %1622 = vsyncpa [#allocation7 + $0x1], 1 }
 0x3ed   :  { %1623 = vsyncpa [#allocation12], 1 }

</bundles_post_ra>
